<compile_context>
chip_gen: v6e
topology: v6e:2x2x1
jax: 0.10.0
libtpu: 0.0.40
codegen_flags: <defaults>
</compile_context>

<pallas_src>
import numpy as np

import jax
import jax.numpy as jnp
from jax.experimental import pallas as pl
from jax.experimental.pallas import tpu as pltpu

C1 = 0.01 ** 2
C2 = 0.03 ** 2
LANES = 128


def _cdiv(a, b):
    return -(-a // b)


def _ssim_kernel(x_ref, y_ref, o_ref):
    """One (TH, W, cb) output strip from (TH+2, W+2, cb) halo'd inputs.

    Both reflection pads (H and W) and the strip halo are baked into the input
    blocks by the wrapper, so this is a pure separable 3x3 box filter + SSIM.
    """
    TH, W, _ = o_ref.shape

    x = x_ref[...]
    y = y_ref[...]

    # Square / cross products once on the padded strip (saves ~6 VALU muls per
    # output element vs squaring each of the three shifted views).
    xx = x * x
    yy = y * y
    xy = x * y

    # ---- W pass: 3-tap row sums via sublane-shifted slices -------------------
    # TODO(synk): if a bundle dump shows Mosaic materializing misaligned copies
    # for these sublane-offset slices, switch to pltpu.roll(..., axis=1).
    def row3(a):
        return a[:, 0:W, :] + a[:, 1:W + 1, :] + a[:, 2:W + 2, :]

    rx, ry = row3(x), row3(y)
    rxx, ryy, rxy = row3(xx), row3(yy), row3(xy)

    # ---- H pass: 3-tap column sums via leading-dim slices (cheap addressing) -
    def col3(r):
        return r[0:TH] + r[1:TH + 1] + r[2:TH + 2]

    sx, sy = col3(rx), col3(ry)
    sxx, syy, sxy = col3(rxx), col3(ryy), col3(rxy)

    inv9 = 1.0 / 9.0
    mu_x = sx * inv9
    mu_y = sy * inv9

    # Hoisted products, reused in sigma_*, numerator and denominator.
    mxx = mu_x * mu_x
    myy = mu_y * mu_y
    mxy = mu_x * mu_y

    sigma_x = sxx * inv9 - mxx
    sigma_y = syy * inv9 - myy
    sigma_xy = sxy * inv9 - mxy

    n = (2.0 * mxy + C1) * (2.0 * sigma_xy + C2)
    d = (mxx + myy + C1) * (sigma_x + sigma_y + C2)

    # EUP reciprocal + one Newton step (~f32 accuracy) instead of a VALU divide.
    r = pl.reciprocal(d, approx=True)
    r = r * (2.0 - d * r)
    o_ref[...] = jnp.clip((1.0 - n * r) * 0.5, 0.0, 1.0)


def _vmem_budget_bytes():
    try:
        cap = pltpu.get_tpu_info().vmem_capacity_bytes
    except Exception:
        cap = 64 * 1024 * 1024  # conservative default (v7x per-core VMEM)
    return int(cap * 3 // 4)    # ~48 MiB on v7x, ~96 MiB on v5e/v6e


def _choose_strip(H, W, cb, n_chan, budget):
    """Pick the strip height TH (output rows per grid step).

    Largest TH that (a) fits the VMEM budget counting 2 inputs x 2 buffers,
    output x 2 buffers and ~12 strip-sized f32 temporaries, and (b) leaves at
    least 2 (ideally >= 8) parallel grid steps so both v7x TensorCores work.
    """
    def step_bytes(th):
        inp = (th + 2) * (W + 2) * cb * 4
        out = th * W * cb * 4
        tmp = th * (W + 2) * cb * 4
        return 2 * 2 * inp + 2 * out + 12 * tmp

    th = max(8, min(256, ((H + 7) // 8) * 8))
    while th > 8 and step_bytes(th) > budget:
        th -= 8
    # Guarantee >= 2 grid steps (megacore) whenever the image allows it.
    while th > 8 and n_chan * _cdiv(H, th) < 2:
        th = ((th // 2 + 7) // 8) * 8
    # Prefer >= 8 steps as long as strips stay reasonably large.
    while th >= 64 and n_chan * _cdiv(H, th) < 8:
        th = max(8, ((th // 2 + 7) // 8) * 8)
    return max(th, 8)


def ssim_pallas(x, y):
    """x, y: (N, C, H, W) float32. Returns the (N, C, H, W) SSIM loss map."""
    N, C, H, W = x.shape
    assert H >= 3 and W >= 3, "SSIM kernel expects spatial dims >= 3"
    NC = N * C
    NCp = max(LANES, ((NC + LANES - 1) // LANES) * LANES)

    # Lane-dense channel block of 128; keeps the channel grid axis maximally
    # parallel and every load/store an unmasked 128-wide vector op.
    cb = LANES
    n_chan = NCp // cb

    budget = _vmem_budget_bytes()
    TH = _choose_strip(H, W, cb, n_chan, budget)
    S = _cdiv(H, TH)
    Hp = S * TH

    # Row-gather indices: fold the H-direction reflection pad AND the 1-row
    # strip halo duplication into a single gather.  Strip s stores padded rows
    # [s*TH - 1, s*TH + TH] of the reflection-padded image; rows past H only
    # feed garbage output rows that are sliced off below.
    p = np.arange(S)[:, None] * TH + np.arange(TH + 2)[None, :] - 1
    p = np.abs(p)                                   # top reflect: -1 -> 1
    p = np.where(p > H - 1, 2 * (H - 1) - p, p)     # bottom reflect: H -> H-2
    p = np.clip(p, 0, H - 1)
    row_idx = jnp.asarray(p.reshape(-1), dtype=jnp.int32)

    # TODO(synk): if the model can supply channels-last tensors directly, drop
    # this transpose/pad copy (it is the dominant wrapper-side HBM traffic).
    # TODO(synk): on v5e, DMA bf16 blocks and upcast in-kernel for extra HBM/VMEM
    # headroom (keep the variance math in f32).
    def to_strips(a):
        a = a.reshape(NC, H, W)
        a = jnp.transpose(a, (1, 2, 0))                              # (H, W, NC)
        a = jnp.pad(a, ((0, 0), (1, 1), (0, 0)), mode="reflect")     # W reflect
        a = jnp.take(a, row_idx, axis=0)                             # (S*(TH+2), W+2, NC)
        if NCp != NC:
            a = jnp.pad(a, ((0, 0), (0, 0), (0, NCp - NC)))          # lane pad
        return a

    xs = to_strips(x)
    ys = to_strips(y)

    out_cl = pl.pallas_call(
        _ssim_kernel,
        out_shape=jax.ShapeDtypeStruct((Hp, W, NCp), x.dtype),
        grid=(S, n_chan),
        in_specs=[
            pl.BlockSpec((TH + 2, W + 2, cb), lambda h, c: (h, 0, c)),
            pl.BlockSpec((TH + 2, W + 2, cb), lambda h, c: (h, 0, c)),
        ],
        out_specs=pl.BlockSpec((TH, W, cb), lambda h, c: (h, 0, c)),
        compiler_params=pltpu.CompilerParams(
            dimension_semantics=("parallel", "parallel"),
            vmem_limit_bytes=budget,
        ),
    )(xs, ys)

    out = jnp.transpose(out_cl[:H, :, :NC], (2, 0, 1)).reshape(N, C, H, W)
    return out


def ssim_reference(x, y):
    """Pure-JAX reference mirroring the PyTorch module semantics."""
    pad_cfg = ((0, 0), (0, 0), (1, 1), (1, 1))
    xp = jnp.pad(x, pad_cfg, mode="reflect")
    yp = jnp.pad(y, pad_cfg, mode="reflect")
    H, W = x.shape[2], x.shape[3]

    def pool(a):
        s = jnp.zeros_like(a[..., :H, :W])
        for di in range(3):
            for dj in range(3):
                s = s + a[..., di:di + H, dj:dj + W]
        return s / 9.0

    mu_x = pool(xp)
    mu_y = pool(yp)
    sigma_x = pool(xp * xp) - mu_x * mu_x
    sigma_y = pool(yp * yp) - mu_y * mu_y
    sigma_xy = pool(xp * yp) - mu_x * mu_y
    n = (2 * mu_x * mu_y + C1) * (2 * sigma_xy + C2)
    d = (mu_x ** 2 + mu_y ** 2 + C1) * (sigma_x + sigma_y + C2)
    return jnp.clip((1 - n / d) / 2, 0.0, 1.0)


if __name__ == "__main__":
    key = jax.random.PRNGKey(0)
    kx, ky = jax.random.split(key)
    N, C, H, W = 2, 4, 16, 16
    x = jax.random.uniform(kx, (N, C, H, W), dtype=jnp.float32)
    y = jax.random.uniform(ky, (N, C, H, W), dtype=jnp.float32)

    out = jax.jit(ssim_pallas)(x, y)
    jax.block_until_ready(out)

    ref = ssim_reference(x, y)
    assert out.shape == (N, C, H, W)
    err = float(jnp.max(jnp.abs(out - ref)))
    assert err < 2e-5, f"mismatch vs reference: max abs err {err}"

    print("KERNEL_OK")
</pallas_src>

<mosaic_0001>
module attributes {stable_mosaic.version = 11 : i64} {
  func.func @_ssim_kernel(%arg0: i32, %arg1: i32, %arg2: memref<10x18x128xf32, #tpu.memory_space<vmem>>, %arg3: memref<10x18x128xf32, #tpu.memory_space<vmem>>, %arg4: memref<8x16x128xf32, #tpu.memory_space<vmem>>) attributes {dimension_semantics = [#tpu.dimension_semantics<parallel>, #tpu.dimension_semantics<parallel>], iteration_bounds = array<i64: 2, 1>, scalar_prefetch = 0 : i64, scratch_operands = 0 : i64, tpu.core_type = #tpu.core_type<tc>, window_params = [{transform_indices = @transform_0, window_bounds = array<i64: 10, 18, 128>}, {transform_indices = @transform_1, window_bounds = array<i64: 10, 18, 128>}, {transform_indices = @transform_2, window_bounds = array<i64: 8, 16, 128>}]} {
    %c0 = arith.constant 0 : index
    %c0_0 = arith.constant 0 : index
    %c0_1 = arith.constant 0 : index
    %0 = vector.load %arg2[%c0, %c0_0, %c0_1] : memref<10x18x128xf32, #tpu.memory_space<vmem>>, vector<10x18x128xf32>
    %c0_2 = arith.constant 0 : index
    %c0_3 = arith.constant 0 : index
    %c0_4 = arith.constant 0 : index
    %1 = vector.load %arg3[%c0_2, %c0_3, %c0_4] : memref<10x18x128xf32, #tpu.memory_space<vmem>>, vector<10x18x128xf32>
    %2 = arith.mulf %0, %0 : vector<10x18x128xf32>
    %3 = arith.mulf %1, %1 : vector<10x18x128xf32>
    %4 = arith.mulf %0, %1 : vector<10x18x128xf32>
    %5 = vector.extract_strided_slice %0 {offsets = [0, 0, 0], sizes = [10, 16, 128], strides = [1, 1, 1]} : vector<10x18x128xf32> to vector<10x16x128xf32>
    %6 = vector.extract_strided_slice %0 {offsets = [0, 1, 0], sizes = [10, 16, 128], strides = [1, 1, 1]} : vector<10x18x128xf32> to vector<10x16x128xf32>
    %7 = arith.addf %5, %6 : vector<10x16x128xf32>
    %8 = vector.extract_strided_slice %0 {offsets = [0, 2, 0], sizes = [10, 16, 128], strides = [1, 1, 1]} : vector<10x18x128xf32> to vector<10x16x128xf32>
    %9 = arith.addf %7, %8 : vector<10x16x128xf32>
    %10 = vector.extract_strided_slice %1 {offsets = [0, 0, 0], sizes = [10, 16, 128], strides = [1, 1, 1]} : vector<10x18x128xf32> to vector<10x16x128xf32>
    %11 = vector.extract_strided_slice %1 {offsets = [0, 1, 0], sizes = [10, 16, 128], strides = [1, 1, 1]} : vector<10x18x128xf32> to vector<10x16x128xf32>
    %12 = arith.addf %10, %11 : vector<10x16x128xf32>
    %13 = vector.extract_strided_slice %1 {offsets = [0, 2, 0], sizes = [10, 16, 128], strides = [1, 1, 1]} : vector<10x18x128xf32> to vector<10x16x128xf32>
    %14 = arith.addf %12, %13 : vector<10x16x128xf32>
    %15 = vector.extract_strided_slice %2 {offsets = [0, 0, 0], sizes = [10, 16, 128], strides = [1, 1, 1]} : vector<10x18x128xf32> to vector<10x16x128xf32>
    %16 = vector.extract_strided_slice %2 {offsets = [0, 1, 0], sizes = [10, 16, 128], strides = [1, 1, 1]} : vector<10x18x128xf32> to vector<10x16x128xf32>
    %17 = arith.addf %15, %16 : vector<10x16x128xf32>
    %18 = vector.extract_strided_slice %2 {offsets = [0, 2, 0], sizes = [10, 16, 128], strides = [1, 1, 1]} : vector<10x18x128xf32> to vector<10x16x128xf32>
    %19 = arith.addf %17, %18 : vector<10x16x128xf32>
    %20 = vector.extract_strided_slice %3 {offsets = [0, 0, 0], sizes = [10, 16, 128], strides = [1, 1, 1]} : vector<10x18x128xf32> to vector<10x16x128xf32>
    %21 = vector.extract_strided_slice %3 {offsets = [0, 1, 0], sizes = [10, 16, 128], strides = [1, 1, 1]} : vector<10x18x128xf32> to vector<10x16x128xf32>
    %22 = arith.addf %20, %21 : vector<10x16x128xf32>
    %23 = vector.extract_strided_slice %3 {offsets = [0, 2, 0], sizes = [10, 16, 128], strides = [1, 1, 1]} : vector<10x18x128xf32> to vector<10x16x128xf32>
    %24 = arith.addf %22, %23 : vector<10x16x128xf32>
    %25 = vector.extract_strided_slice %4 {offsets = [0, 0, 0], sizes = [10, 16, 128], strides = [1, 1, 1]} : vector<10x18x128xf32> to vector<10x16x128xf32>
    %26 = vector.extract_strided_slice %4 {offsets = [0, 1, 0], sizes = [10, 16, 128], strides = [1, 1, 1]} : vector<10x18x128xf32> to vector<10x16x128xf32>
    %27 = arith.addf %25, %26 : vector<10x16x128xf32>
    %28 = vector.extract_strided_slice %4 {offsets = [0, 2, 0], sizes = [10, 16, 128], strides = [1, 1, 1]} : vector<10x18x128xf32> to vector<10x16x128xf32>
    %29 = arith.addf %27, %28 : vector<10x16x128xf32>
    %30 = vector.extract_strided_slice %9 {offsets = [0, 0, 0], sizes = [8, 16, 128], strides = [1, 1, 1]} : vector<10x16x128xf32> to vector<8x16x128xf32>
    %31 = vector.extract_strided_slice %9 {offsets = [1, 0, 0], sizes = [8, 16, 128], strides = [1, 1, 1]} : vector<10x16x128xf32> to vector<8x16x128xf32>
    %32 = arith.addf %30, %31 : vector<8x16x128xf32>
    %33 = vector.extract_strided_slice %9 {offsets = [2, 0, 0], sizes = [8, 16, 128], strides = [1, 1, 1]} : vector<10x16x128xf32> to vector<8x16x128xf32>
    %34 = arith.addf %32, %33 : vector<8x16x128xf32>
    %35 = vector.extract_strided_slice %14 {offsets = [0, 0, 0], sizes = [8, 16, 128], strides = [1, 1, 1]} : vector<10x16x128xf32> to vector<8x16x128xf32>
    %36 = vector.extract_strided_slice %14 {offsets = [1, 0, 0], sizes = [8, 16, 128], strides = [1, 1, 1]} : vector<10x16x128xf32> to vector<8x16x128xf32>
    %37 = arith.addf %35, %36 : vector<8x16x128xf32>
    %38 = vector.extract_strided_slice %14 {offsets = [2, 0, 0], sizes = [8, 16, 128], strides = [1, 1, 1]} : vector<10x16x128xf32> to vector<8x16x128xf32>
    %39 = arith.addf %37, %38 : vector<8x16x128xf32>
    %40 = vector.extract_strided_slice %19 {offsets = [0, 0, 0], sizes = [8, 16, 128], strides = [1, 1, 1]} : vector<10x16x128xf32> to vector<8x16x128xf32>
    %41 = vector.extract_strided_slice %19 {offsets = [1, 0, 0], sizes = [8, 16, 128], strides = [1, 1, 1]} : vector<10x16x128xf32> to vector<8x16x128xf32>
    %42 = arith.addf %40, %41 : vector<8x16x128xf32>
    %43 = vector.extract_strided_slice %19 {offsets = [2, 0, 0], sizes = [8, 16, 128], strides = [1, 1, 1]} : vector<10x16x128xf32> to vector<8x16x128xf32>
    %44 = arith.addf %42, %43 : vector<8x16x128xf32>
    %45 = vector.extract_strided_slice %24 {offsets = [0, 0, 0], sizes = [8, 16, 128], strides = [1, 1, 1]} : vector<10x16x128xf32> to vector<8x16x128xf32>
    %46 = vector.extract_strided_slice %24 {offsets = [1, 0, 0], sizes = [8, 16, 128], strides = [1, 1, 1]} : vector<10x16x128xf32> to vector<8x16x128xf32>
    %47 = arith.addf %45, %46 : vector<8x16x128xf32>
    %48 = vector.extract_strided_slice %24 {offsets = [2, 0, 0], sizes = [8, 16, 128], strides = [1, 1, 1]} : vector<10x16x128xf32> to vector<8x16x128xf32>
    %49 = arith.addf %47, %48 : vector<8x16x128xf32>
    %50 = vector.extract_strided_slice %29 {offsets = [0, 0, 0], sizes = [8, 16, 128], strides = [1, 1, 1]} : vector<10x16x128xf32> to vector<8x16x128xf32>
    %51 = vector.extract_strided_slice %29 {offsets = [1, 0, 0], sizes = [8, 16, 128], strides = [1, 1, 1]} : vector<10x16x128xf32> to vector<8x16x128xf32>
    %52 = arith.addf %50, %51 : vector<8x16x128xf32>
    %53 = vector.extract_strided_slice %29 {offsets = [2, 0, 0], sizes = [8, 16, 128], strides = [1, 1, 1]} : vector<10x16x128xf32> to vector<8x16x128xf32>
    %54 = arith.addf %52, %53 : vector<8x16x128xf32>
    %cst = arith.constant 0.111111112 : f32
    %55 = vector.broadcast %cst : f32 to vector<8x16x128xf32>
    %56 = arith.mulf %34, %55 : vector<8x16x128xf32>
    %cst_5 = arith.constant 0.111111112 : f32
    %57 = vector.broadcast %cst_5 : f32 to vector<8x16x128xf32>
    %58 = arith.mulf %39, %57 : vector<8x16x128xf32>
    %59 = arith.mulf %56, %56 : vector<8x16x128xf32>
    %60 = arith.mulf %58, %58 : vector<8x16x128xf32>
    %61 = arith.mulf %56, %58 : vector<8x16x128xf32>
    %cst_6 = arith.constant 0.111111112 : f32
    %62 = vector.broadcast %cst_6 : f32 to vector<8x16x128xf32>
    %63 = arith.mulf %44, %62 : vector<8x16x128xf32>
    %64 = arith.subf %63, %59 : vector<8x16x128xf32>
    %cst_7 = arith.constant 0.111111112 : f32
    %65 = vector.broadcast %cst_7 : f32 to vector<8x16x128xf32>
    %66 = arith.mulf %49, %65 : vector<8x16x128xf32>
    %67 = arith.subf %66, %60 : vector<8x16x128xf32>
    %cst_8 = arith.constant 0.111111112 : f32
    %68 = vector.broadcast %cst_8 : f32 to vector<8x16x128xf32>
    %69 = arith.mulf %54, %68 : vector<8x16x128xf32>
    %70 = arith.subf %69, %61 : vector<8x16x128xf32>
    %cst_9 = arith.constant 2.000000e+00 : f32
    %71 = vector.broadcast %cst_9 : f32 to vector<8x16x128xf32>
    %72 = arith.mulf %71, %61 : vector<8x16x128xf32>
    %cst_10 = arith.constant 9.99999974E-5 : f32
    %73 = vector.broadcast %cst_10 : f32 to vector<8x16x128xf32>
    %74 = arith.addf %72, %73 : vector<8x16x128xf32>
    %cst_11 = arith.constant 2.000000e+00 : f32
    %75 = vector.broadcast %cst_11 : f32 to vector<8x16x128xf32>
    %76 = arith.mulf %75, %70 : vector<8x16x128xf32>
    %cst_12 = arith.constant 8.99999984E-4 : f32
    %77 = vector.broadcast %cst_12 : f32 to vector<8x16x128xf32>
    %78 = arith.addf %76, %77 : vector<8x16x128xf32>
    %79 = arith.mulf %74, %78 : vector<8x16x128xf32>
    %80 = arith.addf %59, %60 : vector<8x16x128xf32>
    %cst_13 = arith.constant 9.99999974E-5 : f32
    %81 = vector.broadcast %cst_13 : f32 to vector<8x16x128xf32>
    %82 = arith.addf %80, %81 : vector<8x16x128xf32>
    %83 = arith.addf %64, %67 : vector<8x16x128xf32>
    %cst_14 = arith.constant 8.99999984E-4 : f32
    %84 = vector.broadcast %cst_14 : f32 to vector<8x16x128xf32>
    %85 = arith.addf %83, %84 : vector<8x16x128xf32>
    %86 = arith.mulf %82, %85 : vector<8x16x128xf32>
    %87 = tpu.reciprocal %86 {approx = true} : vector<8x16x128xf32> -> vector<8x16x128xf32>
    %88 = arith.mulf %86, %87 : vector<8x16x128xf32>
    %cst_15 = arith.constant 2.000000e+00 : f32
    %89 = vector.broadcast %cst_15 : f32 to vector<8x16x128xf32>
    %90 = arith.subf %89, %88 : vector<8x16x128xf32>
    %91 = arith.mulf %87, %90 : vector<8x16x128xf32>
    %92 = arith.mulf %79, %91 : vector<8x16x128xf32>
    %cst_16 = arith.constant 1.000000e+00 : f32
    %93 = vector.broadcast %cst_16 : f32 to vector<8x16x128xf32>
    %94 = arith.subf %93, %92 : vector<8x16x128xf32>
    %cst_17 = arith.constant 5.000000e-01 : f32
    %95 = vector.broadcast %cst_17 : f32 to vector<8x16x128xf32>
    %96 = arith.mulf %94, %95 : vector<8x16x128xf32>
    %cst_18 = arith.constant 0.000000e+00 : f32
    %cst_19 = arith.constant 1.000000e+00 : f32
    %97 = vector.broadcast %cst_18 : f32 to vector<8x16x128xf32>
    %98 = arith.maximumf %97, %96 : vector<8x16x128xf32>
    %99 = vector.broadcast %cst_19 : f32 to vector<8x16x128xf32>
    %100 = arith.minimumf %99, %98 : vector<8x16x128xf32>
    %c0_20 = arith.constant 0 : index
    %c0_21 = arith.constant 0 : index
    %c0_22 = arith.constant 0 : index
    %101 = vector.load %arg4[%c0_20, %c0_21, %c0_22] : memref<8x16x128xf32, #tpu.memory_space<vmem>>, vector<8x16x128xf32>
    tpu.vector_store %arg4[%c0_20, %c0_21, %c0_22], %100 {strides = array<i32>} : memref<8x16x128xf32, #tpu.memory_space<vmem>>, vector<8x16x128xf32>,
    return
  }
  func.func @transform_0(%arg0: i32, %arg1: i32) -> (i32, i32, i32) {
    %c0_i32 = arith.constant 0 : i32
    %c0_i32_0 = arith.constant 0 : i32
    return %arg0, %c0_i32, %arg1 : i32, i32, i32
  }
  func.func @transform_1(%arg0: i32, %arg1: i32) -> (i32, i32, i32) {
    %c0_i32 = arith.constant 0 : i32
    %c0_i32_0 = arith.constant 0 : i32
    return %arg0, %c0_i32, %arg1 : i32, i32, i32
  }
  func.func @transform_2(%arg0: i32, %arg1: i32) -> (i32, i32, i32) {
    %c0_i32 = arith.constant 0 : i32
    %c0_i32_0 = arith.constant 0 : i32
    return %arg0, %c0_i32, %arg1 : i32, i32, i32
  }
}

</mosaic_0001>

<bundles_post_ra>
// kernel: ssim_pallas.1
= control target key start
LH: loop header
LB: loop body
LE: loop exit
PB: predicated region body
PF: predicated region fallthrough
CT: control target
= control target key end

     0   :  { %s2291_s9 = smov 0   ;;  %s2293_s10 = smov 0   ;;  %s5210_s0 = inlined_call_operand.vmem [shape: f32[20,18,128], index: 0, kind: input, shape index: {}]   ;;  %s5211_s1 = inlined_call_operand.vmem [shape: f32[20,18,128], index: 1, kind: input, shape index: {}]   ;;  %s5212_s2 = inlined_call_operand.vmem [shape: f32[16,16,128], index: 2, kind: output, shape index: {}]  }
   0x1   :  { %s2295_s11 = smov 0  }
   0x2 LB: > { %s24_s12 = sadd.s32 1, %s2270_s10  ;;  %p2186_p0 = scmp.ge.s32.totalorder %s2274_s11, 1  ;;  %s2274_s11 = sphi %s2295_s11, %s12_s11   ;;  %s2270_s10 = sphi %s2293_s10, %s6244_s10   ;;  %s2266_s9 = sphi %s2291_s9, %s6243_s9  }
   0x3   : > { %p26_p1 = scmp.ge.s32.totalorder %s24_s12, 2  ;;  %p150_p2 = scmp.lt.s32.totalorder %s2274_s11, 3 }
   0x5   : > { %s6246_s12 = smov (%p26_p1, %s24_s12), 0  ;;  %p151_p3 = pnand %p2186_p0, %p150_p2 }
   0x7   : > { %154 = sbr.rel (%p151_p3) target bundleno = 446 (0x1be), region = 28 }
   0xc   : > { %s189_s13 = smul.u32 10, %s2266_s9  ;;  %vm399_vm0 = vcmask 1046528   ;;  %vm490_vm1 = vcmask 1045504   ;;  %s2189_s21 = sshll.u32 %s2266_s9, 3 }
   0xd   : > { %p5166_p5 = scmp.lt.s32.totalorder %s2189_s21, 15 }
   0xe   : > { %p190_p4 = scmp.lt.s32.totalorder %s189_s13, 19 }
   0xf   : > { %s6250_s21 = smov (!%p5166_p5, %s2189_s21), 15 }
  0x10   : > { %s6248_s13 = smov (!%p190_p4, %s189_s13), 19  ;;  %s2194_s23 = sshll.u32 %s6250_s21, 4 }
  0x11   : > { %s2195_s14 = smul.u32 24, %s6248_s13  ;;  %s5183_s26 = scalar_lea.vmem %s5212_s2, %s2194_s23 }
  0x13   : > { %s2320_s17 = scalar_lea.vmem %s5210_s0, %s2195_s14  ;;  %s2434_s20 = scalar_lea.vmem %s5211_s1, %s2195_s14 }
  0x14   : > { %v2323_v0 = vld [vmem:[%s2320_s17] sm:$0xff]  ;;  %v2326_v1 = vld [vmem:[%s2320_s17 + $0x8] sm:$0xff]  ;;  %v2329_v2 = vld [vmem:[%s2320_s17 + $0x10] sm:$0x3] }
  0x15   : > { %v2332_v3 = vld [vmem:[%s2320_s17 + $0x18] sm:$0xff]  ;;  %v2335_v4 = vld [vmem:[%s2320_s17 + $0x20] sm:$0xff]  ;;  %v2338_v5 = vld [vmem:[%s2320_s17 + $0x28] sm:$0x3]  ;;  %v400_v11 = vrot.slane %v2323_v0, 1  ;;  %v401_v12 = vrot.slane %v2326_v1, 1  ;;  %v2368_v16 = vmul.f32 %v2323_v0, %v2323_v0  ;;  %v2372_v17 = vmul.f32 %v2326_v1, %v2326_v1 }
  0x16   : > { %v2341_v6 = vld [vmem:[%s2320_s17 + $0x30] sm:$0xff]  ;;  %v2344_v7 = vld [vmem:[%s2320_s17 + $0x38] sm:$0xff]  ;;  %v2347_v8 = vld [vmem:[%s2320_s17 + $0x40] sm:$0x3]  ;;  %v2376_v18 = vmul.f32 %v2329_v2, %v2329_v2  ;;  %v403_v19 = vrot.slane %v2329_v2, 1  ;;  %v2390_v23 = vmul.f32 %v2332_v3, %v2332_v3  ;;  %v2394_v24 = vmul.f32 %v2335_v4, %v2335_v4 }
  0x17   : > { %v2350_v9 = vld [vmem:[%s2320_s17 + $0x48] sm:$0xff]  ;;  %v2353_v10 = vld [vmem:[%s2320_s17 + $0x50] sm:$0xff]  ;;  %v2358_v13 = vld [vmem:[%s2320_s17 + $0x58] sm:$0x3]  ;;  %5488 = vst [vmem:[#allocation2_spill] sm:$0xff] %v2368_v16  ;;  %v2398_v25 = vmul.f32 %v2338_v5, %v2338_v5  ;;  %v2402_v26 = vmul.f32 %v2341_v6, %v2341_v6  ;;  %v2415_v30 = vmul.f32 %v2344_v7, %v2344_v7  ;;  %v2419_v31 = vmul.f32 %v2347_v8, %v2347_v8 }
  0x18   : > { %v2361_v14 = vld [vmem:[%s2320_s17 + $0x60] sm:$0xff]  ;;  %v2364_v15 = vld [vmem:[%s2320_s17 + $0x68] sm:$0xff]  ;;  %5489 = vst [vmem:[#allocation3_spill] sm:$0xff] %v2372_v17  ;;  %5490 = vst [vmem:[#allocation4_spill] sm:$0xff] %v2376_v18  ;;  %v2423_v32 = vmul.f32 %v2350_v9, %v2350_v9  ;;  %v2427_v33 = vmul.f32 %v2353_v10, %v2353_v10  ;;  %v2447_v37 = vmul.f32 %v2358_v13, %v2358_v13  ;;  %v405_v46 = vrot.slane %v2332_v3, 1 }
  0x19   : > { %v2380_v20 = vld [vmem:[%s2320_s17 + $0x70] sm:$0x3]  ;;  %v2383_v21 = vld [vmem:[%s2320_s17 + $0x78] sm:$0xff]  ;;  %v2386_v22 = vld [vmem:[%s2320_s17 + $0x80] sm:$0xff]  ;;  %5491 = vst [vmem:[#allocation5_spill] sm:$0xff] %v2390_v23  ;;  %v2451_v38 = vmul.f32 %v2361_v14, %v2361_v14  ;;  %v2455_v39 = vmul.f32 %v2364_v15, %v2364_v15  ;;  %v2458_v40 = vsel %vm399_vm0, %v400_v11, %v401_v12  ;;  %v2474_v45 = vsel %vm399_vm0, %v401_v12, %v403_v19 }
  0x1a   : > { %5492 = vst [vmem:[#allocation6_spill] sm:$0xff] %v2394_v24  ;;  %5493 = vst [vmem:[#allocation7_spill] sm:$0xff] %v2398_v25  ;;  %v2405_v27 = vld [vmem:[%s2320_s17 + $0x88] sm:$0x3]  ;;  %v2408_v28 = vld [vmem:[%s2320_s17 + $0x90] sm:$0xff]  ;;  %v2471_v44 = vmul.f32 %v2380_v20, %v2380_v20  ;;  %v406_v47 = vrot.slane %v2335_v4, 1  ;;  %v2489_v51 = vmul.f32 %v2383_v21, %v2383_v21  ;;  %v2493_v52 = vmul.f32 %v2386_v22, %v2386_v22 }
  0x1b   : > { %5494 = vst [vmem:[#allocation8_spill] sm:$0xff] %v2402_v26  ;;  %v2411_v29 = vld [vmem:[%s2320_s17 + $0x98] sm:$0xff]  ;;  %5495 = vst [vmem:[#allocation9_spill] sm:$0xff] %v2415_v30  ;;  %v2437_v34 = vld [vmem:[%s2320_s17 + $0xa0] sm:$0x3]  ;;  %v2497_v53 = vmul.f32 %v2405_v27, %v2405_v27  ;;  %v408_v54 = vrot.slane %v2338_v5, 1  ;;  %v2511_v58 = vmul.f32 %v2408_v28, %v2408_v28 }
  0x1c   : > { %5496 = vst [vmem:[#allocation10_spill] sm:$0xff] %v2419_v31  ;;  %5497 = vst [vmem:[#allocation11_spill] sm:$0xff] %v2423_v32  ;;  %v2440_v35 = vld [vmem:[%s2320_s17 + $0xa8] sm:$0xff]  ;;  %v2443_v36 = vld [vmem:[%s2320_s17 + $0xb0] sm:$0xff]  ;;  %v2515_v59 = vmul.f32 %v2411_v29, %v2411_v29  ;;  %v2519_v60 = vmul.f32 %v2437_v34, %v2437_v34 }
  0x1d   : > { %5498 = vst [vmem:[#allocation12_spill] sm:$0xff] %v2427_v33  ;;  %5499 = vst [vmem:[#allocation13_spill] sm:$0xff] %v2447_v37  ;;  %v2461_v41 = vld [vmem:[%s2320_s17 + $0xb8] sm:$0x3]  ;;  %v2464_v42 = vld [vmem:[%s2320_s17 + $0xc0] sm:$0xff]  ;;  %v2523_v61 = vmul.f32 %v2440_v35, %v2440_v35  ;;  %v2536_v12 = vmul.f32 %v2443_v36, %v2443_v36 }
  0x1e   : > { %5500 = vst [vmem:[#allocation14_spill] sm:$0xff] %v2451_v38  ;;  %5501 = vst [vmem:[#allocation15_spill] sm:$0xff] %v2455_v39  ;;  %v2467_v43 = vld [vmem:[%s2320_s17 + $0xc8] sm:$0xff]  ;;  %v2479_v48 = vld [vmem:[%s2320_s17 + $0xd0] sm:$0x3]  ;;  %v2540_v19 = vmul.f32 %v2461_v41, %v2461_v41 }
  0x1f   : > { %5502 = vst [vmem:[#allocation16_spill] sm:$0xff] %v2461_v41  ;;  %5503 = vst [vmem:[#allocation17_spill] sm:$0xff] %v2471_v44  ;;  %v2482_v49 = vld [vmem:[%s2320_s17 + $0xd8] sm:$0xff]  ;;  %v2485_v50 = vld [vmem:[%s2320_s17 + $0xe0] sm:$0xff] }
  0x20   : > { %5504 = vst [vmem:[#allocation18_spill] sm:$0xff] %v2479_v48  ;;  %5505 = vst [vmem:[#allocation19_spill] sm:$0xff] %v2489_v51  ;;  %v2501_v55 = vld [vmem:[%s2320_s17 + $0xe8] sm:$0x3]  ;;  %v2504_v56 = vld [vmem:[%s2434_s20] sm:$0xff] }
  0x21   : > { %5506 = vst [vmem:[#allocation20_spill] sm:$0xff] %v2493_v52  ;;  %5507 = vst [vmem:[#allocation21_spill] sm:$0xff] %v2497_v53  ;;  %v2507_v57 = vld [vmem:[%s2434_s20 + $0x8] sm:$0xff]  ;;  %v2526_v62 = vld [vmem:[%s2434_s20 + $0x10] sm:$0x3]  ;;  %v2569_v53 = vmul.f32 %v2485_v50, %v2485_v50 }
  0x22   : > { %5508 = vst [vmem:[#allocation22_spill] sm:$0xff] %v2501_v55  ;;  %5509 = vst [vmem:[#allocation23_spill] sm:$0xff] %v2504_v56  ;;  %v2529_v63 = vld [vmem:[%s2434_s20 + $0x18] sm:$0xff]  ;;  %v2532_v11 = vld [vmem:[%s2434_s20 + $0x20] sm:$0xff] }
  0x23   : > { %5510 = vst [vmem:[#allocation24_spill] sm:$0xff] %v2507_v57  ;;  %5511 = vst [vmem:[#allocation25_spill] sm:$0xff] %v2511_v58  ;;  %v2554_v58 = vld [vmem:[%s2434_s20 + $0x30] sm:$0xff]  ;;  %v2575_v52 = vld [vmem:[%s2434_s20 + $0x40] sm:$0x3] }
  0x24   : > { %5512 = vst [vmem:[#allocation26_spill] sm:$0xff] %v2515_v59  ;;  %5513 = vst [vmem:[#allocation27_spill] sm:$0xff] %v2519_v60  ;;  %v2544_v60 = vmul.f32 %v2464_v42, %v2464_v42  ;;  %v2551_v59 = vld [vmem:[%s2434_s20 + $0x28] sm:$0x3]  ;;  %v2581_v44 = vld [vmem:[%s2434_s20 + $0x50] sm:$0xff] }
  0x25   : > { %5514 = vst [vmem:[#allocation28_spill] sm:$0xff] %v2523_v61  ;;  %5515 = vst [vmem:[#allocation29_spill] sm:$0xff] %v2526_v62  ;;  %v2548_v61 = vmul.f32 %v2467_v43, %v2467_v43  ;;  %v2578_v51 = vld [vmem:[%s2434_s20 + $0x48] sm:$0xff]  ;;  %v2599_v39 = vld [vmem:[%s2434_s20 + $0x58] sm:$0x3]  ;;  %v2667_v26 = vmul.f32 %v2581_v44, %v2581_v44 }
  0x26   : > { %5516 = vst [vmem:[#allocation30_spill] sm:$0xff] %v2529_v63  ;;  %5517 = vst [vmem:[#allocation31_spill] sm:$0xff] %v2532_v11  ;;  %v2602_v38 = vld [vmem:[%s2434_s20 + $0x60] sm:$0xff]  ;;  %v2605_v37 = vld [vmem:[%s2434_s20 + $0x68] sm:$0xff] }
  0x27   : > { %5518 = vst [vmem:[#allocation32_spill] sm:$0xff] %v2536_v12  ;;  %5519 = vst [vmem:[#allocation33_spill] sm:$0xff] %v2540_v19  ;;  %v2557_v12 = vld [vmem:[%s2434_s20 + $0x38] sm:$0xff]  ;;  %v2561_v19 = vmul.f32 %v2479_v48, %v2479_v48  ;;  %v2649_v31 = vld [vmem:[%s2434_s20 + $0x88] sm:$0x3]  ;;  %v2692_v23 = vmul.f32 %v2605_v37, %v2605_v37 }
  0x28   : > { %5520 = vst [vmem:[#allocation34_spill] sm:$0xff] %v2544_v60  ;;  %5521 = vst [vmem:[#allocation35_spill] sm:$0xff] %v2548_v61  ;;  %v2565_v60 = vmul.f32 %v2482_v49, %v2482_v49  ;;  %v2572_v61 = vsel %vm399_vm0, %v405_v46, %v406_v47  ;;  %v2593_v46 = vmul.f32 %v2507_v57, %v2507_v57  ;;  %v2627_v33 = vld [vmem:[%s2434_s20 + $0x78] sm:$0xff]  ;;  %v2652_v30 = vld [vmem:[%s2434_s20 + $0x90] sm:$0xff] }
  0x29   : > { %5522 = vst [vmem:[#allocation36_spill] sm:$0xff] %v2551_v59  ;;  %5523 = vst [vmem:[#allocation37_spill] sm:$0xff] %v2554_v58  ;;  %v2642_v32 = vmul.f32 %v2557_v12, %v2557_v12  ;;  %v2674_v25 = vld [vmem:[%s2434_s20 + $0xa0] sm:$0x3]  ;;  %v2677_v24 = vld [vmem:[%s2434_s20 + $0xa8] sm:$0xff] }
  0x2a   : > { %5524 = vst [vmem:[#allocation38_spill] sm:$0xff] %v2557_v12  ;;  %5525 = vst [vmem:[#allocation39_spill] sm:$0xff] %v2561_v19  ;;  %v2585_v19 = vmul.f32 %v2501_v55, %v2501_v55  ;;  %v2699_v18 = vld [vmem:[%s2434_s20 + $0xb8] sm:$0x3]  ;;  %v2702_v17 = vld [vmem:[%s2434_s20 + $0xc0] sm:$0xff] }
  0x2b   : > { %5526 = vst [vmem:[#allocation40_spill] sm:$0xff] %v2565_v60  ;;  %5527 = vst [vmem:[#allocation41_spill] sm:$0xff] %v2569_v53  ;;  %v2589_v60 = vmul.f32 %v2504_v56, %v2504_v56  ;;  %v2596_v53 = vsel %vm399_vm0, %v406_v47, %v408_v54  ;;  %v2617_v47 = vmul.f32 %v2532_v11, %v2532_v11  ;;  %v2705_v16 = vld [vmem:[%s2434_s20 + $0xc8] sm:$0xff] }
  0x2c   : > { %5528 = vst [vmem:[#allocation42_spill] sm:$0xff] %v2575_v52  ;;  %5529 = vst [vmem:[#allocation43_spill] sm:$0xff] %v2578_v51  ;;  %v2621_v54 = vmul.f32 %v2504_v56, %v2323_v0  ;;  %v2753_v56 = vmul.f32 %v2674_v25, %v2674_v25 }
  0x2d   : > { %5530 = vst [vmem:[#allocation44_spill] sm:$0xff] %v2581_v44  ;;  %5531 = vst [vmem:[#allocation45_spill] sm:$0xff] %v2585_v19  ;;  %v2609_v19 = vmul.f32 %v2526_v62, %v2526_v62 }
  0x2e   : > { %5532 = vst [vmem:[#allocation46_spill] sm:$0xff] %v2589_v60  ;;  %5533 = vst [vmem:[#allocation47_spill] sm:$0xff] %v2593_v46  ;;  %v2613_v60 = vmul.f32 %v2529_v63, %v2529_v63  ;;  %v2624_v46 = vld [vmem:[%s2434_s20 + $0x70] sm:$0x3] }
  0x2f   : > { %5534 = vst [vmem:[#allocation48_spill] sm:$0xff] %v2599_v39  ;;  %5535 = vst [vmem:[#allocation49_spill] sm:$0xff] %v2602_v38 }
  0x30   : > { %5536 = vst [vmem:[#allocation50_spill] sm:$0xff] %v2605_v37  ;;  %5537 = vst [vmem:[#allocation51_spill] sm:$0xff] %v2609_v19  ;;  %v2630_v19 = vld [vmem:[%s2434_s20 + $0x80] sm:$0xff] }
  0x31   : > { %5538 = vst [vmem:[#allocation52_spill] sm:$0xff] %v2613_v60  ;;  %5539 = vst [vmem:[#allocation53_spill] sm:$0xff] %v2617_v47  ;;  %v2634_v60 = vmul.f32 %v2551_v59, %v2551_v59  ;;  %v2638_v47 = vmul.f32 %v2554_v58, %v2554_v58 }
  0x32   : > { %5540 = vst [vmem:[#allocation54_spill] sm:$0xff] %v2621_v54  ;;  %5541 = vst [vmem:[#allocation55_spill] sm:$0xff] %v2624_v46  ;;  %v2646_v54 = vmul.f32 %v2507_v57, %v2326_v1  ;;  %v2730_v57 = vld [vmem:[%s2434_s20 + $0xe0] sm:$0xff] }
  0x33   : > { %5542 = vst [vmem:[#allocation56_spill] sm:$0xff] %v2627_v33  ;;  %5543 = vst [vmem:[#allocation57_spill] sm:$0xff] %v2630_v19 }
  0x34   : > { %5544 = vst [vmem:[#allocation58_spill] sm:$0xff] %v2634_v60  ;;  %5545 = vst [vmem:[#allocation59_spill] sm:$0xff] %v2638_v47  ;;  %v2655_v60 = vld [vmem:[%s2434_s20 + $0x98] sm:$0xff]  ;;  %v2659_v47 = vmul.f32 %v2575_v52, %v2575_v52 }
  0x35   : > { %5546 = vst [vmem:[#allocation60_spill] sm:$0xff] %v2642_v32  ;;  %5547 = vst [vmem:[#allocation61_spill] sm:$0xff] %v2646_v54  ;;  %v2663_v32 = vmul.f32 %v2578_v51, %v2578_v51  ;;  %v2671_v54 = vmul.f32 %v2526_v62, %v2329_v2  ;;  %v2727_v62 = vld [vmem:[%s2434_s20 + $0xd8] sm:$0xff] }
  0x36   : > { %5548 = vst [vmem:[#allocation62_spill] sm:$0xff] %v2649_v31  ;;  %5549 = vst [vmem:[#allocation63_spill] sm:$0xff] %v2652_v30 }
  0x37   : > { %5550 = vst [vmem:[#allocation64_spill] sm:$0xff] %v2655_v60  ;;  %5551 = vst [vmem:[#allocation65_spill] sm:$0xff] %v2659_v47  ;;  %v2680_v47 = vld [vmem:[%s2434_s20 + $0xb0] sm:$0xff] }
  0x38   : > { %5552 = vst [vmem:[#allocation66_spill] sm:$0xff] %v2663_v32  ;;  %5553 = vst [vmem:[#allocation67_spill] sm:$0xff] %v2667_v26  ;;  %v2684_v32 = vmul.f32 %v2599_v39, %v2599_v39  ;;  %v2688_v26 = vmul.f32 %v2602_v38, %v2602_v38 }
  0x39   : > { %5554 = vst [vmem:[#allocation68_spill] sm:$0xff] %v2671_v54  ;;  %5555 = vst [vmem:[#allocation69_spill] sm:$0xff] %v2674_v25  ;;  %v2696_v54 = vmul.f32 %v2529_v63, %v2332_v3  ;;  %v2724_v63 = vld [vmem:[%s2434_s20 + $0xd0] sm:$0x3] }
  0x3a   : > { %5556 = vst [vmem:[#allocation70_spill] sm:$0xff] %v2677_v24  ;;  %5557 = vst [vmem:[#allocation71_spill] sm:$0xff] %v2680_v47 }
  0x3b   : > { %5558 = vst [vmem:[#allocation72_spill] sm:$0xff] %v2684_v32  ;;  %5559 = vst [vmem:[#allocation73_spill] sm:$0xff] %v2688_v26  ;;  %v2709_v32 = vmul.f32 %v2624_v46, %v2624_v46  ;;  %v2713_v26 = vmul.f32 %v2627_v33, %v2627_v33 }
  0x3c   : > { %5560 = vst [vmem:[#allocation74_spill] sm:$0xff] %v2692_v23  ;;  %5561 = vst [vmem:[#allocation75_spill] sm:$0xff] %v2696_v54  ;;  %v2717_v23 = vmul.f32 %v2630_v19, %v2630_v19  ;;  %v2721_v54 = vmul.f32 %v2532_v11, %v2335_v4  ;;  %v2749_v11 = vld [vmem:[%s2434_s20 + $0xe8] sm:$0x3] }
  0x3d   : > { %5562 = vst [vmem:[#allocation76_spill] sm:$0xff] %v2699_v18  ;;  %5563 = vst [vmem:[#allocation77_spill] sm:$0xff] %v2702_v17 }
  0x3e   : > { %5564 = vst [vmem:[#allocation78_spill] sm:$0xff] %v2705_v16  ;;  %5565 = vst [vmem:[#allocation79_spill] sm:$0xff] %v2709_v32  ;;  %v2734_v32 = vmul.f32 %v2649_v31, %v2649_v31 }
  0x3f   : > { %5566 = vst [vmem:[#allocation80_spill] sm:$0xff] %v2713_v26  ;;  %5567 = vst [vmem:[#allocation81_spill] sm:$0xff] %v2717_v23  ;;  %v2738_v26 = vmul.f32 %v2652_v30, %v2652_v30  ;;  %v2742_v23 = vmul.f32 %v2655_v60, %v2655_v60 }
  0x40   : > { %5568 = vst [vmem:[#allocation82_spill] sm:$0xff] %v2721_v54  ;;  %5569 = vst [vmem:[#allocation83_spill] sm:$0xff] %v2724_v63  ;;  %v2746_v54 = vmul.f32 %v2551_v59, %v2338_v5  ;;  %v2773_v59 = vmul.f32 %v2702_v17, %v2702_v17 }
  0x41   : > { %5570 = vst [vmem:[#allocation84_spill] sm:$0xff] %v2727_v62  ;;  %5571 = vst [vmem:[#allocation85_spill] sm:$0xff] %v2730_v57 }
  0x42   : > { %5572 = vst [vmem:[#allocation86_spill] sm:$0xff] %v2734_v32  ;;  %5573 = vst [vmem:[#allocation87_spill] sm:$0xff] %v2738_v26  ;;  %v2757_v32 = vmul.f32 %v2677_v24, %v2677_v24  ;;  %v2761_v26 = vmul.f32 %v2680_v47, %v2680_v47 }
  0x43   : > { %5574 = vst [vmem:[#allocation88_spill] sm:$0xff] %v2742_v23  ;;  %5575 = vst [vmem:[#allocation89_spill] sm:$0xff] %v2746_v54  ;;  %v2765_v23 = vmul.f32 %v2554_v58, %v2341_v6  ;;  %v2769_v54 = vmul.f32 %v2699_v18, %v2699_v18 }
  0x44   : > { %5576 = vst [vmem:[#allocation90_spill] sm:$0xff] %v2749_v11  ;;  %5577 = vst [vmem:[#allocation91_spill] sm:$0xff] %v2753_v56  ;;  %v2777_v56 = vmul.f32 %v2705_v16, %v2705_v16 }
  0x45   : > { %5578 = vst [vmem:[#allocation92_spill] sm:$0xff] %v2757_v32  ;;  %5579 = vst [vmem:[#allocation93_spill] sm:$0xff] %v2761_v26  ;;  %v2781_v32 = vmul.f32 %v2557_v12, %v2344_v7  ;;  %v2785_v26 = vmul.f32 %v2724_v63, %v2724_v63 }
  0x46   : > { %5580 = vst [vmem:[#allocation94_spill] sm:$0xff] %v2765_v23  ;;  %5581 = vst [vmem:[#allocation95_spill] sm:$0xff] %v2769_v54  ;;  %v2789_v23 = vmul.f32 %v2727_v62, %v2727_v62  ;;  %v2793_v54 = vmul.f32 %v2730_v57, %v2730_v57 }
  0x47   : > { %5582 = vst [vmem:[#allocation96_spill] sm:$0xff] %v2773_v59  ;;  %5583 = vst [vmem:[#allocation97_spill] sm:$0xff] %v2777_v56  ;;  %v2797_v59 = vmul.f32 %v2575_v52, %v2347_v8  ;;  %v2801_v56 = vmul.f32 %v2749_v11, %v2749_v11 }
  0x48   : > { %5584 = vst [vmem:[#allocation98_spill] sm:$0xff] %v2781_v32  ;;  %5585 = vst [vmem:[#allocation99_spill] sm:$0xff] %v2785_v26  ;;  %v2805_v32 = vmul.f32 %v2578_v51, %v2350_v9  ;;  %v2809_v26 = vmul.f32 %v2581_v44, %v2353_v10 }
  0x49   : > { %5586 = vst [vmem:[#allocation100_spill] sm:$0xff] %v2789_v23  ;;  %5587 = vst [vmem:[#allocation101_spill] sm:$0xff] %v2793_v54  ;;  %v2813_v23 = vmul.f32 %v2599_v39, %v2358_v13  ;;  %v2817_v54 = vmul.f32 %v2602_v38, %v2361_v14  ;;  %v446_v38 = vrot.slane %v2485_v50, 1  ;;  %v448_v39 = vrot.slane %v2501_v55, 1 }
  0x4a   : > { %5588 = vst [vmem:[#allocation102_spill] sm:$0xff] %v2797_v59  ;;  %5589 = vst [vmem:[#allocation103_spill] sm:$0xff] %v2801_v56  ;;  %v2821_v59 = vmul.f32 %v2605_v37, %v2364_v15  ;;  %v2825_v56 = vmul.f32 %v2624_v46, %v2380_v20  ;;  %v445_v37 = vrot.slane %v2482_v49, 1 }
  0x4b   : > { %5590 = vst [vmem:[#allocation104_spill] sm:$0xff] %v2805_v32  ;;  %5591 = vst [vmem:[#allocation105_spill] sm:$0xff] %v2809_v26  ;;  %v2829_v32 = vmul.f32 %v2627_v33, %v2383_v21  ;;  %v2833_v26 = vmul.f32 %v2630_v19, %v2386_v22  ;;  %v441_v19 = vrot.slane %v2467_v43, 1  ;;  %v443_v33 = vrot.slane %v2479_v48, 1 }
  0x4c   : > { %5592 = vst [vmem:[#allocation106_spill] sm:$0xff] %v2813_v23  ;;  %5593 = vst [vmem:[#allocation107_spill] sm:$0xff] %v2817_v54  ;;  %v2837_v23 = vmul.f32 %v2649_v31, %v2405_v27  ;;  %v2841_v54 = vmul.f32 %v2652_v30, %v2408_v28  ;;  %v2859_v30 = vmul.f32 %v2680_v47, %v2443_v36  ;;  %v440_v31 = vrot.slane %v2464_v42, 1 }
  0x4d   : > { %5594 = vst [vmem:[#allocation108_spill] sm:$0xff] %v2821_v59  ;;  %5595 = vst [vmem:[#allocation109_spill] sm:$0xff] %v2825_v56  ;;  %v2845_v59 = vmul.f32 %v2655_v60, %v2411_v29  ;;  %v2849_v56 = vmul.f32 %v2674_v25, %v2437_v34  ;;  %v2879_v47 = vmul.f32 %v2727_v62, %v2482_v49  ;;  %v421_v62 = vrot.slane %v2364_v15, 1 }
  0x4e   : > { %5596 = vst [vmem:[#allocation110_spill] sm:$0xff] %v2829_v32  ;;  %5597 = vst [vmem:[#allocation111_spill] sm:$0xff] %v2833_v26  ;;  %v2853_v32 = vmul.f32 %v2677_v24, %v2440_v35  ;;  %v410_v26 = vrot.slane %v2341_v6, 1  ;;  %v433_v24 = vrot.slane %v2437_v34, 1  ;;  %v436_v25 = vrot.slane %v2443_v36, 1 }
  0x4f   : > { %5598 = vst [vmem:[#allocation112_spill] sm:$0xff] %v2837_v23  ;;  %5599 = vst [vmem:[#allocation113_spill] sm:$0xff] %v2841_v54  ;;  %v411_v23 = vrot.slane %v2344_v7, 1  ;;  %v2863_v54 = vmul.f32 %v2699_v18, %v2461_v41  ;;  %v431_v18 = vrot.slane %v2411_v29, 1  ;;  %v438_v60 = vrot.slane %v2461_v41, 1 }
  0x50   : > { %5600 = vst [vmem:[#allocation114_spill] sm:$0xff] %v2845_v59  ;;  %5601 = vst [vmem:[#allocation115_spill] sm:$0xff] %v2849_v56  ;;  %v2867_v59 = vmul.f32 %v2702_v17, %v2464_v42  ;;  %v2871_v56 = vmul.f32 %v2705_v16, %v2467_v43  ;;  %v416_v16 = vrot.slane %v2353_v10, 1  ;;  %v430_v17 = vrot.slane %v2408_v28, 1 }
  0x51   : > { %5602 = vst [vmem:[#allocation116_spill] sm:$0xff] %v2853_v32  ;;  %5603 = vst [vmem:[#allocation117_spill] sm:$0xff] %v2859_v30  ;;  %v2875_v32 = vmul.f32 %v2724_v63, %v2479_v48  ;;  %v2883_v30 = vmul.f32 %v2730_v57, %v2485_v50  ;;  %v412_v63 = vsel %vm399_vm0, %v410_v26, %v411_v23  ;;  %v425_v57 = vrot.slane %v2383_v21, 1 }
  0x52   : > { %5604 = vst [vmem:[#allocation118_spill] sm:$0xff] %v2863_v54  ;;  %5605 = vst [vmem:[#allocation119_spill] sm:$0xff] %v2867_v59  ;;  %v2887_v54 = vmul.f32 %v2749_v11, %v2501_v55  ;;  %v413_v59 = vrot.slane %v2347_v8, 1  ;;  %v428_v11 = vrot.slane %v2405_v27, 1  ;;  %v435_v26 = vrot.slane %v2440_v35, 1 }
  0x53   : > { %5606 = vst [vmem:[#allocation120_spill] sm:$0xff] %v2871_v56  ;;  %5607 = vst [vmem:[#allocation121_spill] sm:$0xff] %v2875_v32  ;;  %v415_v56 = vrot.slane %v2350_v9, 1  ;;  %v418_v32 = vrot.slane %v2358_v13, 1  ;;  %v439_v55 = vsel %vm399_vm0, %v436_v25, %v438_v60  ;;  %v494_v60 = vrot.slane %v2329_v2, 2 }
  0x54   : > { %5608 = vst [vmem:[#allocation122_spill] sm:$0xff] %v2879_v47  ;;  %5609 = vst [vmem:[#allocation123_spill] sm:$0xff] %v2883_v30  ;;  %v420_v47 = vrot.slane %v2361_v14, 1  ;;  %v423_v30 = vrot.slane %v2380_v20, 1  ;;  %v414_v46 = vsel %vm399_vm0, %v411_v23, %v413_v59  ;;  %v432_v23 = vsel %vm399_vm0, %v430_v17, %v431_v18 }
  0x55   : > { %5610 = vst [vmem:[#allocation124_spill] sm:$0xff] %v2887_v54  ;;  %v426_v54 = vrot.slane %v2386_v22, 1  ;;  %v417_v44 = vsel %vm399_vm0, %v415_v56, %v416_v16  ;;  %v419_v51 = vsel %vm399_vm0, %v416_v16, %v418_v32  ;;  %v434_v59 = vsel %vm399_vm0, %v431_v18, %v433_v24 }
  0x56   : > { %v422_v52 = vsel %vm399_vm0, %v420_v47, %v421_v62  ;;  %v424_v12 = vsel %vm399_vm0, %v421_v62, %v423_v30  ;;  %v437_v41 = vsel %vm399_vm0, %v435_v26, %v436_v25  ;;  %v442_v56 = vsel %vm399_vm0, %v440_v31, %v441_v19 }
  0x57   : > { %v427_v58 = vsel %vm399_vm0, %v425_v57, %v426_v54  ;;  %v429_v48 = vsel %vm399_vm0, %v426_v54, %v428_v11  ;;  %v444_v16 = vsel %vm399_vm0, %v441_v19, %v443_v33  ;;  %v447_v32 = vsel %vm399_vm0, %v445_v37, %v446_v38 }
  0x58   : > { %v449_v30 = vsel %vm399_vm0, %v446_v38, %v448_v39  ;;  %v2929_v57 = vadd.f32 %v2458_v40, %v2323_v0  ;;  %v2933_v17 = vadd.f32 %v2474_v45, %v2326_v1  ;;  %v2937_v18 = vadd.f32 %v2572_v61, %v2332_v3 }
  0x59   : > { %v2941_v24 = vadd.f32 %v2596_v53, %v2335_v4  ;;  %v2944_v25 = vadd.f32 %v412_v63, %v2341_v6  ;;  %v2947_v31 = vadd.f32 %v414_v46, %v2344_v7  ;;  %v2950_v33 = vadd.f32 %v417_v44, %v2350_v9 }
  0x5a   : > { %v2953_v37 = vadd.f32 %v419_v51, %v2353_v10  ;;  %v2956_v38 = vadd.f32 %v422_v52, %v2361_v14  ;;  %v2959_v39 = vadd.f32 %v424_v12, %v2364_v15  ;;  %v2962_v40 = vadd.f32 %v427_v58, %v2383_v21 }
  0x5b   : > { %v2965_v45 = vadd.f32 %v429_v48, %v2386_v22  ;;  %v491_v53 = vrot.slane %v2323_v0, 2  ;;  %v492_v44 = vrot.slane %v2326_v1, 2  ;;  %v496_v51 = vrot.slane %v2332_v3, 2 }
  0x5c   : > { %v497_v52 = vrot.slane %v2335_v4, 2  ;;  %v499_v61 = vrot.slane %v2338_v5, 2  ;;  %v2974_v62 = vadd.f32 %v432_v23, %v2408_v28  ;;  %v501_v58 = vrot.slane %v2341_v6, 2 }
  0x5d   : > { %v502_v48 = vrot.slane %v2344_v7, 2  ;;  %v504_v63 = vrot.slane %v2347_v8, 2  ;;  %v2980_v0 = vadd.f32 %v434_v59, %v2411_v29  ;;  %v2983_v1 = vadd.f32 %v437_v41, %v2440_v35 }
  0x5e   : > { %v2986_v2 = vadd.f32 %v439_v55, %v2443_v36  ;;  %v2989_v3 = vadd.f32 %v442_v56, %v2464_v42  ;;  %v2992_v4 = vadd.f32 %v444_v16, %v2467_v43  ;;  %v2995_v5 = vadd.f32 %v447_v32, %v2482_v49 }
  0x5f   : > { %v2998_v6 = vadd.f32 %v449_v30, %v2485_v50  ;;  %v493_v7 = vsel %vm490_vm1, %v491_v53, %v492_v44  ;;  %v495_v8 = vsel %vm490_vm1, %v492_v44, %v494_v60  ;;  %v498_v41 = vsel %vm490_vm1, %v496_v51, %v497_v52  ;;  %v5611_v30 = vld [vmem:[#allocation16_spill] sm:$0xff]  ;;  %v5612_v53 = vld [vmem:[#allocation18_spill] sm:$0xff] }
  0x60   : > { %v500_v55 = vsel %vm490_vm1, %v497_v52, %v499_v61  ;;  %v506_v11 = vrot.slane %v2350_v9, 2  ;;  %v503_v12 = vsel %vm490_vm1, %v501_v58, %v502_v48  ;;  %v505_v19 = vsel %vm490_vm1, %v502_v48, %v504_v63  ;;  %v5613_v44 = vld [vmem:[#allocation22_spill] sm:$0xff] }
  0x61   : > { %v507_v46 = vrot.slane %v2353_v10, 2  ;;  %v509_v47 = vrot.slane %v2358_v13, 2  ;;  %v511_v54 = vrot.slane %v2361_v14, 2  ;;  %v512_v26 = vrot.slane %v2364_v15, 2 }
  0x62   : > { %v514_v23 = vrot.slane %v2380_v20, 2  ;;  %v516_v59 = vrot.slane %v2383_v21, 2  ;;  %v517_v56 = vrot.slane %v2386_v22, 2  ;;  %v519_v9 = vrot.slane %v2405_v27, 2 }
  0x63   : > { %v521_v16 = vrot.slane %v2408_v28, 2  ;;  %v522_v32 = vrot.slane %v2411_v29, 2  ;;  %v524_v10 = vrot.slane %v2437_v34, 2  ;;  %v526_v13 = vrot.slane %v2440_v35, 2 }
  0x64   : > { %v527_v14 = vrot.slane %v2443_v36, 2  ;;  %v529_v15 = vrot.slane %v5611_v30, 2  ;;  %v508_v20 = vsel %vm490_vm1, %v506_v11, %v507_v46  ;;  %v531_v21 = vrot.slane %v2464_v42, 2 }
  0x65   : > { %v532_v22 = vrot.slane %v2467_v43, 2  ;;  %v534_v27 = vrot.slane %v5612_v53, 2  ;;  %v510_v28 = vsel %vm490_vm1, %v507_v46, %v509_v47  ;;  %v536_v29 = vrot.slane %v2482_v49, 2 }
  0x66   : > { %v537_v34 = vrot.slane %v2485_v50, 2  ;;  %v539_v35 = vrot.slane %v5613_v44, 2  ;;  %v513_v36 = vsel %vm490_vm1, %v511_v54, %v512_v26  ;;  %v515_v60 = vsel %vm490_vm1, %v512_v26, %v514_v23 }
  0x67   : > { %v518_v51 = vsel %vm490_vm1, %v516_v59, %v517_v56  ;;  %v520_v42 = vsel %vm490_vm1, %v517_v56, %v519_v9  ;;  %v523_v43 = vsel %vm490_vm1, %v521_v16, %v522_v32  ;;  %v525_v52 = vsel %vm490_vm1, %v522_v32, %v524_v10  ;;  %v5629_v59 = vld [vmem:[#allocation31_spill] sm:$0xff]  ;;  %v5633_v32 = vld [vmem:[#allocation38_spill] sm:$0xff] }
  0x68   : > { %v528_v61 = vsel %vm490_vm1, %v526_v13, %v527_v14  ;;  %v530_v49 = vsel %vm490_vm1, %v527_v14, %v529_v15  ;;  %v533_v50 = vsel %vm490_vm1, %v531_v21, %v532_v22  ;;  %v535_v58 = vsel %vm490_vm1, %v532_v22, %v534_v27 }
  0x69   : > { %v3040_v48 = vadd.f32 %v493_v7, %v2929_v57  ;;  %v3043_v63 = vadd.f32 %v495_v8, %v2933_v17  ;;  %v538_v11 = vsel %vm490_vm1, %v536_v29, %v537_v34  ;;  %v540_v46 = vsel %vm490_vm1, %v537_v34, %v539_v35  ;;  %v5645_v29 = vld [vmem:[#allocation48_spill] sm:$0xff]  ;;  %v5647_v35 = vld [vmem:[#allocation50_spill] sm:$0xff] }
  0x6a   : > { %v3048_v47 = vadd.f32 %v498_v41, %v2937_v18  ;;  %v3051_v54 = vadd.f32 %v500_v55, %v2941_v24  ;;  %v3054_v26 = vadd.f32 %v503_v12, %v2944_v25  ;;  %v3057_v23 = vadd.f32 %v505_v19, %v2947_v31  ;;  %v5625_v25 = vld [vmem:[#allocation23_spill] sm:$0xff]  ;;  %v5626_v41 = vld [vmem:[#allocation24_spill] sm:$0xff]  ;;  %v5627_v55 = vld [vmem:[#allocation29_spill] sm:$0xff] }
  0x6b   : > { %5614 = vst [vmem:[#allocation16_spill] sm:$0xff] %v3040_v48  ;;  %5615 = vst [vmem:[#allocation18_spill] sm:$0xff] %v3043_v63  ;;  %v3060_v57 = vadd.f32 %v508_v20, %v2950_v33  ;;  %v3063_v17 = vadd.f32 %v510_v28, %v2953_v37  ;;  %v3066_v7 = vadd.f32 %v513_v36, %v2956_v38  ;;  %v611_v8 = vrot.slane %v5625_v25, 1  ;;  %v5628_v33 = vld [vmem:[#allocation30_spill] sm:$0xff]  ;;  %v5631_v38 = vld [vmem:[#allocation36_spill] sm:$0xff] }
  0x6c   : > { %5616 = vst [vmem:[#allocation22_spill] sm:$0xff] %v3048_v47  ;;  %5617 = vst [vmem:[#allocation125_spill] sm:$0xff] %v3051_v54  ;;  %v3069_v18 = vadd.f32 %v515_v60, %v2959_v39  ;;  %v3072_v24 = vadd.f32 %v518_v51, %v2962_v40  ;;  %v612_v31 = vrot.slane %v5626_v41, 1  ;;  %v614_v12 = vrot.slane %v5627_v55, 1  ;;  %v5632_v39 = vld [vmem:[#allocation37_spill] sm:$0xff]  ;;  %v5644_v28 = vld [vmem:[#allocation44_spill] sm:$0xff] }
  0x6d   : > { %5618 = vst [vmem:[#allocation126_spill] sm:$0xff] %v3054_v26  ;;  %5619 = vst [vmem:[#allocation127_spill] sm:$0xff] %v3057_v23  ;;  %v616_v19 = vrot.slane %v5628_v33, 1  ;;  %v617_v37 = vrot.slane %v5629_v59, 1  ;;  %v3080_v56 = vadd.f32 %v520_v42, %v2965_v45  ;;  %v619_v9 = vrot.slane %v5631_v38, 1  ;;  %v5648_v60 = vld [vmem:[#allocation55_spill] sm:$0xff] }
  0x6e   : > { %5620 = vst [vmem:[#allocation128_spill] sm:$0xff] %v3060_v57  ;;  %5621 = vst [vmem:[#allocation129_spill] sm:$0xff] %v3063_v17  ;;  %v621_v16 = vrot.slane %v5632_v39, 1  ;;  %v622_v40 = vrot.slane %v5633_v32, 1  ;;  %v3086_v10 = vadd.f32 %v523_v43, %v2974_v62  ;;  %v3089_v13 = vadd.f32 %v525_v52, %v2980_v0  ;;  %v5649_v42 = vld [vmem:[#allocation56_spill] sm:$0xff]  ;;  %v5650_v52 = vld [vmem:[#allocation57_spill] sm:$0xff] }
  0x6f   : > { %5622 = vst [vmem:[#allocation130_spill] sm:$0xff] %v3066_v7  ;;  %5623 = vst [vmem:[#allocation131_spill] sm:$0xff] %v3069_v18  ;;  %v3092_v14 = vadd.f32 %v528_v61, %v2983_v1  ;;  %v3095_v30 = vadd.f32 %v530_v49, %v2986_v2  ;;  %v3098_v45 = vadd.f32 %v533_v50, %v2989_v3  ;;  %v5642_v2 = vld [vmem:[#allocation42_spill] sm:$0xff]  ;;  %v629_v34 = vrot.slane %v5645_v29, 1  ;;  %v5662_v7 = vld [vmem:[#allocation85_spill] sm:$0xff] }
  0x70   : > { %5624 = vst [vmem:[#allocation132_spill] sm:$0xff] %v3072_v24  ;;  %5630 = vst [vmem:[#allocation23_spill] sm:$0xff] %v3080_v56  ;;  %v3101_v15 = vadd.f32 %v535_v58, %v2992_v4  ;;  %v3104_v20 = vadd.f32 %v538_v11, %v2995_v5  ;;  %v3107_v62 = vadd.f32 %v540_v46, %v2998_v6  ;;  %v624_v22 = vrot.slane %v5642_v2, 1  ;;  %v5643_v4 = vld [vmem:[#allocation43_spill] sm:$0xff]  ;;  %v5646_v6 = vld [vmem:[#allocation49_spill] sm:$0xff] }
  0x71   : > { %5634 = vst [vmem:[#allocation24_spill] sm:$0xff] %v3086_v10  ;;  %5635 = vst [vmem:[#allocation29_spill] sm:$0xff] %v3089_v13  ;;  %v613_v0 = vsel %vm399_vm0, %v611_v8, %v612_v31  ;;  %v615_v1 = vsel %vm399_vm0, %v612_v31, %v614_v12  ;;  %v618_v21 = vsel %vm399_vm0, %v616_v19, %v617_v37  ;;  %v626_v27 = vrot.slane %v5643_v4, 1  ;;  %v5651_v49 = vld [vmem:[#allocation62_spill] sm:$0xff]  ;;  %v5652_v58 = vld [vmem:[#allocation63_spill] sm:$0xff] }
  0x72   : > { %5636 = vst [vmem:[#allocation30_spill] sm:$0xff] %v3092_v14  ;;  %5637 = vst [vmem:[#allocation31_spill] sm:$0xff] %v3095_v30  ;;  %v620_v3 = vsel %vm399_vm0, %v617_v37, %v619_v9  ;;  %v623_v53 = vsel %vm399_vm0, %v621_v16, %v622_v40  ;;  %v627_v5 = vrot.slane %v5644_v28, 1  ;;  %v631_v44 = vrot.slane %v5646_v6, 1  ;;  %v5653_v46 = vld [vmem:[#allocation64_spill] sm:$0xff]  ;;  %v5654_v31 = vld [vmem:[#allocation69_spill] sm:$0xff] }
  0x73   : > { %5638 = vst [vmem:[#allocation36_spill] sm:$0xff] %v3098_v45  ;;  %5639 = vst [vmem:[#allocation37_spill] sm:$0xff] %v3101_v15  ;;  %v632_v36 = vrot.slane %v5647_v35, 1  ;;  %v634_v51 = vrot.slane %v5648_v60, 1  ;;  %v636_v43 = vrot.slane %v5649_v42, 1  ;;  %v637_v61 = vrot.slane %v5650_v52, 1 }
  0x74   : > { %5640 = vst [vmem:[#allocation38_spill] sm:$0xff] %v3104_v20  ;;  %5641 = vst [vmem:[#allocation133_spill] sm:$0xff] %v3107_v62  ;;  %v639_v50 = vrot.slane %v5651_v49, 1  ;;  %v641_v11 = vrot.slane %v5652_v58, 1  ;;  %v642_v8 = vrot.slane %v5653_v46, 1  ;;  %v644_v12 = vrot.slane %v5654_v31, 1 }
  0x75   : > { %v5655_v19 = vld [vmem:[#allocation70_spill] sm:$0xff]  ;;  %v5656_v9 = vld [vmem:[#allocation71_spill] sm:$0xff]  ;;  %v5657_v62 = vld [vmem:[#allocation76_spill] sm:$0xff]  ;;  %v625_v56 = vsel %vm399_vm0, %v622_v40, %v624_v22  ;;  %v657_v17 = vrot.slane %v5662_v7, 1  ;;  %v628_v26 = vsel %vm399_vm0, %v626_v27, %v627_v5  ;;  %v630_v54 = vsel %vm399_vm0, %v627_v5, %v629_v34 }
  0x76   : > { %v646_v37 = vrot.slane %v5655_v19, 1  ;;  %v647_v16 = vrot.slane %v5656_v9, 1  ;;  %v649_v20 = vrot.slane %v5657_v62, 1  ;;  %v5658_v15 = vld [vmem:[#allocation77_spill] sm:$0xff]  ;;  %v5659_v30 = vld [vmem:[#allocation78_spill] sm:$0xff]  ;;  %v5660_v13 = vld [vmem:[#allocation83_spill] sm:$0xff]  ;;  %v633_v63 = vsel %vm399_vm0, %v631_v44, %v632_v36 }
  0x77   : > { %v651_v45 = vrot.slane %v5658_v15, 1  ;;  %v652_v14 = vrot.slane %v5659_v30, 1  ;;  %v654_v10 = vrot.slane %v5660_v13, 1  ;;  %v5661_v24 = vld [vmem:[#allocation84_spill] sm:$0xff]  ;;  %v5663_v57 = vld [vmem:[#allocation90_spill] sm:$0xff]  ;;  %v635_v47 = vsel %vm399_vm0, %v632_v36, %v634_v51 }
  0x78   : > { %v656_v18 = vrot.slane %v5661_v24, 1  ;;  %v659_v23 = vrot.slane %v5663_v57, 1  ;;  %v638_v48 = vsel %vm399_vm0, %v636_v43, %v637_v61  ;;  %v640_v13 = vsel %vm399_vm0, %v637_v61, %v639_v50 }
  0x79   : > { %v643_v40 = vsel %vm399_vm0, %v641_v11, %v642_v8  ;;  %v645_v22 = vsel %vm399_vm0, %v642_v8, %v644_v12  ;;  %v648_v62 = vsel %vm399_vm0, %v646_v37, %v647_v16  ;;  %v650_v57 = vsel %vm399_vm0, %v647_v16, %v649_v20 }
  0x7a   : > { %v653_v27 = vsel %vm399_vm0, %v651_v45, %v652_v14  ;;  %v655_v5 = vsel %vm399_vm0, %v652_v14, %v654_v10  ;;  %v658_v34 = vsel %vm399_vm0, %v656_v18, %v657_v17  ;;  %v660_v44 = vsel %vm399_vm0, %v657_v17, %v659_v23 }
  0x7b   : > { %v3152_v36 = vadd.f32 %v613_v0, %v5625_v25  ;;  %v3155_v51 = vadd.f32 %v615_v1, %v5626_v41  ;;  %v3158_v43 = vadd.f32 %v618_v21, %v5628_v33  ;;  %v3161_v61 = vadd.f32 %v620_v3, %v5629_v59 }
  0x7c   : > { %v3164_v45 = vadd.f32 %v623_v53, %v5632_v39  ;;  %v3167_v10 = vadd.f32 %v625_v56, %v5633_v32  ;;  %v3170_v23 = vadd.f32 %v628_v26, %v5643_v4  ;;  %v3173_v17 = vadd.f32 %v630_v54, %v5644_v28 }
  0x7d   : > { %v3176_v18 = vadd.f32 %v633_v63, %v5646_v6  ;;  %v3179_v14 = vadd.f32 %v635_v47, %v5647_v35  ;;  %v3182_v20 = vadd.f32 %v638_v48, %v5649_v42  ;;  %v3185_v0 = vadd.f32 %v640_v13, %v5650_v52 }
  0x7e   : > { %v701_v56 = vrot.slane %v5625_v25, 2  ;;  %v702_v26 = vrot.slane %v5626_v41, 2  ;;  %v704_v1 = vrot.slane %v5627_v55, 2  ;;  %v706_v54 = vrot.slane %v5628_v33, 2 }
  0x7f   : > { %v707_v63 = vrot.slane %v5629_v59, 2  ;;  %v709_v21 = vrot.slane %v5631_v38, 2  ;;  %v3194_v47 = vadd.f32 %v643_v40, %v5652_v58  ;;  %v711_v48 = vrot.slane %v5632_v39, 2 }
  0x80   : > { %v712_v13 = vrot.slane %v5633_v32, 2  ;;  %v714_v3 = vrot.slane %v5642_v2, 2  ;;  %v3200_v25 = vadd.f32 %v645_v22, %v5653_v46  ;;  %v3203_v41 = vadd.f32 %v648_v62, %v5655_v19 }
  0x81   : > { %v3206_v55 = vadd.f32 %v650_v57, %v5656_v9  ;;  %v3209_v33 = vadd.f32 %v653_v27, %v5658_v15  ;;  %v3212_v59 = vadd.f32 %v655_v5, %v5659_v30  ;;  %v3215_v38 = vadd.f32 %v658_v34, %v5661_v24 }
  0x82   : > { %v3218_v39 = vadd.f32 %v660_v44, %v5662_v7  ;;  %v703_v32 = vsel %vm490_vm1, %v701_v56, %v702_v26  ;;  %v705_v62 = vsel %vm490_vm1, %v702_v26, %v704_v1  ;;  %v708_v2 = vsel %vm490_vm1, %v706_v54, %v707_v63  ;;  %v5664_v44 = vld [vmem:[#allocation76_spill] sm:$0xff]  ;;  %v5665_v56 = vld [vmem:[#allocation83_spill] sm:$0xff]  ;;  %v5666_v26 = vld [vmem:[#allocation90_spill] sm:$0xff] }
  0x83   : > { %v710_v57 = vsel %vm490_vm1, %v707_v63, %v709_v21  ;;  %v716_v53 = vrot.slane %v5643_v4, 2  ;;  %v713_v50 = vsel %vm490_vm1, %v711_v48, %v712_v13  ;;  %v715_v11 = vsel %vm490_vm1, %v712_v13, %v714_v3 }
  0x84   : > { %v717_v8 = vrot.slane %v5644_v28, 2  ;;  %v719_v12 = vrot.slane %v5645_v29, 2  ;;  %v721_v37 = vrot.slane %v5646_v6, 2  ;;  %v722_v16 = vrot.slane %v5647_v35, 2 }
  0x85   : > { %v724_v40 = vrot.slane %v5648_v60, 2  ;;  %v726_v22 = vrot.slane %v5649_v42, 2  ;;  %v727_v27 = vrot.slane %v5650_v52, 2  ;;  %v729_v4 = vrot.slane %v5651_v49, 2 }
  0x86   : > { %v731_v5 = vrot.slane %v5652_v58, 2  ;;  %v732_v34 = vrot.slane %v5653_v46, 2  ;;  %v734_v28 = vrot.slane %v5654_v31, 2  ;;  %v736_v29 = vrot.slane %v5655_v19, 2 }
  0x87   : > { %v737_v6 = vrot.slane %v5656_v9, 2  ;;  %v739_v35 = vrot.slane %v5664_v44, 2  ;;  %v718_v60 = vsel %vm490_vm1, %v716_v53, %v717_v8  ;;  %v741_v42 = vrot.slane %v5658_v15, 2 }
  0x88   : > { %v742_v52 = vrot.slane %v5659_v30, 2  ;;  %v744_v49 = vrot.slane %v5665_v56, 2  ;;  %v720_v58 = vsel %vm490_vm1, %v717_v8, %v719_v12  ;;  %v746_v46 = vrot.slane %v5661_v24, 2 }
  0x89   : > { %v747_v31 = vrot.slane %v5662_v7, 2  ;;  %v749_v19 = vrot.slane %v5666_v26, 2  ;;  %v723_v9 = vsel %vm490_vm1, %v721_v37, %v722_v16  ;;  %v725_v1 = vsel %vm490_vm1, %v722_v16, %v724_v40 }
  0x8a   : > { %v728_v54 = vsel %vm490_vm1, %v726_v22, %v727_v27  ;;  %v730_v15 = vsel %vm490_vm1, %v727_v27, %v729_v4  ;;  %v733_v30 = vsel %vm490_vm1, %v731_v5, %v732_v34  ;;  %v735_v63 = vsel %vm490_vm1, %v732_v34, %v734_v28  ;;  %v5682_v22 = vld [vmem:[#allocation6_spill] sm:$0xff]  ;;  %v5686_v34 = vld [vmem:[#allocation9_spill] sm:$0xff] }
  0x8b   : > { %v738_v21 = vsel %vm490_vm1, %v736_v29, %v737_v6  ;;  %v740_v24 = vsel %vm490_vm1, %v737_v6, %v739_v35  ;;  %v743_v7 = vsel %vm490_vm1, %v741_v42, %v742_v52  ;;  %v745_v48 = vsel %vm490_vm1, %v742_v52, %v744_v49 }
  0x8c   : > { %v3260_v13 = vadd.f32 %v703_v32, %v3152_v36  ;;  %v3263_v3 = vadd.f32 %v705_v62, %v3155_v51  ;;  %v748_v53 = vsel %vm490_vm1, %v746_v46, %v747_v31  ;;  %v750_v8 = vsel %vm490_vm1, %v747_v31, %v749_v19  ;;  %v5698_v46 = vld [vmem:[#allocation13_spill] sm:$0xff]  ;;  %v5700_v19 = vld [vmem:[#allocation15_spill] sm:$0xff] }
  0x8d   : > { %v3268_v12 = vadd.f32 %v708_v2, %v3158_v43  ;;  %v3271_v37 = vadd.f32 %v710_v57, %v3161_v61  ;;  %v3274_v16 = vadd.f32 %v713_v50, %v3164_v45  ;;  %v3277_v40 = vadd.f32 %v715_v11, %v3167_v10  ;;  %v5678_v45 = vld [vmem:[#allocation2_spill] sm:$0xff]  ;;  %v5679_v2 = vld [vmem:[#allocation3_spill] sm:$0xff]  ;;  %v5680_v57 = vld [vmem:[#allocation4_spill] sm:$0xff] }
  0x8e   : > { %5667 = vst [vmem:[#allocation42_spill] sm:$0xff] %v3260_v13  ;;  %5668 = vst [vmem:[#allocation43_spill] sm:$0xff] %v3263_v3  ;;  %v3280_v36 = vadd.f32 %v718_v60, %v3170_v23  ;;  %v3283_v51 = vadd.f32 %v720_v58, %v3173_v17  ;;  %v3286_v32 = vadd.f32 %v723_v9, %v3176_v18  ;;  %v821_v62 = vrot.slane %v5678_v45, 1  ;;  %v5681_v23 = vld [vmem:[#allocation5_spill] sm:$0xff]  ;;  %v5684_v18 = vld [vmem:[#allocation7_spill] sm:$0xff] }
  0x8f   : > { %5669 = vst [vmem:[#allocation44_spill] sm:$0xff] %v3268_v12  ;;  %5670 = vst [vmem:[#allocation48_spill] sm:$0xff] %v3271_v37  ;;  %v3289_v43 = vadd.f32 %v725_v1, %v3179_v14  ;;  %v3292_v61 = vadd.f32 %v728_v54, %v3182_v20  ;;  %v822_v10 = vrot.slane %v5679_v2, 1  ;;  %v824_v50 = vrot.slane %v5680_v57, 1  ;;  %v5685_v14 = vld [vmem:[#allocation8_spill] sm:$0xff]  ;;  %v5701_v1 = vld [vmem:[#allocation17_spill] sm:$0xff] }
  0x90   : > { %5671 = vst [vmem:[#allocation49_spill] sm:$0xff] %v3274_v16  ;;  %5672 = vst [vmem:[#allocation50_spill] sm:$0xff] %v3277_v40  ;;  %v826_v11 = vrot.slane %v5681_v23, 1  ;;  %v827_v17 = vrot.slane %v5682_v22, 1  ;;  %v3300_v27 = vadd.f32 %v730_v15, %v3185_v0  ;;  %v829_v4 = vrot.slane %v5684_v18, 1  ;;  %v5697_v58 = vld [vmem:[#allocation12_spill] sm:$0xff] }
  0x91   : > { %5673 = vst [vmem:[#allocation55_spill] sm:$0xff] %v3280_v36  ;;  %5674 = vst [vmem:[#allocation56_spill] sm:$0xff] %v3283_v51  ;;  %v831_v5 = vrot.slane %v5685_v14, 1  ;;  %v832_v20 = vrot.slane %v5686_v34, 1  ;;  %v3306_v28 = vadd.f32 %v733_v30, %v3194_v47  ;;  %v3309_v29 = vadd.f32 %v735_v63, %v3200_v25  ;;  %v5702_v15 = vld [vmem:[#allocation19_spill] sm:$0xff]  ;;  %v5703_v63 = vld [vmem:[#allocation20_spill] sm:$0xff] }
  0x92   : > { %5675 = vst [vmem:[#allocation57_spill] sm:$0xff] %v3286_v32  ;;  %5676 = vst [vmem:[#allocation62_spill] sm:$0xff] %v3289_v43  ;;  %v3312_v6 = vadd.f32 %v738_v21, %v3203_v41  ;;  %v3315_v44 = vadd.f32 %v740_v24, %v3206_v55  ;;  %v3318_v0 = vadd.f32 %v743_v7, %v3209_v33  ;;  %v5695_v55 = vld [vmem:[#allocation10_spill] sm:$0xff]  ;;  %v839_v31 = vrot.slane %v5698_v46, 1  ;;  %v5704_v24 = vld [vmem:[#allocation21_spill] sm:$0xff] }
  0x93   : > { %5677 = vst [vmem:[#allocation63_spill] sm:$0xff] %v3292_v61  ;;  %5683 = vst [vmem:[#allocation64_spill] sm:$0xff] %v3300_v27  ;;  %v3321_v35 = vadd.f32 %v745_v48, %v3212_v59  ;;  %v3324_v60 = vadd.f32 %v748_v53, %v3215_v38  ;;  %v3327_v47 = vadd.f32 %v750_v8, %v3218_v39  ;;  %v834_v52 = vrot.slane %v5695_v55, 1  ;;  %v5696_v59 = vld [vmem:[#allocation11_spill] sm:$0xff]  ;;  %v5699_v39 = vld [vmem:[#allocation14_spill] sm:$0xff] }
  0x94   : > { %5687 = vst [vmem:[#allocation69_spill] sm:$0xff] %v3306_v28  ;;  %5688 = vst [vmem:[#allocation70_spill] sm:$0xff] %v3309_v29  ;;  %v823_v25 = vsel %vm399_vm0, %v821_v62, %v822_v10  ;;  %v825_v41 = vsel %vm399_vm0, %v822_v10, %v824_v50  ;;  %v828_v42 = vsel %vm399_vm0, %v826_v11, %v827_v17  ;;  %v836_v49 = vrot.slane %v5696_v59, 1  ;;  %v5705_v48 = vld [vmem:[#allocation25_spill] sm:$0xff]  ;;  %v5706_v8 = vld [vmem:[#allocation26_spill] sm:$0xff] }
  0x95   : > { %5689 = vst [vmem:[#allocation71_spill] sm:$0xff] %v3312_v6  ;;  %5690 = vst [vmem:[#allocation77_spill] sm:$0xff] %v3315_v44  ;;  %v830_v33 = vsel %vm399_vm0, %v827_v17, %v829_v4  ;;  %v833_v56 = vsel %vm399_vm0, %v831_v5, %v832_v20  ;;  %v837_v38 = vrot.slane %v5697_v58, 1  ;;  %v841_v26 = vrot.slane %v5699_v39, 1  ;;  %v5707_v10 = vld [vmem:[#allocation27_spill] sm:$0xff]  ;;  %v5708_v11 = vld [vmem:[#allocation28_spill] sm:$0xff] }
  0x96   : > { %5691 = vst [vmem:[#allocation78_spill] sm:$0xff] %v3318_v0  ;;  %5692 = vst [vmem:[#allocation84_spill] sm:$0xff] %v3321_v35  ;;  %v842_v9 = vrot.slane %v5700_v19, 1  ;;  %v844_v54 = vrot.slane %v5701_v1, 1  ;;  %v846_v30 = vrot.slane %v5702_v15, 1  ;;  %v847_v21 = vrot.slane %v5703_v63, 1 }
  0x97   : > { %5693 = vst [vmem:[#allocation85_spill] sm:$0xff] %v3324_v60  ;;  %5694 = vst [vmem:[#allocation76_spill] sm:$0xff] %v3327_v47  ;;  %v849_v7 = vrot.slane %v5704_v24, 1  ;;  %v851_v53 = vrot.slane %v5705_v48, 1  ;;  %v852_v62 = vrot.slane %v5706_v8, 1  ;;  %v854_v50 = vrot.slane %v5707_v10, 1 }
  0x98   : > { %v856_v17 = vrot.slane %v5708_v11, 1  ;;  %v5709_v4 = vld [vmem:[#allocation32_spill] sm:$0xff]  ;;  %v5710_v47 = vld [vmem:[#allocation33_spill] sm:$0xff]  ;;  %v5711_v35 = vld [vmem:[#allocation34_spill] sm:$0xff]  ;;  %v835_v27 = vsel %vm399_vm0, %v832_v20, %v834_v52  ;;  %v838_v16 = vsel %vm399_vm0, %v836_v49, %v837_v38  ;;  %v840_v37 = vsel %vm399_vm0, %v837_v38, %v839_v31 }
  0x99   : > { %v857_v5 = vrot.slane %v5709_v4, 1  ;;  %v859_v60 = vrot.slane %v5710_v47, 1  ;;  %v861_v0 = vrot.slane %v5711_v35, 1  ;;  %v5712_v44 = vld [vmem:[#allocation35_spill] sm:$0xff]  ;;  %v5714_v61 = vld [vmem:[#allocation40_spill] sm:$0xff]  ;;  %v5715_v32 = vld [vmem:[#allocation41_spill] sm:$0xff]  ;;  %v843_v3 = vsel %vm399_vm0, %v841_v26, %v842_v9 }
  0x9a   : > { %v862_v6 = vrot.slane %v5712_v44, 1  ;;  %v5713_v29 = vld [vmem:[#allocation39_spill] sm:$0xff]  ;;  %v866_v43 = vrot.slane %v5714_v61, 1  ;;  %v867_v51 = vrot.slane %v5715_v32, 1  ;;  %v5716_v36 = vld [vmem:[#allocation45_spill] sm:$0xff]  ;;  %v845_v12 = vsel %vm399_vm0, %v842_v9, %v844_v54 }
  0x9b   : > { %v864_v28 = vrot.slane %v5713_v29, 1  ;;  %v869_v40 = vrot.slane %v5716_v36, 1  ;;  %v848_v13 = vsel %vm399_vm0, %v846_v30, %v847_v21  ;;  %v850_v29 = vsel %vm399_vm0, %v847_v21, %v849_v7 }
  0x9c   : > { %v853_v20 = vsel %vm399_vm0, %v851_v53, %v852_v62  ;;  %v855_v52 = vsel %vm399_vm0, %v852_v62, %v854_v50  ;;  %v858_v47 = vsel %vm399_vm0, %v856_v17, %v857_v5  ;;  %v860_v36 = vsel %vm399_vm0, %v857_v5, %v859_v60 }
  0x9d   : > { %v863_v49 = vsel %vm399_vm0, %v861_v0, %v862_v6  ;;  %v865_v38 = vsel %vm399_vm0, %v862_v6, %v864_v28  ;;  %v868_v31 = vsel %vm399_vm0, %v866_v43, %v867_v51  ;;  %v870_v26 = vsel %vm399_vm0, %v867_v51, %v869_v40 }
  0x9e   : > { %v3372_v9 = vadd.f32 %v823_v25, %v5678_v45  ;;  %v3375_v54 = vadd.f32 %v825_v41, %v5679_v2  ;;  %v3378_v30 = vadd.f32 %v828_v42, %v5681_v23  ;;  %v3381_v21 = vadd.f32 %v830_v33, %v5682_v22 }
  0x9f   : > { %v3384_v0 = vadd.f32 %v833_v56, %v5685_v14  ;;  %v3387_v28 = vadd.f32 %v835_v27, %v5686_v34  ;;  %v3390_v40 = vadd.f32 %v838_v16, %v5696_v59  ;;  %v3393_v51 = vadd.f32 %v840_v37, %v5697_v58 }
  0xa0   : > { %v3396_v43 = vadd.f32 %v843_v3, %v5699_v39  ;;  %v3399_v6 = vadd.f32 %v845_v12, %v5700_v19  ;;  %v3402_v60 = vadd.f32 %v848_v13, %v5702_v15  ;;  %v3405_v25 = vadd.f32 %v850_v29, %v5703_v63 }
  0xa1   : > { %v911_v27 = vrot.slane %v5678_v45, 2  ;;  %v912_v16 = vrot.slane %v5679_v2, 2  ;;  %v914_v41 = vrot.slane %v5680_v57, 2  ;;  %v916_v37 = vrot.slane %v5681_v23, 2 }
  0xa2   : > { %v917_v3 = vrot.slane %v5682_v22, 2  ;;  %v919_v42 = vrot.slane %v5684_v18, 2  ;;  %v3414_v12 = vadd.f32 %v853_v20, %v5705_v48  ;;  %v921_v13 = vrot.slane %v5685_v14, 2 }
  0xa3   : > { %v922_v29 = vrot.slane %v5686_v34, 2  ;;  %v924_v33 = vrot.slane %v5695_v55, 2  ;;  %v3420_v45 = vadd.f32 %v855_v52, %v5706_v8  ;;  %v3423_v2 = vadd.f32 %v858_v47, %v5708_v11 }
  0xa4   : > { %v3426_v57 = vadd.f32 %v860_v36, %v5709_v4  ;;  %v3429_v23 = vadd.f32 %v863_v49, %v5711_v35  ;;  %v3432_v22 = vadd.f32 %v865_v38, %v5712_v44  ;;  %v3435_v18 = vadd.f32 %v868_v31, %v5714_v61 }
  0xa5   : > { %v3438_v14 = vadd.f32 %v870_v26, %v5715_v32  ;;  %v913_v34 = vsel %vm490_vm1, %v911_v27, %v912_v16  ;;  %v915_v47 = vsel %vm490_vm1, %v912_v16, %v914_v41  ;;  %v918_v55 = vsel %vm490_vm1, %v916_v37, %v917_v3  ;;  %v5717_v26 = vld [vmem:[#allocation33_spill] sm:$0xff]  ;;  %v5718_v27 = vld [vmem:[#allocation39_spill] sm:$0xff] }
  0xa6   : > { %v920_v36 = vsel %vm490_vm1, %v917_v3, %v919_v42  ;;  %v926_v56 = vrot.slane %v5696_v59, 2  ;;  %v923_v7 = vsel %vm490_vm1, %v921_v13, %v922_v29  ;;  %v925_v53 = vsel %vm490_vm1, %v922_v29, %v924_v33  ;;  %v5719_v16 = vld [vmem:[#allocation45_spill] sm:$0xff] }
  0xa7   : > { %v927_v62 = vrot.slane %v5697_v58, 2  ;;  %v929_v50 = vrot.slane %v5698_v46, 2  ;;  %v931_v17 = vrot.slane %v5699_v39, 2  ;;  %v932_v5 = vrot.slane %v5700_v19, 2 }
  0xa8   : > { %v934_v20 = vrot.slane %v5701_v1, 2  ;;  %v936_v52 = vrot.slane %v5702_v15, 2  ;;  %v937_v49 = vrot.slane %v5703_v63, 2  ;;  %v939_v59 = vrot.slane %v5704_v24, 2 }
  0xa9   : > { %v941_v38 = vrot.slane %v5705_v48, 2  ;;  %v942_v31 = vrot.slane %v5706_v8, 2  ;;  %v944_v58 = vrot.slane %v5707_v10, 2  ;;  %v946_v46 = vrot.slane %v5708_v11, 2 }
  0xaa   : > { %v947_v39 = vrot.slane %v5709_v4, 2  ;;  %v949_v19 = vrot.slane %v5717_v26, 2  ;;  %v928_v1 = vsel %vm490_vm1, %v926_v56, %v927_v62  ;;  %v951_v15 = vrot.slane %v5711_v35, 2 }
  0xab   : > { %v952_v63 = vrot.slane %v5712_v44, 2  ;;  %v954_v24 = vrot.slane %v5718_v27, 2  ;;  %v930_v48 = vsel %vm490_vm1, %v927_v62, %v929_v50  ;;  %v956_v8 = vrot.slane %v5714_v61, 2 }
  0xac   : > { %v957_v10 = vrot.slane %v5715_v32, 2  ;;  %v959_v11 = vrot.slane %v5719_v16, 2  ;;  %v933_v4 = vsel %vm490_vm1, %v931_v17, %v932_v5  ;;  %v935_v41 = vsel %vm490_vm1, %v932_v5, %v934_v20 }
  0xad   : > { %v938_v37 = vsel %vm490_vm1, %v936_v52, %v937_v49  ;;  %v940_v35 = vsel %vm490_vm1, %v937_v49, %v939_v59  ;;  %v943_v44 = vsel %vm490_vm1, %v941_v38, %v942_v31  ;;  %v945_v3 = vsel %vm490_vm1, %v942_v31, %v944_v58  ;;  %v5735_v52 = vld [vmem:[#allocation53_spill] sm:$0xff]  ;;  %v5739_v31 = vld [vmem:[#allocation60_spill] sm:$0xff] }
  0xae   : > { %v948_v42 = vsel %vm490_vm1, %v946_v46, %v947_v39  ;;  %v950_v61 = vsel %vm490_vm1, %v947_v39, %v949_v19  ;;  %v953_v32 = vsel %vm490_vm1, %v951_v15, %v952_v63  ;;  %v955_v13 = vsel %vm490_vm1, %v952_v63, %v954_v24 }
  0xaf   : > { %v3480_v29 = vadd.f32 %v913_v34, %v3372_v9  ;;  %v3483_v33 = vadd.f32 %v915_v47, %v3375_v54  ;;  %v958_v56 = vsel %vm490_vm1, %v956_v8, %v957_v10  ;;  %v960_v62 = vsel %vm490_vm1, %v957_v10, %v959_v11  ;;  %v5751_v8 = vld [vmem:[#allocation72_spill] sm:$0xff]  ;;  %v5753_v11 = vld [vmem:[#allocation74_spill] sm:$0xff] }
  0xb0   : > { %v3488_v50 = vadd.f32 %v918_v55, %v3378_v30  ;;  %v3491_v17 = vadd.f32 %v920_v36, %v3381_v21  ;;  %v3494_v5 = vadd.f32 %v923_v7, %v3384_v0  ;;  %v3497_v20 = vadd.f32 %v925_v53, %v3387_v28  ;;  %v5731_v0 = vld [vmem:[#allocation46_spill] sm:$0xff]  ;;  %v5732_v55 = vld [vmem:[#allocation47_spill] sm:$0xff] }
  0xb1   : > { %5720 = vst [vmem:[#allocation83_spill] sm:$0xff] %v3480_v29  ;;  %5721 = vst [vmem:[#allocation90_spill] sm:$0xff] %v3483_v33  ;;  %v3500_v9 = vadd.f32 %v928_v1, %v3390_v40  ;;  %v3503_v54 = vadd.f32 %v930_v48, %v3393_v51  ;;  %v3506_v34 = vadd.f32 %v933_v4, %v3396_v43  ;;  %v1031_v47 = vrot.slane %v5731_v0, 1  ;;  %v5733_v36 = vld [vmem:[#allocation51_spill] sm:$0xff]  ;;  %v5734_v40 = vld [vmem:[#allocation52_spill] sm:$0xff] }
  0xb2   : > { %5722 = vst [vmem:[#allocation2_spill] sm:$0xff] %v3488_v50  ;;  %5723 = vst [vmem:[#allocation3_spill] sm:$0xff] %v3491_v17  ;;  %v3509_v30 = vadd.f32 %v935_v41, %v3399_v6  ;;  %v3512_v21 = vadd.f32 %v938_v37, %v3402_v60  ;;  %v1032_v28 = vrot.slane %v5732_v55, 1  ;;  %v1034_v7 = vrot.slane %v5733_v36, 1  ;;  %v5737_v43 = vld [vmem:[#allocation58_spill] sm:$0xff]  ;;  %v5738_v6 = vld [vmem:[#allocation59_spill] sm:$0xff] }
  0xb3   : > { %5724 = vst [vmem:[#allocation4_spill] sm:$0xff] %v3494_v5  ;;  %5725 = vst [vmem:[#allocation5_spill] sm:$0xff] %v3497_v20  ;;  %v1036_v53 = vrot.slane %v5734_v40, 1  ;;  %v1037_v51 = vrot.slane %v5735_v52, 1  ;;  %v3520_v49 = vadd.f32 %v940_v35, %v3405_v25  ;;  %v1039_v59 = vrot.slane %v5737_v43, 1  ;;  %v5750_v48 = vld [vmem:[#allocation67_spill] sm:$0xff] }
  0xb4   : > { %5726 = vst [vmem:[#allocation6_spill] sm:$0xff] %v3500_v9  ;;  %5727 = vst [vmem:[#allocation7_spill] sm:$0xff] %v3503_v54  ;;  %v1041_v38 = vrot.slane %v5738_v6, 1  ;;  %v1042_v60 = vrot.slane %v5739_v31, 1  ;;  %v3526_v58 = vadd.f32 %v943_v44, %v3414_v12  ;;  %v3529_v46 = vadd.f32 %v945_v3, %v3420_v45  ;;  %v5754_v41 = vld [vmem:[#allocation79_spill] sm:$0xff]  ;;  %v5755_v35 = vld [vmem:[#allocation80_spill] sm:$0xff] }
  0xb5   : > { %5728 = vst [vmem:[#allocation8_spill] sm:$0xff] %v3506_v34  ;;  %5729 = vst [vmem:[#allocation9_spill] sm:$0xff] %v3509_v30  ;;  %v3532_v39 = vadd.f32 %v948_v42, %v3423_v2  ;;  %v3535_v26 = vadd.f32 %v950_v61, %v3426_v57  ;;  %v3538_v25 = vadd.f32 %v953_v32, %v3429_v23  ;;  %v5748_v57 = vld [vmem:[#allocation65_spill] sm:$0xff]  ;;  %v1049_v10 = vrot.slane %v5751_v8, 1  ;;  %v5757_v61 = vld [vmem:[#allocation86_spill] sm:$0xff] }
  0xb6   : > { %5730 = vst [vmem:[#allocation10_spill] sm:$0xff] %v3512_v21  ;;  %5736 = vst [vmem:[#allocation11_spill] sm:$0xff] %v3520_v49  ;;  %v3541_v19 = vadd.f32 %v955_v13, %v3432_v22  ;;  %v3544_v1 = vadd.f32 %v958_v56, %v3435_v18  ;;  %v3547_v12 = vadd.f32 %v960_v62, %v3438_v14  ;;  %v1044_v63 = vrot.slane %v5748_v57, 1  ;;  %v5749_v22 = vld [vmem:[#allocation66_spill] sm:$0xff]  ;;  %v5752_v14 = vld [vmem:[#allocation73_spill] sm:$0xff] }
  0xb7   : > { %5740 = vst [vmem:[#allocation12_spill] sm:$0xff] %v3526_v58  ;;  %5741 = vst [vmem:[#allocation13_spill] sm:$0xff] %v3529_v46  ;;  %v1033_v45 = vsel %vm399_vm0, %v1031_v47, %v1032_v28  ;;  %v1035_v2 = vsel %vm399_vm0, %v1032_v28, %v1034_v7  ;;  %v1038_v15 = vsel %vm399_vm0, %v1036_v53, %v1037_v51  ;;  %v1046_v24 = vrot.slane %v5749_v22, 1  ;;  %v5756_v3 = vld [vmem:[#allocation81_spill] sm:$0xff]  ;;  %v5758_v13 = vld [vmem:[#allocation87_spill] sm:$0xff] }
  0xb8   : > { %5742 = vst [vmem:[#allocation14_spill] sm:$0xff] %v3532_v39  ;;  %5743 = vst [vmem:[#allocation15_spill] sm:$0xff] %v3535_v26  ;;  %v1040_v23 = vsel %vm399_vm0, %v1037_v51, %v1039_v59  ;;  %v1043_v27 = vsel %vm399_vm0, %v1041_v38, %v1042_v60  ;;  %v1047_v18 = vrot.slane %v5750_v48, 1  ;;  %v1051_v16 = vrot.slane %v5752_v14, 1  ;;  %v5759_v62 = vld [vmem:[#allocation88_spill] sm:$0xff]  ;;  %v5760_v28 = vld [vmem:[#allocation91_spill] sm:$0xff] }
  0xb9   : > { %5744 = vst [vmem:[#allocation17_spill] sm:$0xff] %v3538_v25  ;;  %5745 = vst [vmem:[#allocation19_spill] sm:$0xff] %v3541_v19  ;;  %v1052_v4 = vrot.slane %v5753_v11, 1  ;;  %v1054_v37 = vrot.slane %v5754_v41, 1  ;;  %v1056_v44 = vrot.slane %v5755_v35, 1  ;;  %v1057_v42 = vrot.slane %v5756_v3, 1 }
  0xba   : > { %5746 = vst [vmem:[#allocation20_spill] sm:$0xff] %v3544_v1  ;;  %5747 = vst [vmem:[#allocation21_spill] sm:$0xff] %v3547_v12  ;;  %v1059_v32 = vrot.slane %v5757_v61, 1  ;;  %v1061_v56 = vrot.slane %v5758_v13, 1  ;;  %v1062_v47 = vrot.slane %v5759_v62, 1  ;;  %v1064_v7 = vrot.slane %v5760_v28, 1 }
  0xbb   : > { %v5761_v53 = vld [vmem:[#allocation92_spill] sm:$0xff]  ;;  %v5762_v59 = vld [vmem:[#allocation93_spill] sm:$0xff]  ;;  %v5763_v12 = vld [vmem:[#allocation95_spill] sm:$0xff]  ;;  %v1045_v49 = vsel %vm399_vm0, %v1042_v60, %v1044_v63  ;;  %v1048_v5 = vsel %vm399_vm0, %v1046_v24, %v1047_v18  ;;  %v1050_v17 = vsel %vm399_vm0, %v1047_v18, %v1049_v10  ;;  %v1053_v33 = vsel %vm399_vm0, %v1051_v16, %v1052_v4 }
  0xbc   : > { %v1066_v51 = vrot.slane %v5761_v53, 1  ;;  %v1067_v38 = vrot.slane %v5762_v59, 1  ;;  %v1069_v1 = vrot.slane %v5763_v12, 1  ;;  %v5764_v19 = vld [vmem:[#allocation96_spill] sm:$0xff]  ;;  %v5765_v26 = vld [vmem:[#allocation97_spill] sm:$0xff]  ;;  %v5766_v46 = vld [vmem:[#allocation99_spill] sm:$0xff]  ;;  %v1055_v50 = vsel %vm399_vm0, %v1052_v4, %v1054_v37 }
  0xbd   : > { %v1071_v25 = vrot.slane %v5764_v19, 1  ;;  %v1072_v39 = vrot.slane %v5765_v26, 1  ;;  %v1074_v58 = vrot.slane %v5766_v46, 1  ;;  %v5767_v21 = vld [vmem:[#allocation100_spill] sm:$0xff]  ;;  %v5768_v34 = vld [vmem:[#allocation101_spill] sm:$0xff]  ;;  %v5769_v9 = vld [vmem:[#allocation103_spill] sm:$0xff]  ;;  %v1058_v29 = vsel %vm399_vm0, %v1056_v44, %v1057_v42 }
  0xbe   : > { %v1076_v30 = vrot.slane %v5767_v21, 1  ;;  %v1077_v54 = vrot.slane %v5768_v34, 1  ;;  %v1079_v20 = vrot.slane %v5769_v9, 1  ;;  %v1060_v46 = vsel %vm399_vm0, %v1057_v42, %v1059_v32 }
  0xbf   : > { %v1063_v60 = vsel %vm399_vm0, %v1061_v56, %v1062_v47  ;;  %v1065_v63 = vsel %vm399_vm0, %v1062_v47, %v1064_v7  ;;  %v1068_v12 = vsel %vm399_vm0, %v1066_v51, %v1067_v38  ;;  %v1070_v9 = vsel %vm399_vm0, %v1067_v38, %v1069_v1 }
  0xc0   : > { %v1073_v24 = vsel %vm399_vm0, %v1071_v25, %v1072_v39  ;;  %v1075_v18 = vsel %vm399_vm0, %v1072_v39, %v1074_v58  ;;  %v1078_v10 = vsel %vm399_vm0, %v1076_v30, %v1077_v54  ;;  %v1080_v16 = vsel %vm399_vm0, %v1077_v54, %v1079_v20 }
  0xc1   : > { %v3592_v4 = vadd.f32 %v1033_v45, %v5731_v0  ;;  %v3595_v37 = vadd.f32 %v1035_v2, %v5732_v55  ;;  %v3598_v44 = vadd.f32 %v1038_v15, %v5734_v40  ;;  %v3601_v42 = vadd.f32 %v1040_v23, %v5735_v52 }
  0xc2   : > { %v3604_v25 = vadd.f32 %v1043_v27, %v5738_v6  ;;  %v3607_v58 = vadd.f32 %v1045_v49, %v5739_v31  ;;  %v3610_v20 = vadd.f32 %v1048_v5, %v5749_v22  ;;  %v3613_v54 = vadd.f32 %v1050_v17, %v5750_v48 }
  0xc3   : > { %v3616_v30 = vadd.f32 %v1053_v33, %v5752_v14  ;;  %v3619_v39 = vadd.f32 %v1055_v50, %v5753_v11  ;;  %v3622_v1 = vadd.f32 %v1058_v29, %v5755_v35  ;;  %v3625_v45 = vadd.f32 %v1060_v46, %v5756_v3 }
  0xc4   : > { %v1121_v49 = vrot.slane %v5731_v0, 2  ;;  %v1122_v5 = vrot.slane %v5732_v55, 2  ;;  %v1124_v2 = vrot.slane %v5733_v36, 2  ;;  %v1126_v17 = vrot.slane %v5734_v40, 2 }
  0xc5   : > { %v1127_v33 = vrot.slane %v5735_v52, 2  ;;  %v1129_v15 = vrot.slane %v5737_v43, 2  ;;  %v3634_v50 = vadd.f32 %v1063_v60, %v5758_v13  ;;  %v1131_v29 = vrot.slane %v5738_v6, 2 }
  0xc6   : > { %v1132_v46 = vrot.slane %v5739_v31, 2  ;;  %v1134_v23 = vrot.slane %v5748_v57, 2  ;;  %v3640_v0 = vadd.f32 %v1065_v63, %v5759_v62  ;;  %v3643_v55 = vadd.f32 %v1068_v12, %v5761_v53 }
  0xc7   : > { %v3646_v36 = vadd.f32 %v1070_v9, %v5762_v59  ;;  %v3649_v40 = vadd.f32 %v1073_v24, %v5764_v19  ;;  %v3652_v52 = vadd.f32 %v1075_v18, %v5765_v26  ;;  %v3655_v43 = vadd.f32 %v1078_v10, %v5767_v21 }
  0xc8   : > { %v3658_v6 = vadd.f32 %v1080_v16, %v5768_v34  ;;  %v1123_v31 = vsel %vm490_vm1, %v1121_v49, %v1122_v5  ;;  %v1125_v12 = vsel %vm490_vm1, %v1122_v5, %v1124_v2  ;;  %v1128_v57 = vsel %vm490_vm1, %v1126_v17, %v1127_v33  ;;  %v5770_v16 = vld [vmem:[#allocation95_spill] sm:$0xff] }
  0xc9   : > { %v1130_v9 = vsel %vm490_vm1, %v1127_v33, %v1129_v15  ;;  %v1136_v27 = vrot.slane %v5749_v22, 2  ;;  %v1133_v32 = vsel %vm490_vm1, %v1131_v29, %v1132_v46  ;;  %v1135_v56 = vsel %vm490_vm1, %v1132_v46, %v1134_v23  ;;  %v5771_v49 = vld [vmem:[#allocation99_spill] sm:$0xff] }
  0xca   : > { %v1137_v47 = vrot.slane %v5750_v48, 2  ;;  %v1139_v7 = vrot.slane %v5751_v8, 2  ;;  %v1141_v51 = vrot.slane %v5752_v14, 2  ;;  %v1142_v38 = vrot.slane %v5753_v11, 2  ;;  %v5772_v5 = vld [vmem:[#allocation103_spill] sm:$0xff] }
  0xcb   : > { %v1144_v60 = vrot.slane %v5754_v41, 2  ;;  %v1146_v63 = vrot.slane %v5755_v35, 2  ;;  %v1147_v24 = vrot.slane %v5756_v3, 2  ;;  %v1149_v22 = vrot.slane %v5757_v61, 2 }
  0xcc   : > { %v1151_v18 = vrot.slane %v5758_v13, 2  ;;  %v1152_v10 = vrot.slane %v5759_v62, 2  ;;  %v1154_v48 = vrot.slane %v5760_v28, 2  ;;  %v1156_v8 = vrot.slane %v5761_v53, 2 }
  0xcd   : > { %v1157_v14 = vrot.slane %v5762_v59, 2  ;;  %v1159_v11 = vrot.slane %v5770_v16, 2  ;;  %v1138_v41 = vsel %vm490_vm1, %v1136_v27, %v1137_v47  ;;  %v1161_v35 = vrot.slane %v5764_v19, 2 }
  0xce   : > { %v1162_v3 = vrot.slane %v5765_v26, 2  ;;  %v1164_v61 = vrot.slane %v5771_v49, 2  ;;  %v1140_v13 = vsel %vm490_vm1, %v1137_v47, %v1139_v7  ;;  %v1166_v62 = vrot.slane %v5767_v21, 2 }
  0xcf   : > { %v1167_v28 = vrot.slane %v5768_v34, 2  ;;  %v1169_v53 = vrot.slane %v5772_v5, 2  ;;  %v1143_v59 = vsel %vm490_vm1, %v1141_v51, %v1142_v38  ;;  %v1145_v2 = vsel %vm490_vm1, %v1142_v38, %v1144_v60 }
  0xd0   : > { %v1148_v17 = vsel %vm490_vm1, %v1146_v63, %v1147_v24  ;;  %v1150_v19 = vsel %vm490_vm1, %v1147_v24, %v1149_v22  ;;  %v1153_v26 = vsel %vm490_vm1, %v1151_v18, %v1152_v10  ;;  %v1155_v33 = vsel %vm490_vm1, %v1152_v10, %v1154_v48  ;;  %v5788_v63 = vld [vmem:[#allocation82_spill] sm:$0xff] }
  0xd1   : > { %v1158_v15 = vsel %vm490_vm1, %v1156_v8, %v1157_v14  ;;  %v1160_v21 = vsel %vm490_vm1, %v1157_v14, %v1159_v11  ;;  %v1163_v34 = vsel %vm490_vm1, %v1161_v35, %v1162_v3  ;;  %v1165_v29 = vsel %vm490_vm1, %v1162_v3, %v1164_v61  ;;  %v5792_v10 = vld [vmem:[#allocation98_spill] sm:$0xff] }
  0xd2   : > { %v3700_v46 = vadd.f32 %v1123_v31, %v3592_v4  ;;  %v3703_v23 = vadd.f32 %v1125_v12, %v3595_v37  ;;  %v1168_v27 = vsel %vm490_vm1, %v1166_v62, %v1167_v28  ;;  %v1170_v47 = vsel %vm490_vm1, %v1167_v28, %v1169_v53  ;;  %v5804_v62 = vld [vmem:[#allocation106_spill] sm:$0xff]  ;;  %v5806_v53 = vld [vmem:[#allocation108_spill] sm:$0xff] }
  0xd3   : > { %v3708_v7 = vadd.f32 %v1128_v57, %v3598_v44  ;;  %v3711_v51 = vadd.f32 %v1130_v9, %v3601_v42  ;;  %v3714_v38 = vadd.f32 %v1133_v32, %v3604_v25  ;;  %v3717_v60 = vadd.f32 %v1135_v56, %v3607_v58  ;;  %v5784_v25 = vld [vmem:[#allocation54_spill] sm:$0xff]  ;;  %v5785_v57 = vld [vmem:[#allocation61_spill] sm:$0xff]  ;;  %v5786_v9 = vld [vmem:[#allocation68_spill] sm:$0xff] }
  0xd4   : > { %5773 = vst [vmem:[#allocation25_spill] sm:$0xff] %v3700_v46  ;;  %5774 = vst [vmem:[#allocation26_spill] sm:$0xff] %v3703_v23  ;;  %v3720_v4 = vadd.f32 %v1138_v41, %v3610_v20  ;;  %v3723_v37 = vadd.f32 %v1140_v13, %v3613_v54  ;;  %v3726_v31 = vadd.f32 %v1143_v59, %v3616_v30  ;;  %v1241_v12 = vrot.slane %v5784_v25, 1  ;;  %v5787_v20 = vld [vmem:[#allocation75_spill] sm:$0xff]  ;;  %v5790_v30 = vld [vmem:[#allocation89_spill] sm:$0xff] }
  0xd5   : > { %5775 = vst [vmem:[#allocation27_spill] sm:$0xff] %v3708_v7  ;;  %5776 = vst [vmem:[#allocation28_spill] sm:$0xff] %v3711_v51  ;;  %v3729_v44 = vadd.f32 %v1145_v2, %v3619_v39  ;;  %v3732_v42 = vadd.f32 %v1148_v17, %v3622_v1  ;;  %v1242_v58 = vrot.slane %v5785_v57, 1  ;;  %v1244_v32 = vrot.slane %v5786_v9, 1  ;;  %v5791_v39 = vld [vmem:[#allocation94_spill] sm:$0xff]  ;;  %v5803_v13 = vld [vmem:[#allocation105_spill] sm:$0xff] }
  0xd6   : > { %5777 = vst [vmem:[#allocation32_spill] sm:$0xff] %v3714_v38  ;;  %5778 = vst [vmem:[#allocation34_spill] sm:$0xff] %v3717_v60  ;;  %v1246_v56 = vrot.slane %v5787_v20, 1  ;;  %v1247_v54 = vrot.slane %v5788_v63, 1  ;;  %v3740_v24 = vadd.f32 %v1150_v19, %v3625_v45  ;;  %v1249_v22 = vrot.slane %v5790_v30, 1  ;;  %v5807_v2 = vld [vmem:[#allocation109_spill] sm:$0xff] }
  0xd7   : > { %5779 = vst [vmem:[#allocation35_spill] sm:$0xff] %v3720_v4  ;;  %5780 = vst [vmem:[#allocation40_spill] sm:$0xff] %v3723_v37  ;;  %v1251_v18 = vrot.slane %v5791_v39, 1  ;;  %v1252_v1 = vrot.slane %v5792_v10, 1  ;;  %v3746_v48 = vadd.f32 %v1153_v26, %v3634_v50  ;;  %v3749_v8 = vadd.f32 %v1155_v33, %v3640_v0  ;;  %v5808_v19 = vld [vmem:[#allocation110_spill] sm:$0xff]  ;;  %v5809_v33 = vld [vmem:[#allocation111_spill] sm:$0xff] }
  0xd8   : > { %5781 = vst [vmem:[#allocation41_spill] sm:$0xff] %v3726_v31  ;;  %5782 = vst [vmem:[#allocation33_spill] sm:$0xff] %v3729_v44  ;;  %v3752_v14 = vadd.f32 %v1158_v15, %v3643_v55  ;;  %v3755_v16 = vadd.f32 %v1160_v21, %v3646_v36  ;;  %v3758_v45 = vadd.f32 %v1163_v34, %v3649_v40  ;;  %v5801_v36 = vld [vmem:[#allocation102_spill] sm:$0xff]  ;;  %v1259_v28 = vrot.slane %v5804_v62, 1  ;;  %v5810_v21 = vld [vmem:[#allocation112_spill] sm:$0xff] }
  0xd9   : > { %5783 = vst [vmem:[#allocation39_spill] sm:$0xff] %v3732_v42  ;;  %5789 = vst [vmem:[#allocation45_spill] sm:$0xff] %v3740_v24  ;;  %v3761_v11 = vadd.f32 %v1165_v29, %v3652_v52  ;;  %v3764_v41 = vadd.f32 %v1168_v27, %v3655_v43  ;;  %v3767_v50 = vadd.f32 %v1170_v47, %v3658_v6  ;;  %v1254_v3 = vrot.slane %v5801_v36, 1  ;;  %v5802_v52 = vld [vmem:[#allocation104_spill] sm:$0xff]  ;;  %v5805_v6 = vld [vmem:[#allocation107_spill] sm:$0xff] }
  0xda   : > { %5793 = vst [vmem:[#allocation46_spill] sm:$0xff] %v3746_v48  ;;  %5794 = vst [vmem:[#allocation47_spill] sm:$0xff] %v3749_v8  ;;  %v1243_v0 = vsel %vm399_vm0, %v1241_v12, %v1242_v58  ;;  %v1245_v55 = vsel %vm399_vm0, %v1242_v58, %v1244_v32  ;;  %v1248_v35 = vsel %vm399_vm0, %v1246_v56, %v1247_v54  ;;  %v1256_v61 = vrot.slane %v5802_v52, 1  ;;  %v5811_v29 = vld [vmem:[#allocation113_spill] sm:$0xff]  ;;  %v5812_v47 = vld [vmem:[#allocation114_spill] sm:$0xff] }
  0xdb   : > { %5795 = vst [vmem:[#allocation51_spill] sm:$0xff] %v3752_v14  ;;  %5796 = vst [vmem:[#allocation52_spill] sm:$0xff] %v3755_v16  ;;  %v1250_v40 = vsel %vm399_vm0, %v1247_v54, %v1249_v22  ;;  %v1253_v49 = vsel %vm399_vm0, %v1251_v18, %v1252_v1  ;;  %v1257_v43 = vrot.slane %v5803_v13, 1  ;;  %v1261_v5 = vrot.slane %v5805_v6, 1  ;;  %v5813_v58 = vld [vmem:[#allocation115_spill] sm:$0xff]  ;;  %v5814_v56 = vld [vmem:[#allocation116_spill] sm:$0xff] }
  0xdc   : > { %5797 = vst [vmem:[#allocation53_spill] sm:$0xff] %v3758_v45  ;;  %5798 = vst [vmem:[#allocation58_spill] sm:$0xff] %v3761_v11  ;;  %v1262_v59 = vrot.slane %v5806_v53, 1  ;;  %v1264_v17 = vrot.slane %v5807_v2, 1  ;;  %v1266_v26 = vrot.slane %v5808_v19, 1  ;;  %v1267_v15 = vrot.slane %v5809_v33, 1 }
  0xdd   : > { %5799 = vst [vmem:[#allocation59_spill] sm:$0xff] %v3764_v41  ;;  %5800 = vst [vmem:[#allocation60_spill] sm:$0xff] %v3767_v50  ;;  %v1269_v34 = vrot.slane %v5810_v21, 1  ;;  %v1271_v27 = vrot.slane %v5811_v29, 1  ;;  %v1272_v12 = vrot.slane %v5812_v47, 1  ;;  %v1274_v32 = vrot.slane %v5813_v58, 1 }
  0xde   : > { %v1276_v54 = vrot.slane %v5814_v56, 1  ;;  %v5815_v22 = vld [vmem:[#allocation117_spill] sm:$0xff]  ;;  %v5816_v50 = vld [vmem:[#allocation118_spill] sm:$0xff]  ;;  %v5817_v11 = vld [vmem:[#allocation119_spill] sm:$0xff]  ;;  %v1255_v24 = vsel %vm399_vm0, %v1252_v1, %v1254_v3  ;;  %v1258_v38 = vsel %vm399_vm0, %v1256_v61, %v1257_v43  ;;  %v1260_v51 = vsel %vm399_vm0, %v1257_v43, %v1259_v28 }
  0xdf   : > { %v1277_v18 = vrot.slane %v5815_v22, 1  ;;  %v1279_v41 = vrot.slane %v5816_v50, 1  ;;  %v1281_v45 = vrot.slane %v5817_v11, 1  ;;  %v5818_v16 = vld [vmem:[#allocation120_spill] sm:$0xff]  ;;  %v5819_v8 = vld [vmem:[#allocation121_spill] sm:$0xff]  ;;  %v5820_v42 = vld [vmem:[#allocation122_spill] sm:$0xff]  ;;  %v1263_v23 = vsel %vm399_vm0, %v1261_v5, %v1262_v59 }
  0xe0   : > { %v1282_v14 = vrot.slane %v5818_v16, 1  ;;  %v1284_v48 = vrot.slane %v5819_v8, 1  ;;  %v1286_v44 = vrot.slane %v5820_v42, 1  ;;  %v5821_v31 = vld [vmem:[#allocation123_spill] sm:$0xff]  ;;  %v5822_v4 = vld [vmem:[#allocation124_spill] sm:$0xff]  ;;  %v1265_v7 = vsel %vm399_vm0, %v1262_v59, %v1264_v17 }
  0xe1   : > { %v1287_v37 = vrot.slane %v5821_v31, 1  ;;  %v1289_v60 = vrot.slane %v5822_v4, 1  ;;  %v1268_v46 = vsel %vm399_vm0, %v1266_v26, %v1267_v15  ;;  %v1270_v8 = vsel %vm399_vm0, %v1267_v15, %v1269_v34 }
  0xe2   : > { %v1273_v1 = vsel %vm399_vm0, %v1271_v27, %v1272_v12  ;;  %v1275_v3 = vsel %vm399_vm0, %v1272_v12, %v1274_v32  ;;  %v1278_v50 = vsel %vm399_vm0, %v1276_v54, %v1277_v18  ;;  %v1280_v4 = vsel %vm399_vm0, %v1277_v18, %v1279_v41 }
  0xe3   : > { %v1283_v61 = vsel %vm399_vm0, %v1281_v45, %v1282_v14  ;;  %v1285_v43 = vsel %vm399_vm0, %v1282_v14, %v1284_v48  ;;  %v1288_v28 = vsel %vm399_vm0, %v1286_v44, %v1287_v37  ;;  %v1290_v5 = vsel %vm399_vm0, %v1287_v37, %v1289_v60 }
  0xe4   : > { %v3812_v59 = vadd.f32 %v1243_v0, %v5784_v25  ;;  %v3815_v17 = vadd.f32 %v1245_v55, %v5785_v57  ;;  %v3818_v26 = vadd.f32 %v1248_v35, %v5787_v20  ;;  %v3821_v15 = vadd.f32 %v1250_v40, %v5788_v63 }
  0xe5   : > { %v3824_v45 = vadd.f32 %v1253_v49, %v5791_v39  ;;  %v3827_v48 = vadd.f32 %v1255_v24, %v5792_v10  ;;  %v3830_v60 = vadd.f32 %v1258_v38, %v5802_v52  ;;  %v3833_v37 = vadd.f32 %v1260_v51, %v5803_v13 }
  0xe6   : > { %v3836_v44 = vadd.f32 %v1263_v23, %v5805_v6  ;;  %v3839_v14 = vadd.f32 %v1265_v7, %v5806_v53  ;;  %v3842_v41 = vadd.f32 %v1268_v46, %v5808_v19  ;;  %v3845_v0 = vadd.f32 %v1270_v8, %v5809_v33 }
  0xe7   : > { %v1331_v24 = vrot.slane %v5784_v25, 2  ;;  %v1332_v38 = vrot.slane %v5785_v57, 2  ;;  %v1334_v55 = vrot.slane %v5786_v9, 2  ;;  %v1336_v51 = vrot.slane %v5787_v20, 2 }
  0xe8   : > { %v1337_v23 = vrot.slane %v5788_v63, 2  ;;  %v1339_v35 = vrot.slane %v5790_v30, 2  ;;  %v3854_v7 = vadd.f32 %v1273_v1, %v5811_v29  ;;  %v1341_v46 = vrot.slane %v5791_v39, 2 }
  0xe9   : > { %v1342_v8 = vrot.slane %v5792_v10, 2  ;;  %v1344_v40 = vrot.slane %v5801_v36, 2  ;;  %v1324_v25 = vadd.f32 %v1275_v3, %v5812_v47  ;;  %v1325_v57 = vadd.f32 %v1278_v50, %v5814_v56 }
  0xea   : > { %v1326_v9 = vadd.f32 %v1280_v4, %v5815_v22  ;;  %v1327_v20 = vadd.f32 %v1283_v61, %v5817_v11  ;;  %v1328_v63 = vadd.f32 %v1285_v43, %v5818_v16  ;;  %v1329_v30 = vadd.f32 %v1288_v28, %v5820_v42 }
  0xeb   : > { %v1330_v49 = vadd.f32 %v1290_v5, %v5821_v31  ;;  %v1333_v39 = vsel %vm490_vm1, %v1331_v24, %v1332_v38  ;;  %v1335_v10 = vsel %vm490_vm1, %v1332_v38, %v1334_v55  ;;  %v1338_v36 = vsel %vm490_vm1, %v1336_v51, %v1337_v23  ;;  %v5823_v5 = vld [vmem:[#allocation118_spill] sm:$0xff]  ;;  %v5824_v24 = vld [vmem:[#allocation121_spill] sm:$0xff]  ;;  %v5825_v38 = vld [vmem:[#allocation124_spill] sm:$0xff] }
  0xec   : > { %v1340_v34 = vsel %vm490_vm1, %v1337_v23, %v1339_v35  ;;  %v1346_v50 = vrot.slane %v5802_v52, 2  ;;  %v1343_v4 = vsel %vm490_vm1, %v1341_v46, %v1342_v8  ;;  %v1345_v27 = vsel %vm490_vm1, %v1342_v8, %v1344_v40 }
  0xed   : > { %v1347_v12 = vrot.slane %v5803_v13, 2  ;;  %v1349_v32 = vrot.slane %v5804_v62, 2  ;;  %v1351_v54 = vrot.slane %v5805_v6, 2  ;;  %v1352_v18 = vrot.slane %v5806_v53, 2 }
  0xee   : > { %v1354_v1 = vrot.slane %v5807_v2, 2  ;;  %v1356_v3 = vrot.slane %v5808_v19, 2  ;;  %v1357_v61 = vrot.slane %v5809_v33, 2  ;;  %v1359_v52 = vrot.slane %v5810_v21, 2 }
  0xef   : > { %v1361_v43 = vrot.slane %v5811_v29, 2  ;;  %v1362_v28 = vrot.slane %v5812_v47, 2  ;;  %v1364_v13 = vrot.slane %v5813_v58, 2  ;;  %v1366_v62 = vrot.slane %v5814_v56, 2 }
  0xf0   : > { %v1367_v6 = vrot.slane %v5815_v22, 2  ;;  %v1369_v53 = vrot.slane %v5823_v5, 2  ;;  %v1348_v2 = vsel %vm490_vm1, %v1346_v50, %v1347_v12  ;;  %v1371_v19 = vrot.slane %v5817_v11, 2  ;;  %v5837_v5 = vld [vmem:[#allocation23_spill] sm:$0xff] }
  0xf1   : > { %v1372_v33 = vrot.slane %v5818_v16, 2  ;;  %v1374_v21 = vrot.slane %v5824_v24, 2  ;;  %v1350_v29 = vsel %vm490_vm1, %v1347_v12, %v1349_v32  ;;  %v1376_v47 = vrot.slane %v5820_v42, 2 }
  0xf2   : > { %v1377_v58 = vrot.slane %v5821_v31, 2  ;;  %v1379_v56 = vrot.slane %v5825_v38, 2  ;;  %v1353_v22 = vsel %vm490_vm1, %v1351_v54, %v1352_v18  ;;  %v1355_v55 = vsel %vm490_vm1, %v1352_v18, %v1354_v1  ;;  %v5842_v38 = vld [vmem:[#allocation36_spill] sm:$0xff] }
  0xf3   : > { %v1358_v51 = vsel %vm490_vm1, %v1356_v3, %v1357_v61  ;;  %v1360_v11 = vsel %vm490_vm1, %v1357_v61, %v1359_v52  ;;  %v1363_v16 = vsel %vm490_vm1, %v1361_v43, %v1362_v28  ;;  %v1365_v23 = vsel %vm490_vm1, %v1362_v28, %v1364_v13  ;;  %v5835_v28 = vld [vmem:[#allocation131_spill] sm:$0xff] }
  0xf4   : > { %v1368_v35 = vsel %vm490_vm1, %v1366_v62, %v1367_v6  ;;  %v1370_v42 = vsel %vm490_vm1, %v1367_v6, %v1369_v53  ;;  %v1373_v31 = vsel %vm490_vm1, %v1371_v19, %v1372_v33  ;;  %v1375_v46 = vsel %vm490_vm1, %v1372_v33, %v1374_v21  ;;  %v5836_v62 = vld [vmem:[#allocation132_spill] sm:$0xff]  ;;  %v5839_v33 = vld [vmem:[#allocation29_spill] sm:$0xff]  ;;  %v5840_v21 = vld [vmem:[#allocation30_spill] sm:$0xff] }
  0xf5   : > { %v3906_v8 = vadd.f32 %v1333_v39, %v3812_v59  ;;  %v3909_v40 = vadd.f32 %v1335_v10, %v3815_v17  ;;  %v1378_v50 = vsel %vm490_vm1, %v1376_v47, %v1377_v58  ;;  %v1380_v12 = vsel %vm490_vm1, %v1377_v58, %v1379_v56  ;;  %v5841_v47 = vld [vmem:[#allocation31_spill] sm:$0xff] }
  0xf6   : > { %v3914_v32 = vadd.f32 %v1338_v36, %v3818_v26  ;;  %v3917_v54 = vadd.f32 %v1340_v34, %v3821_v15  ;;  %v3920_v18 = vadd.f32 %v1343_v4, %v3824_v45  ;;  %v3923_v1 = vadd.f32 %v1345_v27, %v3827_v48  ;;  %v5826_v34 = vld [vmem:[#allocation16_spill] sm:$0xff]  ;;  %v5828_v27 = vld [vmem:[#allocation18_spill] sm:$0xff] }
  0xf7   : > { %v3926_v59 = vadd.f32 %v1348_v2, %v3830_v60  ;;  %v3929_v17 = vadd.f32 %v1350_v29, %v3833_v37  ;;  %v3932_v39 = vadd.f32 %v1353_v22, %v3836_v44  ;;  %v3935_v26 = vadd.f32 %v1355_v55, %v3839_v14  ;;  %v5838_v2 = vld [vmem:[#allocation24_spill] sm:$0xff]  ;;  %v5843_v22 = vld [vmem:[#allocation37_spill] sm:$0xff] }
  0xf8   : > { %v3938_v15 = vadd.f32 %v1358_v51, %v3842_v41  ;;  %v3941_v45 = vadd.f32 %v1360_v11, %v3845_v0  ;;  %v3944_v48 = vadd.f32 %v1363_v16, %v3854_v7  ;;  %v3946_v60 = vadd.f32 %v1365_v23, %v1324_v25  ;;  %v5827_v0 = vld [vmem:[#allocation22_spill] sm:$0xff]  ;;  %v5829_v7 = vld [vmem:[#allocation125_spill] sm:$0xff] }
  0xf9   : > { %v3948_v10 = vadd.f32 %v1368_v35, %v1325_v57  ;;  %v3950_v37 = vadd.f32 %v1370_v42, %v1326_v9  ;;  %v3952_v44 = vadd.f32 %v1373_v31, %v1327_v20  ;;  %v3954_v36 = vadd.f32 %v1375_v46, %v1328_v63  ;;  %v5830_v25 = vld [vmem:[#allocation126_spill] sm:$0xff]  ;;  %v5831_v9 = vld [vmem:[#allocation127_spill] sm:$0xff]  ;;  %v5832_v20 = vld [vmem:[#allocation128_spill] sm:$0xff] }
  0xfa   : > { %v3956_v14 = vadd.f32 %v1378_v50, %v1329_v30  ;;  %v3958_v41 = vadd.f32 %v1380_v12, %v1330_v49  ;;  %v1421_v4 = vadd.f32 %v5827_v0, %v5826_v34  ;;  %v1422_v3 = vadd.f32 %v5829_v7, %v5828_v27  ;;  %v5833_v30 = vld [vmem:[#allocation129_spill] sm:$0xff]  ;;  %v5834_v49 = vld [vmem:[#allocation130_spill] sm:$0xff] }
  0xfb   : > { %v1423_v57 = vadd.f32 %v5830_v25, %v5827_v0  ;;  %v1424_v61 = vadd.f32 %v5831_v9, %v5829_v7  ;;  %v1425_v63 = vadd.f32 %v5832_v20, %v5830_v25  ;;  %v1426_v52 = vadd.f32 %v5833_v30, %v5831_v9  ;;  %v5851_v7 = vld [vmem:[#allocation38_spill] sm:$0xff] }
  0xfc   : > { %v1427_v43 = vadd.f32 %v5834_v49, %v5832_v20  ;;  %v1428_v13 = vadd.f32 %v5835_v28, %v5833_v30  ;;  %v1429_v6 = vadd.f32 %v5836_v62, %v5834_v49  ;;  %v1430_v53 = vadd.f32 %v5837_v5, %v5835_v28 }
  0xfd   : > { %v1431_v19 = vadd.f32 %v5838_v2, %v5836_v62  ;;  %v1432_v24 = vadd.f32 %v5839_v33, %v5837_v5  ;;  %v1433_v29 = vadd.f32 %v5840_v21, %v5838_v2  ;;  %v1434_v58 = vadd.f32 %v5841_v47, %v5839_v33 }
  0xfe   : > { %v1435_v56 = vadd.f32 %v5842_v38, %v5840_v21  ;;  %v1436_v55 = vadd.f32 %v5843_v22, %v5841_v47  ;;  %v3993_v51 = vadd.f32 %v1421_v4, %v5830_v25  ;;  %v3996_v11 = vadd.f32 %v1422_v3, %v5831_v9  ;;  %v5853_v25 = vld [vmem:[#allocation133_spill] sm:$0xff]  ;;  %v5855_v9 = vld [vmem:[#allocation42_spill] sm:$0xff] }
  0xff   : > { %v3999_v16 = vadd.f32 %v1423_v57, %v5832_v20  ;;  %v4002_v23 = vadd.f32 %v1424_v61, %v5833_v30  ;;  %v4005_v35 = vadd.f32 %v1425_v63, %v5834_v49  ;;  %v4008_v42 = vadd.f32 %v1426_v52, %v5835_v28  ;;  %v5856_v61 = vld [vmem:[#allocation44_spill] sm:$0xff]  ;;  %v5857_v63 = vld [vmem:[#allocation43_spill] sm:$0xff]  ;;  %v5859_v49 = vld [vmem:[#allocation49_spill] sm:$0xff] }
 0x100   : > { %v4011_v31 = vadd.f32 %v1427_v43, %v5836_v62  ;;  %v4014_v46 = vadd.f32 %v1428_v13, %v5837_v5  ;;  %v4017_v50 = vadd.f32 %v1429_v6, %v5838_v2  ;;  %v4020_v12 = vadd.f32 %v1430_v53, %v5839_v33  ;;  %v5858_v30 = vld [vmem:[#allocation48_spill] sm:$0xff]  ;;  %v5860_v28 = vld [vmem:[#allocation50_spill] sm:$0xff]  ;;  %v5861_v62 = vld [vmem:[#allocation55_spill] sm:$0xff] }
 0x101   : > { %v4023_v34 = vadd.f32 %v1431_v19, %v5840_v21  ;;  %v4026_v0 = vadd.f32 %v1432_v24, %v5841_v47  ;;  %v4029_v4 = vadd.f32 %v1433_v29, %v5842_v38  ;;  %v4032_v27 = vadd.f32 %v1434_v58, %v5843_v22  ;;  %v5862_v5 = vld [vmem:[#allocation56_spill] sm:$0xff]  ;;  %v5863_v2 = vld [vmem:[#allocation57_spill] sm:$0xff]  ;;  %v5864_v33 = vld [vmem:[#allocation62_spill] sm:$0xff] }
 0x102   : > { %5844 = vst [vmem:[#allocation65_spill] sm:$0xff] %v4014_v46  ;;  %5845 = vst [vmem:[#allocation66_spill] sm:$0xff] %v4017_v50  ;;  %v4035_v3 = vadd.f32 %v1435_v56, %v5851_v7  ;;  %v4038_v57 = vadd.f32 %v1436_v55, %v5853_v25  ;;  %v1453_v20 = vadd.f32 %v5856_v61, %v5855_v9  ;;  %v5865_v21 = vld [vmem:[#allocation63_spill] sm:$0xff]  ;;  %v5866_v47 = vld [vmem:[#allocation64_spill] sm:$0xff] }
 0x103   : > { %5846 = vst [vmem:[#allocation67_spill] sm:$0xff] %v4020_v12  ;;  %5847 = vst [vmem:[#allocation72_spill] sm:$0xff] %v4023_v34  ;;  %v1454_v52 = vadd.f32 %v5858_v30, %v5857_v63  ;;  %v1455_v43 = vadd.f32 %v5859_v49, %v5856_v61  ;;  %v1456_v13 = vadd.f32 %v5860_v28, %v5858_v30  ;;  %v5867_v38 = vld [vmem:[#allocation69_spill] sm:$0xff]  ;;  %v5868_v22 = vld [vmem:[#allocation70_spill] sm:$0xff] }
 0x104   : > { %5848 = vst [vmem:[#allocation73_spill] sm:$0xff] %v4026_v0  ;;  %5849 = vst [vmem:[#allocation74_spill] sm:$0xff] %v4029_v4  ;;  %v1457_v6 = vadd.f32 %v5861_v62, %v5859_v49  ;;  %v1458_v53 = vadd.f32 %v5862_v5, %v5860_v28  ;;  %v1459_v19 = vadd.f32 %v5863_v2, %v5861_v62  ;;  %v5869_v7 = vld [vmem:[#allocation71_spill] sm:$0xff]  ;;  %v5870_v9 = vld [vmem:[#allocation77_spill] sm:$0xff] }
 0x105   : > { %5850 = vst [vmem:[#allocation79_spill] sm:$0xff] %v4032_v27  ;;  %5852 = vst [vmem:[#allocation80_spill] sm:$0xff] %v4035_v3  ;;  %v1460_v24 = vadd.f32 %v5864_v33, %v5862_v5  ;;  %v1461_v29 = vadd.f32 %v5865_v21, %v5863_v2  ;;  %v1462_v58 = vadd.f32 %v5866_v47, %v5864_v33  ;;  %v5871_v63 = vld [vmem:[#allocation78_spill] sm:$0xff] }
 0x106   : > { %5854 = vst [vmem:[#allocation81_spill] sm:$0xff] %v4038_v57  ;;  %v1463_v56 = vadd.f32 %v5867_v38, %v5865_v21  ;;  %v1464_v55 = vadd.f32 %v5868_v22, %v5866_v47  ;;  %v1465_v25 = vadd.f32 %v5869_v7, %v5867_v38  ;;  %v1466_v61 = vadd.f32 %v5870_v9, %v5868_v22  ;;  %v5872_v57 = vld [vmem:[#allocation84_spill] sm:$0xff] }
 0x107   : > { %v1467_v30 = vadd.f32 %v5871_v63, %v5869_v7  ;;  %v1468_v3 = vadd.f32 %v5872_v57, %v5870_v9  ;;  %v4073_v27 = vadd.f32 %v1453_v20, %v5859_v49  ;;  %v4076_v4 = vadd.f32 %v1454_v52, %v5860_v28 }
 0x108   : > { %v4079_v0 = vadd.f32 %v1455_v43, %v5861_v62  ;;  %v4082_v34 = vadd.f32 %v1456_v13, %v5862_v5  ;;  %v4085_v12 = vadd.f32 %v1457_v6, %v5863_v2  ;;  %v4088_v50 = vadd.f32 %v1458_v53, %v5864_v33  ;;  %v5887_v6 = vld [vmem:[#allocation85_spill] sm:$0xff]  ;;  %v5889_v53 = vld [vmem:[#allocation76_spill] sm:$0xff]  ;;  %v5892_v33 = vld [vmem:[#allocation2_spill] sm:$0xff] }
 0x109   : > { %5873 = vst [vmem:[#allocation86_spill] sm:$0xff] %v4073_v27  ;;  %5874 = vst [vmem:[#allocation87_spill] sm:$0xff] %v4076_v4  ;;  %v4091_v46 = vadd.f32 %v1459_v19, %v5865_v21  ;;  %v4094_v20 = vadd.f32 %v1460_v24, %v5866_v47  ;;  %v4097_v52 = vadd.f32 %v1461_v29, %v5867_v38  ;;  %v5891_v19 = vld [vmem:[#allocation83_spill] sm:$0xff]  ;;  %v5893_v21 = vld [vmem:[#allocation90_spill] sm:$0xff] }
 0x10a   : > { %5875 = vst [vmem:[#allocation88_spill] sm:$0xff] %v4079_v0  ;;  %5876 = vst [vmem:[#allocation91_spill] sm:$0xff] %v4082_v34  ;;  %v4100_v49 = vadd.f32 %v1462_v58, %v5868_v22  ;;  %v4103_v43 = vadd.f32 %v1463_v56, %v5869_v7  ;;  %v4106_v28 = vadd.f32 %v1464_v55, %v5870_v9  ;;  %v5894_v29 = vld [vmem:[#allocation3_spill] sm:$0xff]  ;;  %v5895_v58 = vld [vmem:[#allocation4_spill] sm:$0xff] }
 0x10b   : > { %5877 = vst [vmem:[#allocation92_spill] sm:$0xff] %v4085_v12  ;;  %5878 = vst [vmem:[#allocation93_spill] sm:$0xff] %v4088_v50  ;;  %v4109_v13 = vadd.f32 %v1465_v25, %v5871_v63  ;;  %v4112_v62 = vadd.f32 %v1466_v61, %v5872_v57  ;;  %v4115_v5 = vadd.f32 %v1467_v30, %v5887_v6  ;;  %v5896_v56 = vld [vmem:[#allocation5_spill] sm:$0xff]  ;;  %v5897_v57 = vld [vmem:[#allocation6_spill] sm:$0xff] }
 0x10c   : > { %5879 = vst [vmem:[#allocation96_spill] sm:$0xff] %v4091_v46  ;;  %5880 = vst [vmem:[#allocation97_spill] sm:$0xff] %v4094_v20  ;;  %v4118_v2 = vadd.f32 %v1468_v3, %v5889_v53  ;;  %v1485_v24 = vadd.f32 %v5892_v33, %v5891_v19  ;;  %v1486_v47 = vadd.f32 %v5894_v29, %v5893_v21  ;;  %v5898_v7 = vld [vmem:[#allocation7_spill] sm:$0xff]  ;;  %v5899_v3 = vld [vmem:[#allocation8_spill] sm:$0xff] }
 0x10d   : > { %5881 = vst [vmem:[#allocation100_spill] sm:$0xff] %v4097_v52  ;;  %5882 = vst [vmem:[#allocation101_spill] sm:$0xff] %v4100_v49  ;;  %v1487_v38 = vadd.f32 %v5895_v58, %v5892_v33  ;;  %v1488_v22 = vadd.f32 %v5896_v56, %v5894_v29  ;;  %v1489_v55 = vadd.f32 %v5897_v57, %v5895_v58  ;;  %v5900_v61 = vld [vmem:[#allocation9_spill] sm:$0xff]  ;;  %v5901_v30 = vld [vmem:[#allocation10_spill] sm:$0xff] }
 0x10e   : > { %5883 = vst [vmem:[#allocation95_spill] sm:$0xff] %v4103_v43  ;;  %5884 = vst [vmem:[#allocation99_spill] sm:$0xff] %v4106_v28  ;;  %v1490_v25 = vadd.f32 %v5898_v7, %v5896_v56  ;;  %v1491_v9 = vadd.f32 %v5899_v3, %v5897_v57  ;;  %v1492_v63 = vadd.f32 %v5900_v61, %v5898_v7  ;;  %v5902_v53 = vld [vmem:[#allocation11_spill] sm:$0xff]  ;;  %v5903_v33 = vld [vmem:[#allocation12_spill] sm:$0xff] }
 0x10f   : > { %5885 = vst [vmem:[#allocation103_spill] sm:$0xff] %v4109_v13  ;;  %5886 = vst [vmem:[#allocation54_spill] sm:$0xff] %v4112_v62  ;;  %v1493_v6 = vadd.f32 %v5901_v30, %v5899_v3  ;;  %v1494_v19 = vadd.f32 %v5902_v53, %v5900_v61  ;;  %v1495_v21 = vadd.f32 %v5903_v33, %v5901_v30  ;;  %v5904_v29 = vld [vmem:[#allocation13_spill] sm:$0xff]  ;;  %v5906_v13 = vld [vmem:[#allocation15_spill] sm:$0xff] }
 0x110   : > { %5888 = vst [vmem:[#allocation61_spill] sm:$0xff] %v4115_v5  ;;  %5890 = vst [vmem:[#allocation68_spill] sm:$0xff] %v4118_v2  ;;  %v1496_v2 = vadd.f32 %v5904_v29, %v5902_v53  ;;  %v5905_v5 = vld [vmem:[#allocation14_spill] sm:$0xff]  ;;  %v1498_v28 = vadd.f32 %v5906_v13, %v5904_v29  ;;  %v5907_v43 = vld [vmem:[#allocation17_spill] sm:$0xff]  ;;  %v4153_v46 = vadd.f32 %v1485_v24, %v5895_v58 }
 0x111   : > { %v1497_v62 = vadd.f32 %v5905_v5, %v5903_v33  ;;  %v1499_v49 = vadd.f32 %v5907_v43, %v5905_v5  ;;  %v5908_v52 = vld [vmem:[#allocation19_spill] sm:$0xff]  ;;  %v4156_v50 = vadd.f32 %v1486_v47, %v5896_v56  ;;  %v4159_v12 = vadd.f32 %v1487_v38, %v5897_v57 }
 0x112   : > { %v1500_v20 = vadd.f32 %v5908_v52, %v5906_v13  ;;  %5909 = vst [vmem:[#allocation75_spill] sm:$0xff] %v4153_v46  ;;  %v4162_v34 = vadd.f32 %v1488_v22, %v5898_v7  ;;  %v4165_v0 = vadd.f32 %v1489_v55, %v5899_v3  ;;  %v4168_v4 = vadd.f32 %v1490_v25, %v5900_v61  ;;  %v5923_v55 = vld [vmem:[#allocation20_spill] sm:$0xff]  ;;  %v5925_v25 = vld [vmem:[#allocation21_spill] sm:$0xff]  ;;  %v5928_v61 = vld [vmem:[#allocation27_spill] sm:$0xff] }
 0x113   : > { %5910 = vst [vmem:[#allocation82_spill] sm:$0xff] %v4156_v50  ;;  %5911 = vst [vmem:[#allocation89_spill] sm:$0xff] %v4159_v12  ;;  %v4171_v27 = vadd.f32 %v1491_v9, %v5901_v30  ;;  %v4174_v24 = vadd.f32 %v1492_v63, %v5902_v53  ;;  %v4177_v47 = vadd.f32 %v1493_v6, %v5903_v33  ;;  %v5927_v9 = vld [vmem:[#allocation25_spill] sm:$0xff]  ;;  %v5930_v30 = vld [vmem:[#allocation28_spill] sm:$0xff] }
 0x114   : > { %5912 = vst [vmem:[#allocation94_spill] sm:$0xff] %v4162_v34  ;;  %5913 = vst [vmem:[#allocation98_spill] sm:$0xff] %v4165_v0  ;;  %v4180_v58 = vadd.f32 %v1494_v19, %v5904_v29  ;;  %v4183_v38 = vadd.f32 %v1495_v21, %v5905_v5  ;;  %v4186_v56 = vadd.f32 %v1496_v2, %v5906_v13  ;;  %v5929_v5 = vld [vmem:[#allocation26_spill] sm:$0xff]  ;;  %v5931_v13 = vld [vmem:[#allocation32_spill] sm:$0xff] }
 0x115   : > { %5914 = vst [vmem:[#allocation102_spill] sm:$0xff] %v4168_v4  ;;  %5915 = vst [vmem:[#allocation104_spill] sm:$0xff] %v4171_v27  ;;  %v4189_v22 = vadd.f32 %v1497_v62, %v5907_v43  ;;  %v4192_v57 = vadd.f32 %v1498_v28, %v5908_v52  ;;  %v4195_v7 = vadd.f32 %v1499_v49, %v5923_v55  ;;  %v5932_v43 = vld [vmem:[#allocation34_spill] sm:$0xff]  ;;  %v5933_v52 = vld [vmem:[#allocation35_spill] sm:$0xff] }
 0x116   : > { %5916 = vst [vmem:[#allocation105_spill] sm:$0xff] %v4174_v24  ;;  %5917 = vst [vmem:[#allocation106_spill] sm:$0xff] %v4177_v47  ;;  %v4198_v3 = vadd.f32 %v1500_v20, %v5925_v25  ;;  %v1517_v63 = vadd.f32 %v5928_v61, %v5927_v9  ;;  %v1518_v6 = vadd.f32 %v5930_v30, %v5929_v5  ;;  %v5934_v49 = vld [vmem:[#allocation40_spill] sm:$0xff]  ;;  %v5935_v20 = vld [vmem:[#allocation41_spill] sm:$0xff] }
 0x117   : > { %5918 = vst [vmem:[#allocation107_spill] sm:$0xff] %v4180_v58  ;;  %5919 = vst [vmem:[#allocation108_spill] sm:$0xff] %v4183_v38  ;;  %v1519_v2 = vadd.f32 %v5931_v13, %v5928_v61  ;;  %v1520_v62 = vadd.f32 %v5932_v43, %v5930_v30  ;;  %v1521_v28 = vadd.f32 %v5933_v52, %v5931_v13  ;;  %v5936_v33 = vld [vmem:[#allocation33_spill] sm:$0xff]  ;;  %v5937_v29 = vld [vmem:[#allocation39_spill] sm:$0xff] }
 0x118   : > { %5920 = vst [vmem:[#allocation109_spill] sm:$0xff] %v4186_v56  ;;  %5921 = vst [vmem:[#allocation110_spill] sm:$0xff] %v4189_v22  ;;  %v1522_v53 = vadd.f32 %v5934_v49, %v5932_v43  ;;  %v1523_v19 = vadd.f32 %v5935_v20, %v5933_v52  ;;  %v1524_v21 = vadd.f32 %v5936_v33, %v5934_v49  ;;  %v5938_v25 = vld [vmem:[#allocation45_spill] sm:$0xff]  ;;  %v5939_v61 = vld [vmem:[#allocation46_spill] sm:$0xff] }
 0x119   : > { %5922 = vst [vmem:[#allocation111_spill] sm:$0xff] %v4192_v57  ;;  %5924 = vst [vmem:[#allocation112_spill] sm:$0xff] %v4195_v7  ;;  %v1525_v55 = vadd.f32 %v5937_v29, %v5935_v20  ;;  %v1526_v9 = vadd.f32 %v5938_v25, %v5936_v33  ;;  %v1527_v5 = vadd.f32 %v5939_v61, %v5937_v29  ;;  %v5940_v30 = vld [vmem:[#allocation47_spill] sm:$0xff]  ;;  %v5942_v22 = vld [vmem:[#allocation52_spill] sm:$0xff] }
 0x11a   : > { %5926 = vst [vmem:[#allocation113_spill] sm:$0xff] %v4198_v3  ;;  %v1528_v3 = vadd.f32 %v5940_v30, %v5938_v25  ;;  %v5941_v7 = vld [vmem:[#allocation51_spill] sm:$0xff]  ;;  %v1530_v56 = vadd.f32 %v5942_v22, %v5940_v30  ;;  %v5943_v38 = vld [vmem:[#allocation53_spill] sm:$0xff]  ;;  %v5944_v47 = vld [vmem:[#allocation58_spill] sm:$0xff]  ;;  %v4233_v27 = vadd.f32 %v1517_v63, %v5931_v13  ;;  %v4236_v4 = vadd.f32 %v1518_v6, %v5932_v43 }
 0x11b   : > { %v1529_v57 = vadd.f32 %v5941_v7, %v5939_v61  ;;  %v1531_v58 = vadd.f32 %v5943_v38, %v5941_v7  ;;  %v1532_v24 = vadd.f32 %v5944_v47, %v5942_v22  ;;  %v4239_v0 = vadd.f32 %v1519_v2, %v5933_v52 }
 0x11c   : > { %v4242_v34 = vadd.f32 %v1520_v62, %v5934_v49  ;;  %v4245_v12 = vadd.f32 %v1521_v28, %v5935_v20  ;;  %v4248_v50 = vadd.f32 %v1522_v53, %v5936_v33  ;;  %v4251_v46 = vadd.f32 %v1523_v19, %v5937_v29  ;;  %v5955_v28 = vld [vmem:[#allocation59_spill] sm:$0xff]  ;;  %v5957_v53 = vld [vmem:[#allocation60_spill] sm:$0xff] }
 0x11d   : > { %v4254_v63 = vadd.f32 %v1524_v21, %v5938_v25  ;;  %v4257_v6 = vadd.f32 %v1525_v55, %v5939_v61  ;;  %v4260_v13 = vadd.f32 %v1526_v9, %v5940_v30  ;;  %v4263_v2 = vadd.f32 %v1527_v5, %v5941_v7 }
 0x11e   : > { %5945 = vst [vmem:[#allocation114_spill] sm:$0xff] %v4245_v12  ;;  %5946 = vst [vmem:[#allocation115_spill] sm:$0xff] %v4248_v50  ;;  %v4266_v43 = vadd.f32 %v1528_v3, %v5942_v22  ;;  %v4269_v62 = vadd.f32 %v1529_v57, %v5943_v38  ;;  %v4272_v52 = vadd.f32 %v1530_v56, %v5944_v47 }
 0x11f   : > { %5947 = vst [vmem:[#allocation116_spill] sm:$0xff] %v4251_v46  ;;  %5948 = vst [vmem:[#allocation117_spill] sm:$0xff] %v4254_v63  ;;  %v4275_v49 = vadd.f32 %v1531_v58, %v5955_v28  ;;  %v4278_v20 = vadd.f32 %v1532_v24, %v5957_v53  ;;  %v1549_v19 = vadd.f32 %v3914_v32, %v3906_v8 }
 0x120   : > { %5949 = vst [vmem:[#allocation119_spill] sm:$0xff] %v4257_v6  ;;  %5950 = vst [vmem:[#allocation120_spill] sm:$0xff] %v4260_v13  ;;  %v1550_v7 = vadd.f32 %v3917_v54, %v3909_v40  ;;  %v1551_v22 = vadd.f32 %v3920_v18, %v3914_v32  ;;  %v1552_v38 = vadd.f32 %v3923_v1, %v3917_v54 }
 0x121   : > { %5951 = vst [vmem:[#allocation122_spill] sm:$0xff] %v4263_v2  ;;  %5952 = vst [vmem:[#allocation123_spill] sm:$0xff] %v4266_v43  ;;  %v1553_v47 = vadd.f32 %v3926_v59, %v3920_v18  ;;  %v1554_v58 = vadd.f32 %v3929_v17, %v3923_v1  ;;  %v1555_v24 = vadd.f32 %v3932_v39, %v3926_v59 }
 0x122   : > { %5953 = vst [vmem:[#allocation118_spill] sm:$0xff] %v4269_v62  ;;  %5954 = vst [vmem:[#allocation121_spill] sm:$0xff] %v4272_v52  ;;  %v1556_v8 = vadd.f32 %v3935_v26, %v3929_v17  ;;  %v1557_v40 = vadd.f32 %v3938_v15, %v3932_v39  ;;  %v1558_v32 = vadd.f32 %v3941_v45, %v3935_v26 }
 0x123   : > { %5956 = vst [vmem:[#allocation124_spill] sm:$0xff] %v4275_v49  ;;  %5958 = vst [vmem:[#allocation16_spill] sm:$0xff] %v4278_v20  ;;  %v1559_v54 = vadd.f32 %v3944_v48, %v3938_v15  ;;  %v1560_v56 = vadd.f32 %v3946_v60, %v3941_v45  ;;  %v1561_v57 = vadd.f32 %v3948_v10, %v3944_v48 }
 0x124   : > { %v1562_v3 = vadd.f32 %v3950_v37, %v3946_v60  ;;  %v1563_v33 = vadd.f32 %v3952_v44, %v3948_v10  ;;  %v1564_v21 = vadd.f32 %v3954_v36, %v3950_v37  ;;  %v4313_v29 = vadd.f32 %v1549_v19, %v3920_v18 }
 0x125   : > { %v4316_v55 = vadd.f32 %v1550_v7, %v3923_v1  ;;  %v4319_v25 = vadd.f32 %v1551_v22, %v3926_v59  ;;  %v4322_v9 = vadd.f32 %v1552_v38, %v3929_v17  ;;  %v4325_v61 = vadd.f32 %v1553_v47, %v3932_v39  ;;  %v5981_v47 = vld [vmem:[#allocation79_spill] sm:$0xff] }
 0x126   : > { %5959 = vst [vmem:[#allocation22_spill] sm:$0xff] %v4313_v29  ;;  %v4328_v5 = vadd.f32 %v1554_v58, %v3935_v26  ;;  %v4331_v30 = vadd.f32 %v1555_v24, %v3938_v15  ;;  %v4334_v18 = vadd.f32 %v1556_v8, %v3941_v45  ;;  %v4337_v1 = vadd.f32 %v1557_v40, %v3944_v48  ;;  %v5982_v8 = vld [vmem:[#allocation80_spill] sm:$0xff] }
 0x127   : > { %5960 = vst [vmem:[#allocation18_spill] sm:$0xff] %v4316_v55  ;;  %5961 = vst [vmem:[#allocation125_spill] sm:$0xff] %v4319_v25  ;;  %v4340_v59 = vadd.f32 %v1558_v32, %v3946_v60  ;;  %v4343_v17 = vadd.f32 %v1559_v54, %v3948_v10  ;;  %v4346_v39 = vmul.f32 0.11111111, %v3993_v51  ;;  %v4349_v26 = vadd.f32 %v1560_v56, %v3950_v37  ;;  %v5983_v32 = vld [vmem:[#allocation81_spill] sm:$0xff]  ;;  %v5984_v56 = vld [vmem:[#allocation86_spill] sm:$0xff] }
 0x128   : > { %5962 = vst [vmem:[#allocation126_spill] sm:$0xff] %v4322_v9  ;;  %5963 = vst [vmem:[#allocation127_spill] sm:$0xff] %v4325_v61  ;;  %v4352_v15 = vadd.f32 %v1561_v57, %v3952_v44  ;;  %v4355_v45 = vadd.f32 %v1562_v3, %v3954_v36  ;;  %v4358_v48 = vmul.f32 0.11111111, %v3996_v11  ;;  %v4361_v60 = vadd.f32 %v1563_v33, %v3956_v14  ;;  %v5975_v14 = vld [vmem:[#allocation65_spill] sm:$0xff]  ;;  %v5986_v33 = vld [vmem:[#allocation87_spill] sm:$0xff] }
 0x129   : > { %5964 = vst [vmem:[#allocation128_spill] sm:$0xff] %v4328_v5  ;;  %5965 = vst [vmem:[#allocation129_spill] sm:$0xff] %v4331_v30  ;;  %v4364_v10 = vmul.f32 0.11111111, %v3999_v16  ;;  %v4367_v51 = vmul.f32 0.11111111, %v4002_v23  ;;  %v4373_v44 = vadd.f32 %v1564_v21, %v3958_v41  ;;  %v4395_v41 = vmul.f32 %v4346_v39, %v4346_v39 }
 0x12a   : > { %5966 = vst [vmem:[#allocation130_spill] sm:$0xff] %v4334_v18  ;;  %5967 = vst [vmem:[#allocation131_spill] sm:$0xff] %v4337_v1  ;;  %v4370_v37 = vmul.f32 0.11111111, %v4005_v35  ;;  %v4376_v36 = vmul.f32 0.11111111, %v4008_v42  ;;  %v4408_v24 = vmul.f32 %v4358_v48, %v4358_v48 }
 0x12b   : > { %5968 = vst [vmem:[#allocation132_spill] sm:$0xff] %v4340_v59  ;;  %5969 = vst [vmem:[#allocation23_spill] sm:$0xff] %v4343_v17  ;;  %v4379_v11 = vmul.f32 0.11111111, %v4011_v31  ;;  %v4382_v28 = vmul.f32 0.11111111, %v5975_v14  ;;  %v4419_v3 = vmul.f32 %v4364_v10, %v4364_v10 }
 0x12c   : > { %5970 = vst [vmem:[#allocation24_spill] sm:$0xff] %v4349_v26  ;;  %5971 = vst [vmem:[#allocation29_spill] sm:$0xff] %v4352_v15  ;;  %v5976_v16 = vld [vmem:[#allocation66_spill] sm:$0xff]  ;;  %v5977_v23 = vld [vmem:[#allocation67_spill] sm:$0xff]  ;;  %v4404_v58 = vmul.f32 0.11111111, %v5981_v47  ;;  %v4440_v17 = vmul.f32 %v4376_v36, %v4376_v36 }
 0x12d   : > { %5972 = vst [vmem:[#allocation30_spill] sm:$0xff] %v4355_v45  ;;  %5973 = vst [vmem:[#allocation31_spill] sm:$0xff] %v4361_v60  ;;  %v4385_v53 = vmul.f32 0.11111111, %v5976_v16  ;;  %v4388_v19 = vmul.f32 0.11111111, %v5977_v23  ;;  %v4433_v60 = vmul.f32 %v4370_v37, %v4370_v37  ;;  %v4447_v30 = vmul.f32 %v4379_v11, %v4379_v11 }
 0x12e   : > { %5974 = vst [vmem:[#allocation36_spill] sm:$0xff] %v4373_v44  ;;  %v5978_v35 = vld [vmem:[#allocation72_spill] sm:$0xff]  ;;  %v5979_v42 = vld [vmem:[#allocation73_spill] sm:$0xff]  ;;  %v5980_v31 = vld [vmem:[#allocation74_spill] sm:$0xff]  ;;  %v4411_v40 = vmul.f32 0.11111111, %v5982_v8  ;;  %v4454_v25 = vmul.f32 %v4382_v28, %v4382_v28 }
 0x12f   : > { %v4391_v7 = vmul.f32 0.11111111, %v5978_v35  ;;  %v4398_v22 = vmul.f32 0.11111111, %v5979_v42  ;;  %v4401_v38 = vmul.f32 0.11111111, %v5980_v31  ;;  %v4426_v42 = vmul.f32 %v4367_v51, %v4367_v51 }
 0x130   : > { %v4414_v54 = vmul.f32 0.11111111, %v5983_v32  ;;  %v1597_v57 = vmul.f32 0.11111111, %v5984_v56  ;;  %5985 = vst [vmem:[#allocation37_spill] sm:$0xff] %v4419_v3  ;;  %v5987_v14 = vld [vmem:[#allocation88_spill] sm:$0xff]  ;;  %v4482_v55 = vmul.f32 %v4411_v40, %v4411_v40 }
 0x131   : > { %v1598_v21 = vmul.f32 0.11111111, %v5986_v33  ;;  %v1599_v16 = vmul.f32 0.11111111, %v5987_v14  ;;  %v5988_v23 = vld [vmem:[#allocation91_spill] sm:$0xff]  ;;  %5989 = vst [vmem:[#allocation38_spill] sm:$0xff] %v4426_v42 }
 0x132   : > { %v1600_v35 = vmul.f32 0.11111111, %v5988_v23  ;;  %v5990_v31 = vld [vmem:[#allocation92_spill] sm:$0xff]  ;;  %v5991_v8 = vld [vmem:[#allocation93_spill] sm:$0xff]  ;;  %v5996_v59 = vld [vmem:[#allocation95_spill] sm:$0xff]  ;;  %6005 = vst [vmem:[#allocation43_spill] sm:$0xff] %v4482_v55  ;;  %v4486_v29 = vmul.f32 %v4414_v54, %v4414_v54  ;;  %v4488_v20 = vmul.f32 %v1597_v57, %v1597_v57 }
 0x133   : > { %v1601_v47 = vmul.f32 0.11111111, %v5990_v31  ;;  %v1602_v32 = vmul.f32 0.11111111, %v5991_v8  ;;  %v5992_v44 = vld [vmem:[#allocation96_spill] sm:$0xff]  ;;  %v5993_v45 = vld [vmem:[#allocation97_spill] sm:$0xff]  ;;  %v4490_v49 = vmul.f32 %v1598_v21, %v1598_v21  ;;  %v4492_v52 = vmul.f32 %v1599_v16, %v1599_v16 }
 0x134   : > { %v1603_v56 = vmul.f32 0.11111111, %v5992_v44  ;;  %v1604_v33 = vmul.f32 0.11111111, %v5993_v45  ;;  %v5994_v15 = vld [vmem:[#allocation100_spill] sm:$0xff]  ;;  %v5995_v26 = vld [vmem:[#allocation101_spill] sm:$0xff]  ;;  %v4494_v62 = vmul.f32 %v1600_v35, %v1600_v35 }
 0x135   : > { %v1605_v14 = vmul.f32 0.11111111, %v5994_v15  ;;  %v1606_v23 = vmul.f32 0.11111111, %v5995_v26  ;;  %v1607_v31 = vmul.f32 0.11111111, %v5996_v59  ;;  %v4458_v59 = vmul.f32 %v4385_v53, %v4385_v53 }
 0x136   : > { %v5997_v1 = vld [vmem:[#allocation99_spill] sm:$0xff]  ;;  %v5999_v5 = vld [vmem:[#allocation54_spill] sm:$0xff]  ;;  %v6000_v61 = vld [vmem:[#allocation61_spill] sm:$0xff]  ;;  %6006 = vst [vmem:[#allocation48_spill] sm:$0xff] %v4486_v29  ;;  %v4496_v43 = vmul.f32 %v1601_v47, %v1601_v47  ;;  %v4498_v2 = vmul.f32 %v1602_v32, %v1602_v32  ;;  %v4500_v13 = vmul.f32 %v1603_v56, %v1603_v56  ;;  %v4502_v6 = vmul.f32 %v1604_v33, %v1604_v33 }
 0x137   : > { %v1608_v8 = vmul.f32 0.11111111, %v5997_v1  ;;  %v5998_v18 = vld [vmem:[#allocation103_spill] sm:$0xff]  ;;  %v1610_v45 = vmul.f32 0.11111111, %v5999_v5  ;;  %v6001_v9 = vld [vmem:[#allocation68_spill] sm:$0xff]  ;;  %v4466_v1 = vmul.f32 %v4391_v7, %v4391_v7  ;;  %v4478_v5 = vmul.f32 %v4404_v58, %v4404_v58 }
 0x138   : > { %v1609_v44 = vmul.f32 0.11111111, %v5998_v18  ;;  %v1611_v15 = vmul.f32 0.11111111, %v6000_v61  ;;  %v1612_v26 = vmul.f32 0.11111111, %v6001_v9  ;;  %v4462_v18 = vmul.f32 %v4388_v19, %v4388_v19 }
 0x139   : > { %v4470_v61 = vmul.f32 %v4398_v22, %v4398_v22  ;;  %v4474_v9 = vmul.f32 %v4401_v38, %v4401_v38  ;;  %6004 = vst [vmem:[#allocation44_spill] sm:$0xff] %v4478_v5  ;;  %6007 = vst [vmem:[#allocation49_spill] sm:$0xff] %v4490_v49  ;;  %v4504_v63 = vmul.f32 %v1605_v14, %v1605_v14 }
 0x13a   : > { %6008 = vst [vmem:[#allocation50_spill] sm:$0xff] %v4492_v52  ;;  %6009 = vst [vmem:[#allocation55_spill] sm:$0xff] %v4494_v62  ;;  %v4506_v46 = vmul.f32 %v1606_v23, %v1606_v23  ;;  %v4508_v50 = vmul.f32 %v1607_v31, %v1607_v31  ;;  %v4510_v12 = vmul.f32 %v1608_v8, %v1608_v8 }
 0x13b   : > { %6002 = vst [vmem:[#allocation133_spill] sm:$0xff] %v4470_v61  ;;  %6003 = vst [vmem:[#allocation42_spill] sm:$0xff] %v4474_v9  ;;  %v4512_v49 = vmul.f32 %v1609_v44, %v1609_v44  ;;  %v4514_v52 = vmul.f32 %v1610_v45, %v1610_v45  ;;  %v4516_v62 = vmul.f32 %v1611_v15, %v1611_v15 }
 0x13c   : > { %6010 = vst [vmem:[#allocation56_spill] sm:$0xff] %v4496_v43  ;;  %6011 = vst [vmem:[#allocation57_spill] sm:$0xff] %v4500_v13  ;;  %v4518_v43 = vmul.f32 %v1612_v26, %v1612_v26  ;;  %v4521_v13 = vmul.f32 %v1597_v57, %v4346_v39  ;;  %v4542_v39 = vmul.f32 %v1604_v33, %v4382_v28  ;;  %v6020_v28 = vld [vmem:[#allocation75_spill] sm:$0xff]  ;;  %v6030_v33 = vld [vmem:[#allocation104_spill] sm:$0xff] }
 0x13d   : > { %6012 = vst [vmem:[#allocation62_spill] sm:$0xff] %v4502_v6  ;;  %6013 = vst [vmem:[#allocation63_spill] sm:$0xff] %v4506_v46  ;;  %v4524_v6 = vmul.f32 %v1598_v21, %v4358_v48  ;;  %v4527_v46 = vmul.f32 %v1599_v16, %v4364_v10  ;;  %v4545_v48 = vmul.f32 %v1605_v14, %v4385_v53  ;;  %v4563_v57 = vmul.f32 0.11111111, %v6020_v28  ;;  %v6021_v53 = vld [vmem:[#allocation82_spill] sm:$0xff] }
 0x13e   : > { %6014 = vst [vmem:[#allocation64_spill] sm:$0xff] %v4508_v50  ;;  %6015 = vst [vmem:[#allocation69_spill] sm:$0xff] %v4510_v12  ;;  %v4530_v50 = vmul.f32 %v1600_v35, %v4367_v51  ;;  %v4548_v10 = vmul.f32 %v1606_v23, %v4388_v19  ;;  %v4551_v51 = vmul.f32 %v1607_v31, %v4391_v7  ;;  %v4566_v21 = vmul.f32 0.11111111, %v6021_v53  ;;  %v6022_v7 = vld [vmem:[#allocation89_spill] sm:$0xff]  ;;  %v6034_v31 = vld [vmem:[#allocation106_spill] sm:$0xff] }
 0x13f   : > { %6016 = vst [vmem:[#allocation70_spill] sm:$0xff] %v4512_v49  ;;  %6017 = vst [vmem:[#allocation71_spill] sm:$0xff] %v4514_v52  ;;  %v4533_v49 = vmul.f32 %v1601_v47, %v4370_v37  ;;  %v4536_v52 = vmul.f32 %v1602_v32, %v4376_v36  ;;  %v4554_v37 = vmul.f32 %v1608_v8, %v4398_v22  ;;  %v4572_v16 = vmul.f32 0.11111111, %v6022_v7  ;;  %v6024_v22 = vld [vmem:[#allocation94_spill] sm:$0xff] }
 0x140   : > { %6018 = vst [vmem:[#allocation77_spill] sm:$0xff] %v4516_v62  ;;  %6019 = vst [vmem:[#allocation78_spill] sm:$0xff] %v4518_v43  ;;  %v4539_v43 = vmul.f32 %v1603_v56, %v4379_v11  ;;  %v4557_v36 = vmul.f32 %v1609_v44, %v4401_v38  ;;  %v4560_v11 = vmul.f32 %v1610_v45, %v4404_v58  ;;  %v4575_v35 = vmul.f32 0.11111111, %v6024_v22  ;;  %v6026_v38 = vld [vmem:[#allocation98_spill] sm:$0xff]  ;;  %v6036_v44 = vld [vmem:[#allocation107_spill] sm:$0xff] }
 0x141   : > { %v4569_v19 = vmul.f32 %v1611_v15, %v4411_v40  ;;  %6023 = vst [vmem:[#allocation84_spill] sm:$0xff] %v4572_v16  ;;  %v4578_v47 = vmul.f32 0.11111111, %v6026_v38  ;;  %v4581_v58 = vmul.f32 %v1612_v26, %v4414_v54  ;;  %v6028_v32 = vld [vmem:[#allocation102_spill] sm:$0xff]  ;;  %v4587_v14 = vmul.f32 0.11111111, %v6030_v33 }
 0x142   : > { %6025 = vst [vmem:[#allocation85_spill] sm:$0xff] %v4575_v35  ;;  %v4584_v56 = vmul.f32 0.11111111, %v6028_v32  ;;  %v6032_v40 = vld [vmem:[#allocation105_spill] sm:$0xff]  ;;  %v4593_v8 = vmul.f32 0.11111111, %v6034_v31  ;;  %v4603_v54 = vadd.f32 %v4488_v20, %v4395_v41 }
 0x143   : > { %6027 = vst [vmem:[#allocation76_spill] sm:$0xff] %v4578_v47  ;;  %6031 = vst [vmem:[#allocation2_spill] sm:$0xff] %v4587_v14  ;;  %v4590_v23 = vmul.f32 0.11111111, %v6032_v40  ;;  %v4596_v45 = vmul.f32 0.11111111, %v6036_v44 }
 0x144   : > { %6029 = vst [vmem:[#allocation83_spill] sm:$0xff] %v4584_v56  ;;  %6035 = vst [vmem:[#allocation3_spill] sm:$0xff] %v4593_v8  ;;  %v6038_v15 = vld [vmem:[#allocation108_spill] sm:$0xff]  ;;  %v6041_v26 = vld [vmem:[#allocation109_spill] sm:$0xff]  ;;  %v1764_v61 = vmul.f32 2.0, %v4542_v39 }
 0x145   : > { %6033 = vst [vmem:[#allocation90_spill] sm:$0xff] %v4590_v23  ;;  %6037 = vst [vmem:[#allocation4_spill] sm:$0xff] %v4596_v45  ;;  %v4599_v28 = vmul.f32 0.11111111, %v6038_v15  ;;  %v4606_v53 = vmul.f32 0.11111111, %v6041_v26 }
 0x146   : > { %6040 = vst [vmem:[#allocation6_spill] sm:$0xff] %v4603_v54  ;;  %v6043_v7 = vld [vmem:[#allocation110_spill] sm:$0xff]  ;;  %v6045_v38 = vld [vmem:[#allocation111_spill] sm:$0xff]  ;;  %v6047_v40 = vld [vmem:[#allocation112_spill] sm:$0xff]  ;;  %v4654_v26 = vmul.f32 0.11111111, %v4236_v4 }
 0x147   : > { %6039 = vst [vmem:[#allocation5_spill] sm:$0xff] %v4599_v28  ;;  %6042 = vst [vmem:[#allocation7_spill] sm:$0xff] %v4606_v53  ;;  %v4609_v22 = vmul.f32 0.11111111, %v6043_v7  ;;  %v4612_v32 = vmul.f32 0.11111111, %v6045_v38 }
 0x148   : > { %v4617_v31 = vmul.f32 0.11111111, %v6047_v40  ;;  %v6049_v44 = vld [vmem:[#allocation113_spill] sm:$0xff]  ;;  %v4657_v7 = vmul.f32 0.11111111, %v4239_v0  ;;  %v6057_v53 = vld [vmem:[#allocation116_spill] sm:$0xff] }
 0x149   : > { %6044 = vst [vmem:[#allocation8_spill] sm:$0xff] %v4609_v22  ;;  %6046 = vst [vmem:[#allocation9_spill] sm:$0xff] %v4612_v32  ;;  %v4620_v15 = vmul.f32 0.11111111, %v6049_v44  ;;  %v4649_v44 = vmul.f32 0.11111111, %v4233_v27 }
 0x14a   : > { %6048 = vst [vmem:[#allocation10_spill] sm:$0xff] %v4617_v31  ;;  %6051 = vst [vmem:[#allocation12_spill] sm:$0xff] %v4657_v7  ;;  %v4660_v38 = vmul.f32 0.11111111, %v4242_v34  ;;  %v6053_v22 = vld [vmem:[#allocation114_spill] sm:$0xff]  ;;  %v6055_v27 = vld [vmem:[#allocation115_spill] sm:$0xff] }
 0x14b   : > { %6050 = vst [vmem:[#allocation11_spill] sm:$0xff] %v4620_v15  ;;  %v4665_v40 = vmul.f32 0.11111111, %v6053_v22  ;;  %v4668_v32 = vmul.f32 0.11111111, %v6055_v27  ;;  %v6059_v4 = vld [vmem:[#allocation117_spill] sm:$0xff] }
 0x14c   : > { %6052 = vst [vmem:[#allocation13_spill] sm:$0xff] %v4660_v38  ;;  %v4671_v54 = vmul.f32 0.11111111, %v6057_v53  ;;  %v4674_v31 = vmul.f32 0.11111111, %v6059_v4  ;;  %v6061_v0 = vld [vmem:[#allocation119_spill] sm:$0xff] }
 0x14d   : > { %6054 = vst [vmem:[#allocation14_spill] sm:$0xff] %v4665_v40  ;;  %6056 = vst [vmem:[#allocation15_spill] sm:$0xff] %v4668_v32  ;;  %v4677_v28 = vmul.f32 0.11111111, %v6061_v0  ;;  %v6063_v34 = vld [vmem:[#allocation120_spill] sm:$0xff]  ;;  %v6065_v33 = vld [vmem:[#allocation49_spill] sm:$0xff] }
 0x14e   : > { %6058 = vst [vmem:[#allocation17_spill] sm:$0xff] %v4671_v54  ;;  %6060 = vst [vmem:[#allocation19_spill] sm:$0xff] %v4674_v31  ;;  %v4680_v45 = vmul.f32 0.11111111, %v6063_v34  ;;  %v4684_v15 = vadd.f32 %v6065_v33, %v4408_v24  ;;  %v6067_v22 = vld [vmem:[#allocation122_spill] sm:$0xff]  ;;  %v6069_v27 = vld [vmem:[#allocation123_spill] sm:$0xff] }
 0x14f   : > { %6062 = vst [vmem:[#allocation20_spill] sm:$0xff] %v4677_v28  ;;  %v4687_v8 = vmul.f32 0.11111111, %v6067_v22  ;;  %v4690_v23 = vmul.f32 0.11111111, %v6069_v27  ;;  %v6071_v53 = vld [vmem:[#allocation118_spill] sm:$0xff] }
 0x150   : > { %6064 = vst [vmem:[#allocation21_spill] sm:$0xff] %v4680_v45  ;;  %6066 = vst [vmem:[#allocation25_spill] sm:$0xff] %v4684_v15  ;;  %v4693_v14 = vmul.f32 0.11111111, %v6071_v53  ;;  %v6073_v4 = vld [vmem:[#allocation50_spill] sm:$0xff]  ;;  %v6075_v56 = vld [vmem:[#allocation121_spill] sm:$0xff] }
 0x151   : > { %6068 = vst [vmem:[#allocation27_spill] sm:$0xff] %v4687_v8  ;;  %6070 = vst [vmem:[#allocation26_spill] sm:$0xff] %v4690_v23  ;;  %v4697_v0 = vadd.f32 %v6073_v4, %v4419_v3  ;;  %v4700_v34 = vmul.f32 0.11111111, %v6075_v56  ;;  %v6077_v47 = vld [vmem:[#allocation124_spill] sm:$0xff]  ;;  %v6081_v55 = vld [vmem:[#allocation55_spill] sm:$0xff] }
 0x152   : > { %6072 = vst [vmem:[#allocation28_spill] sm:$0xff] %v4693_v14  ;;  %v4703_v35 = vmul.f32 0.11111111, %v6077_v47  ;;  %v6079_v15 = vld [vmem:[#allocation16_spill] sm:$0xff]  ;;  %v6083_v3 = vld [vmem:[#allocation57_spill] sm:$0xff]  ;;  %v6084_v16 = vld [vmem:[#allocation62_spill] sm:$0xff] }
 0x153   : > { %6074 = vst [vmem:[#allocation32_spill] sm:$0xff] %v4697_v0  ;;  %6076 = vst [vmem:[#allocation34_spill] sm:$0xff] %v4700_v34  ;;  %v4710_v29 = vmul.f32 0.11111111, %v6079_v15  ;;  %v6082_v56 = vld [vmem:[#allocation56_spill] sm:$0xff]  ;;  %v6085_v9 = vld [vmem:[#allocation63_spill] sm:$0xff]  ;;  %v4778_v34 = vadd.f32 %v6081_v55, %v4426_v42 }
 0x154   : > { %6078 = vst [vmem:[#allocation35_spill] sm:$0xff] %v4703_v35  ;;  %v6086_v4 = vld [vmem:[#allocation64_spill] sm:$0xff]  ;;  %v6089_v54 = vld [vmem:[#allocation22_spill] sm:$0xff]  ;;  %v6091_v28 = vld [vmem:[#allocation125_spill] sm:$0xff]  ;;  %v1758_v55 = vmul.f32 2.0, %v4524_v6  ;;  %v1761_v42 = vmul.f32 2.0, %v4533_v49 }
 0x155   : > { %6080 = vst [vmem:[#allocation40_spill] sm:$0xff] %v4710_v29  ;;  %v4737_v27 = vmul.f32 0.11111111, %v6089_v54  ;;  %v6090_v31 = vld [vmem:[#allocation18_spill] sm:$0xff]  ;;  %v4743_v53 = vmul.f32 0.11111111, %v6091_v28 }
 0x156   : > { %v4740_v15 = vmul.f32 0.11111111, %v6090_v31  ;;  %v6092_v8 = vld [vmem:[#allocation126_spill] sm:$0xff]  ;;  %v6093_v23 = vld [vmem:[#allocation127_spill] sm:$0xff]  ;;  %v6094_v14 = vld [vmem:[#allocation128_spill] sm:$0xff]  ;;  %6102 = vst [vmem:[#allocation41_spill] sm:$0xff] %v4778_v34 }
 0x157   : > { %v4748_v5 = vmul.f32 0.11111111, %v6092_v8  ;;  %v4751_v47 = vmul.f32 0.11111111, %v6093_v23  ;;  %v4754_v22 = vmul.f32 0.11111111, %v6094_v14  ;;  %v1743_v34 = vsub.f32 %v4743_v53, %v4527_v46 }
 0x158   : > { %v6096_v31 = vld [vmem:[#allocation129_spill] sm:$0xff]  ;;  %v6097_v28 = vld [vmem:[#allocation130_spill] sm:$0xff]  ;;  %v6098_v32 = vld [vmem:[#allocation131_spill] sm:$0xff] }
 0x159   : > { %v4759_v45 = vmul.f32 0.11111111, %v6096_v31  ;;  %v4762_v38 = vmul.f32 0.11111111, %v6097_v28  ;;  %v4765_v0 = vmul.f32 0.11111111, %v6098_v32 }
 0x15a   : > { %v6099_v8 = vld [vmem:[#allocation132_spill] sm:$0xff]  ;;  %v6100_v23 = vld [vmem:[#allocation23_spill] sm:$0xff]  ;;  %v6103_v31 = vld [vmem:[#allocation29_spill] sm:$0xff] }
 0x15b   : > { %v4768_v35 = vmul.f32 0.11111111, %v6099_v8  ;;  %v4771_v62 = vmul.f32 0.11111111, %v6100_v23  ;;  %v6101_v14 = vld [vmem:[#allocation24_spill] sm:$0xff]  ;;  %v6104_v28 = vld [vmem:[#allocation30_spill] sm:$0xff]  ;;  %v1741_v8 = vsub.f32 %v4737_v27, %v4521_v13  ;;  %v1747_v27 = vsub.f32 %v4759_v45, %v4539_v43 }
 0x15c   : > { %v4774_v7 = vmul.f32 0.11111111, %v6101_v14  ;;  %v4781_v29 = vmul.f32 0.11111111, %v6103_v31  ;;  %v4784_v54 = vmul.f32 0.11111111, %v6104_v28  ;;  %v1742_v14 = vsub.f32 %v4740_v15, %v4524_v6 }
 0x15d   : > { %v6105_v32 = vld [vmem:[#allocation31_spill] sm:$0xff]  ;;  %v6106_v23 = vld [vmem:[#allocation36_spill] sm:$0xff]  ;;  %v1744_v31 = vsub.f32 %v4748_v5, %v4530_v50  ;;  %v1745_v28 = vsub.f32 %v4751_v47, %v4533_v49  ;;  %v1749_v15 = vsub.f32 %v4765_v0, %v4545_v48  ;;  %v1750_v53 = vsub.f32 %v4768_v35, %v4548_v10 }
 0x15e   : > { %v4787_v40 = vmul.f32 0.11111111, %v6105_v32  ;;  %v4792_v12 = vmul.f32 0.11111111, %v6106_v23  ;;  %v1746_v32 = vsub.f32 %v4754_v22, %v4536_v52  ;;  %v1748_v23 = vsub.f32 %v4762_v38, %v4542_v39 }
 0x15f   : > { %v1751_v5 = vsub.f32 %v4771_v62, %v4551_v51  ;;  %v1752_v47 = vsub.f32 %v4774_v7, %v4554_v37  ;;  %v1753_v22 = vsub.f32 %v4781_v29, %v4557_v36  ;;  %v1754_v45 = vsub.f32 %v4784_v54, %v4560_v11 }
 0x160   : > { %v1755_v38 = vsub.f32 %v4787_v40, %v4569_v19  ;;  %v1757_v0 = vmul.f32 2.0, %v4521_v13  ;;  %v1759_v35 = vmul.f32 2.0, %v4527_v46  ;;  %v1760_v62 = vmul.f32 2.0, %v4530_v50 }
 0x161   : > { %v1762_v7 = vmul.f32 2.0, %v4536_v52  ;;  %v1763_v29 = vmul.f32 2.0, %v4539_v43  ;;  %v1765_v54 = vmul.f32 2.0, %v4545_v48  ;;  %v1766_v40 = vmul.f32 2.0, %v4548_v10 }
 0x162   : > { %v1767_v13 = vmul.f32 2.0, %v4551_v51  ;;  %v1768_v6 = vmul.f32 2.0, %v4554_v37  ;;  %v1769_v46 = vmul.f32 2.0, %v4557_v36  ;;  %v1770_v50 = vmul.f32 2.0, %v4560_v11 }
 0x163   : > { %v1771_v49 = vmul.f32 2.0, %v4569_v19  ;;  %v1772_v52 = vmul.f32 2.0, %v4581_v58  ;;  %v4838_v33 = vadd.f32 0.0001, %v1757_v0  ;;  %v1756_v43 = vsub.f32 %v4792_v12, %v4581_v58 }
 0x164   : > { %v4842_v39 = vadd.f32 0.0001, %v1758_v55  ;;  %v4844_v48 = vadd.f32 0.0001, %v1759_v35  ;;  %v4846_v10 = vadd.f32 0.0001, %v1760_v62  ;;  %v1841_v11 = vadd.f32 %v6082_v56, %v4433_v60 }
 0x165   : > { %v4848_v51 = vadd.f32 0.0001, %v1761_v42  ;;  %v4850_v37 = vadd.f32 0.0001, %v1762_v7  ;;  %v4852_v36 = vadd.f32 0.0001, %v1763_v29  ;;  %v1842_v55 = vadd.f32 %v4498_v2, %v4440_v17 }
 0x166   : > { %6107 = vst [vmem:[#allocation33_spill] sm:$0xff] %v4842_v39  ;;  %6108 = vst [vmem:[#allocation39_spill] sm:$0xff] %v4844_v48  ;;  %v4856_v19 = vadd.f32 0.0001, %v1764_v61  ;;  %v4858_v0 = vadd.f32 0.0001, %v1765_v54  ;;  %v1843_v62 = vadd.f32 %v6083_v3, %v4447_v30  ;;  %v1844_v54 = vadd.f32 %v6084_v16, %v4454_v25 }
 0x167   : > { %6109 = vst [vmem:[#allocation45_spill] sm:$0xff] %v4846_v10  ;;  %6110 = vst [vmem:[#allocation46_spill] sm:$0xff] %v4848_v51  ;;  %v4860_v12 = vadd.f32 0.0001, %v1766_v40  ;;  %v4864_v58 = vadd.f32 0.0001, %v1767_v13 }
 0x168   : > { %6111 = vst [vmem:[#allocation47_spill] sm:$0xff] %v4850_v37  ;;  %6112 = vst [vmem:[#allocation51_spill] sm:$0xff] %v4852_v36  ;;  %v4866_v42 = vadd.f32 0.0001, %v1768_v6  ;;  %v4868_v35 = vadd.f32 0.0001, %v1769_v46 }
 0x169   : > { %6113 = vst [vmem:[#allocation52_spill] sm:$0xff] %v4856_v19  ;;  %6114 = vst [vmem:[#allocation53_spill] sm:$0xff] %v4858_v0  ;;  %v4872_v7 = vadd.f32 0.0001, %v1770_v50  ;;  %v4874_v61 = vadd.f32 0.0001, %v1771_v49 }
 0x16a   : > { %6115 = vst [vmem:[#allocation58_spill] sm:$0xff] %v4860_v12  ;;  %6116 = vst [vmem:[#allocation59_spill] sm:$0xff] %v4864_v58  ;;  %v4876_v29 = vadd.f32 0.0001, %v1772_v52  ;;  %v1789_v40 = vmul.f32 2.0, %v1741_v8  ;;  %v1790_v12 = vmul.f32 2.0, %v1742_v14 }
 0x16b   : > { %6117 = vst [vmem:[#allocation60_spill] sm:$0xff] %v4866_v42  ;;  %6118 = vst [vmem:[#allocation65_spill] sm:$0xff] %v4868_v35  ;;  %v1791_v13 = vmul.f32 2.0, %v1743_v34  ;;  %v1792_v58 = vmul.f32 2.0, %v1744_v31  ;;  %v1793_v6 = vmul.f32 2.0, %v1745_v28  ;;  %v1794_v42 = vmul.f32 2.0, %v1746_v32 }
 0x16c   : > { %6119 = vst [vmem:[#allocation66_spill] sm:$0xff] %v4872_v7  ;;  %6120 = vst [vmem:[#allocation67_spill] sm:$0xff] %v4874_v61  ;;  %v1795_v46 = vmul.f32 2.0, %v1747_v27  ;;  %v1796_v35 = vmul.f32 2.0, %v1748_v23  ;;  %v4880_v0 = vmul.f32 2.0, %v1749_v15  ;;  %v4882_v19 = vmul.f32 2.0, %v1750_v53 }
 0x16d   : > { %6121 = vst [vmem:[#allocation72_spill] sm:$0xff] %v4876_v29  ;;  %v4884_v50 = vmul.f32 2.0, %v1751_v5  ;;  %v4886_v49 = vmul.f32 2.0, %v1752_v47  ;;  %v4888_v52 = vmul.f32 2.0, %v1753_v22  ;;  %v4890_v29 = vmul.f32 2.0, %v1754_v45  ;;  %v6147_v61 = vld [vmem:[#allocation12_spill] sm:$0xff] }
 0x16e   : > { %v4892_v8 = vmul.f32 2.0, %v1755_v38  ;;  %v4894_v34 = vmul.f32 2.0, %v1756_v43  ;;  %v4896_v14 = vadd.f32 0.0009, %v1789_v40  ;;  %v4898_v31 = vadd.f32 0.0009, %v1790_v12 }
 0x16f   : > { %6122 = vst [vmem:[#allocation73_spill] sm:$0xff] %v4884_v50  ;;  %6123 = vst [vmem:[#allocation74_spill] sm:$0xff] %v4886_v49  ;;  %v4900_v28 = vadd.f32 0.0009, %v1791_v13  ;;  %v1845_v32 = vadd.f32 %v4504_v63, %v4458_v59  ;;  %v4904_v27 = vadd.f32 0.0009, %v1792_v58  ;;  %v1846_v15 = vadd.f32 %v6085_v9, %v4462_v18 }
 0x170   : > { %6124 = vst [vmem:[#allocation79_spill] sm:$0xff] %v4888_v52  ;;  %6125 = vst [vmem:[#allocation80_spill] sm:$0xff] %v4890_v29  ;;  %v4906_v23 = vadd.f32 0.0009, %v1793_v6  ;;  %v6132_v53 = vsub.f32 %v4563_v57, %v4395_v41  ;;  %v6133_v5 = vsub.f32 %v4649_v44, %v4488_v20  ;;  %v4916_v22 = vadd.f32 0.0009, %v1794_v42 }
 0x171   : > { %6126 = vst [vmem:[#allocation81_spill] sm:$0xff] %v4892_v8  ;;  %6127 = vst [vmem:[#allocation86_spill] sm:$0xff] %v4894_v34  ;;  %v4918_v45 = vadd.f32 0.0009, %v1795_v46  ;;  %v1847_v38 = vadd.f32 %v6086_v4, %v4466_v1  ;;  %v6136_v43 = vsub.f32 %v4566_v21, %v4408_v24  ;;  %v6137_v12 = vld [vmem:[#allocation49_spill] sm:$0xff]  ;;  %v6142_v44 = vld [vmem:[#allocation42_spill] sm:$0xff] }
 0x172   : > { %6128 = vst [vmem:[#allocation87_spill] sm:$0xff] %v4898_v31  ;;  %6129 = vst [vmem:[#allocation88_spill] sm:$0xff] %v4900_v28  ;;  %v1869_v47 = vadd.f32 %v6133_v5, %v6132_v53  ;;  %v6138_v58 = vsub.f32 %v4654_v26, %v6137_v12  ;;  %v4928_v13 = vadd.f32 0.0009, %v1796_v35  ;;  %v6140_v41 = vld [vmem:[#allocation133_spill] sm:$0xff]  ;;  %v6143_v42 = vld [vmem:[#allocation70_spill] sm:$0xff] }
 0x173   : > { %6130 = vst [vmem:[#allocation91_spill] sm:$0xff] %v4904_v27  ;;  %6131 = vst [vmem:[#allocation92_spill] sm:$0xff] %v4906_v23  ;;  %v6141_v57 = vld [vmem:[#allocation69_spill] sm:$0xff]  ;;  %v1849_v6 = vadd.f32 %v6143_v42, %v6142_v44  ;;  %v6144_v46 = vld [vmem:[#allocation84_spill] sm:$0xff]  ;;  %v1858_v50 = vadd.f32 0.0001, %v1842_v55 }
 0x174   : > { %6134 = vst [vmem:[#allocation93_spill] sm:$0xff] %v4916_v22  ;;  %6135 = vst [vmem:[#allocation96_spill] sm:$0xff] %v4918_v45  ;;  %v1870_v40 = vadd.f32 %v6138_v58, %v6136_v43  ;;  %v1848_v20 = vadd.f32 %v6141_v57, %v6140_v41  ;;  %v6145_v53 = vld [vmem:[#allocation37_spill] sm:$0xff]  ;;  %v6148_v7 = vld [vmem:[#allocation50_spill] sm:$0xff]  ;;  %v1885_v52 = vadd.f32 0.0009, %v1869_v47 }
 0x175   : > { %6139 = vst [vmem:[#allocation97_spill] sm:$0xff] %v4928_v13  ;;  %v6146_v5 = vsub.f32 %v6144_v46, %v6145_v53  ;;  %v6149_v45 = vsub.f32 %v6147_v61, %v6148_v7  ;;  %v6150_v24 = vld [vmem:[#allocation44_spill] sm:$0xff]  ;;  %v6151_v21 = vld [vmem:[#allocation71_spill] sm:$0xff]  ;;  %v6153_v43 = vld [vmem:[#allocation77_spill] sm:$0xff]  ;;  %v1859_v47 = vadd.f32 0.0001, %v1843_v62 }
 0x176   : > { %v1850_v22 = vadd.f32 %v6151_v21, %v6150_v24  ;;  %v6152_v26 = vld [vmem:[#allocation43_spill] sm:$0xff]  ;;  %v6154_v12 = vld [vmem:[#allocation48_spill] sm:$0xff]  ;;  %v6155_v58 = vld [vmem:[#allocation78_spill] sm:$0xff]  ;;  %v1862_v62 = vadd.f32 0.0001, %v1846_v15 }
 0x177   : > { %v1871_v36 = vadd.f32 %v6149_v45, %v6146_v5  ;;  %v1851_v35 = vadd.f32 %v6153_v43, %v6152_v26  ;;  %v1852_v13 = vadd.f32 %v6155_v58, %v6154_v12  ;;  %v6156_v37 = vld [vmem:[#allocation85_spill] sm:$0xff]  ;;  %v6157_v23 = vld [vmem:[#allocation38_spill] sm:$0xff]  ;;  %v6160_v10 = vld [vmem:[#allocation55_spill] sm:$0xff] }
 0x178   : > { %v6158_v51 = vsub.f32 %v6156_v37, %v6157_v23  ;;  %v6159_v27 = vld [vmem:[#allocation13_spill] sm:$0xff]  ;;  %v6162_v53 = vld [vmem:[#allocation6_spill] sm:$0xff]  ;;  %v6164_v45 = vld [vmem:[#allocation76_spill] sm:$0xff] }
 0x179   : > { %v6161_v28 = vsub.f32 %v6159_v27, %v6160_v10  ;;  %v1853_v48 = vadd.f32 0.0001, %v6162_v53  ;;  %v6163_v7 = vld [vmem:[#allocation25_spill] sm:$0xff]  ;;  %v6165_v5 = vsub.f32 %v6164_v45, %v4433_v60  ;;  %v6166_v34 = vld [vmem:[#allocation14_spill] sm:$0xff]  ;;  %v6168_v31 = vld [vmem:[#allocation32_spill] sm:$0xff] }
 0x17a   : > { %v1854_v61 = vadd.f32 0.0001, %v6163_v7  ;;  %v6167_v8 = vsub.f32 %v6166_v34, %v6082_v56  ;;  %v1855_v39 = vadd.f32 0.0001, %v6168_v31  ;;  %v6169_v49 = vld [vmem:[#allocation41_spill] sm:$0xff]  ;;  %v6170_v23 = vld [vmem:[#allocation83_spill] sm:$0xff] }
 0x17b   : > { %v1872_v46 = vadd.f32 %v6161_v28, %v6158_v51  ;;  %v1856_v37 = vadd.f32 0.0001, %v6169_v49  ;;  %v6171_v10 = vsub.f32 %v6170_v23, %v4440_v17  ;;  %v6172_v51 = vld [vmem:[#allocation15_spill] sm:$0xff]  ;;  %v1886_v53 = vadd.f32 0.0009, %v1870_v40  ;;  %v6174_v60 = vld [vmem:[#allocation2_spill] sm:$0xff] }
 0x17c   : > { %v1873_v29 = vadd.f32 %v6167_v8, %v6165_v5  ;;  %v6173_v28 = vsub.f32 %v6172_v51, %v4498_v2  ;;  %v1857_v7 = vadd.f32 0.0001, %v1841_v11  ;;  %v6175_v45 = vsub.f32 %v6174_v60, %v4447_v30  ;;  %v6176_v56 = vld [vmem:[#allocation17_spill] sm:$0xff]  ;;  %v6178_v5 = vld [vmem:[#allocation90_spill] sm:$0xff]  ;;  %v6180_v23 = vld [vmem:[#allocation19_spill] sm:$0xff] }
 0x17d   : > { %v6177_v8 = vsub.f32 %v6176_v56, %v6083_v3  ;;  %v1887_v31 = vadd.f32 0.0009, %v1871_v36  ;;  %v1860_v49 = vadd.f32 0.0001, %v1844_v54  ;;  %v6179_v17 = vsub.f32 %v6178_v5, %v4454_v25  ;;  %v6182_v55 = vld [vmem:[#allocation3_spill] sm:$0xff]  ;;  %v6184_v30 = vld [vmem:[#allocation20_spill] sm:$0xff] }
 0x17e   : > { %v1874_v27 = vadd.f32 %v6173_v28, %v6171_v10  ;;  %v6181_v2 = vsub.f32 %v6180_v23, %v6084_v16  ;;  %v1888_v40 = vadd.f32 0.0009, %v1872_v46  ;;  %v1861_v11 = vadd.f32 0.0001, %v1845_v32  ;;  %v6186_v54 = vld [vmem:[#allocation4_spill] sm:$0xff] }
 0x17f   : > { %v1875_v34 = vadd.f32 %v6177_v8, %v6175_v45  ;;  %v6183_v51 = vsub.f32 %v6182_v55, %v4458_v59  ;;  %v6185_v28 = vsub.f32 %v6184_v30, %v4504_v63  ;;  %v1889_v60 = vadd.f32 0.0009, %v1873_v29  ;;  %v6188_v45 = vld [vmem:[#allocation21_spill] sm:$0xff]  ;;  %v6192_v63 = vld [vmem:[#allocation27_spill] sm:$0xff]  ;;  %v6200_v55 = vld [vmem:[#allocation28_spill] sm:$0xff] }
 0x180   : > { %v1876_v10 = vadd.f32 %v6181_v2, %v6179_v17  ;;  %v4986_v36 = vmul.f32 %v1885_v52, %v1853_v48  ;;  %v6187_v25 = vsub.f32 %v6186_v54, %v4462_v18  ;;  %v6189_v16 = vsub.f32 %v6188_v45, %v6085_v9  ;;  %v6190_v59 = vld [vmem:[#allocation5_spill] sm:$0xff]  ;;  %v6194_v18 = vld [vmem:[#allocation7_spill] sm:$0xff]  ;;  %v6196_v9 = vld [vmem:[#allocation26_spill] sm:$0xff] }
 0x181   : > { %v1877_v3 = vadd.f32 %v6185_v28, %v6183_v51  ;;  %v1890_v46 = vadd.f32 0.0009, %v1874_v27  ;;  %v4994_v32 = vmul.f32 %v1886_v53, %v1854_v61  ;;  %v1863_v8 = vadd.f32 0.0001, %v1847_v38  ;;  %v6198_v2 = vld [vmem:[#allocation8_spill] sm:$0xff]  ;;  %v6208_v30 = vld [vmem:[#allocation35_spill] sm:$0xff] }
 0x182   : > { %v1878_v56 = vadd.f32 %v6189_v16, %v6187_v25  ;;  %v6191_v5 = vsub.f32 %v6190_v59, %v4466_v1  ;;  %v6193_v29 = vsub.f32 %v6192_v63, %v6086_v4  ;;  %v1891_v52 = vadd.f32 0.0009, %v1875_v34  ;;  %v6212_v54 = vld [vmem:[#allocation40_spill] sm:$0xff] }
 0x183   : > { %v5002_v15 = vmul.f32 %v1887_v31, %v1855_v39  ;;  %v1864_v17 = vadd.f32 0.0001, %v1848_v20  ;;  %v6195_v23 = vsub.f32 %v6194_v18, %v6140_v41  ;;  %v6197_v27 = vsub.f32 %v6196_v9, %v6141_v57  ;;  %v6202_v41 = vld [vmem:[#allocation9_spill] sm:$0xff]  ;;  %v6204_v57 = vld [vmem:[#allocation34_spill] sm:$0xff]  ;;  %v6217_v18 = vld [vmem:[#allocation87_spill] sm:$0xff] }
 0x184   : > { %v1879_v48 = vadd.f32 %v6193_v29, %v6191_v5  ;;  %v1892_v53 = vadd.f32 0.0009, %v1876_v10  ;;  %v5010_v38 = vmul.f32 %v1888_v40, %v1856_v37  ;;  %v6199_v1 = vsub.f32 %v6198_v2, %v6142_v44  ;;  %v6206_v44 = vld [vmem:[#allocation10_spill] sm:$0xff]  ;;  %v6219_v9 = vld [vmem:[#allocation80_spill] sm:$0xff] }
 0x185   : > { %v1880_v61 = vadd.f32 %v6197_v27, %v6195_v23  ;;  %v6201_v4 = vsub.f32 %v6200_v55, %v6143_v42  ;;  %v1893_v39 = vadd.f32 0.0009, %v1877_v3  ;;  %v5018_v31 = vmul.f32 %v1889_v60, %v1857_v7  ;;  %v6221_v2 = vld [vmem:[#allocation86_spill] sm:$0xff]  ;;  %v6222_v55 = vld [vmem:[#allocation39_spill] sm:$0xff] }
 0x186   : > { %2220 = vrcp.f32 %v4986_v36  ;;  %v6203_v20 = vsub.f32 %v6202_v41, %v6150_v24  ;;  %v6205_v10 = vsub.f32 %v6204_v57, %v6151_v21  ;;  %v1894_v40 = vadd.f32 0.0009, %v1878_v56  ;;  %v6210_v24 = vld [vmem:[#allocation11_spill] sm:$0xff]  ;;  %v6224_v41 = vld [vmem:[#allocation45_spill] sm:$0xff] }
 0x187   : > { %v1881_v34 = vadd.f32 %v6201_v4, %v6199_v1  ;;  %v5027_v51 = vmul.f32 %v1890_v46, %v1858_v50  ;;  %2222 = vrcp.f32 %v4994_v32  ;;  %v6207_v42 = vsub.f32 %v6206_v44, %v6152_v26  ;;  %v6223_v4 = vld [vmem:[#allocation88_spill] sm:$0xff]  ;;  %v6228_v44 = vld [vmem:[#allocation47_spill] sm:$0xff] }
 0x188   : > { %v1882_v37 = vadd.f32 %v6205_v10, %v6203_v20  ;;  %v6209_v7 = vsub.f32 %v6208_v30, %v6153_v43  ;;  %v1895_v3 = vadd.f32 0.0009, %v1879_v48  ;;  %v5036_v60 = vmul.f32 %v1891_v52, %v1859_v47  ;;  %v6225_v20 = vld [vmem:[#allocation91_spill] sm:$0xff]  ;;  %v6226_v10 = vld [vmem:[#allocation46_spill] sm:$0xff] }
 0x189   : > { %2224 = vrcp.f32 %v5002_v15  ;;  %v6211_v21 = vsub.f32 %v6210_v24, %v6154_v12  ;;  %v6213_v50 = vsub.f32 %v6212_v54, %v6155_v58  ;;  %v1896_v45 = vadd.f32 0.0009, %v1880_v61  ;;  %v6220_v61 = vld [vmem:[#allocation81_spill] sm:$0xff] }
 0x18a   : > { %v1883_v28 = vadd.f32 %v6209_v7, %v6207_v42  ;;  %v5045_v16 = vmul.f32 %v1892_v53, %v1860_v49  ;;  %2226 = vrcp.f32 %v5010_v38  ;;  %v1865_v26 = vadd.f32 0.0001, %v1849_v6  ;;  %v6229_v42 = vld [vmem:[#allocation93_spill] sm:$0xff] }
 0x18b   : > { %v1884_v25 = vadd.f32 %v6213_v50, %v6211_v21  ;;  %v1897_v43 = vadd.f32 0.0009, %v1881_v34  ;;  %v5048_v56 = vmul.f32 %v1893_v39, %v1861_v11  ;;  %2228 = vrcp.f32 %v5018_v31  ;;  %v6232_v21 = vld [vmem:[#allocation52_spill] sm:$0xff]  ;;  %v6233_v54 = vld [vmem:[#allocation97_spill] sm:$0xff] }
 0x18c   : > { %v1866_v47 = vadd.f32 0.0001, %v1850_v22  ;;  %v1898_v46 = vadd.f32 0.0009, %v1882_v37  ;;  %v5051_v59 = vmul.f32 %v1894_v40, %v1862_v62  ;;  %2230 = vrcp.f32 %v5027_v51  ;;  %v6227_v37 = vld [vmem:[#allocation92_spill] sm:$0xff] }
 0x18d   : > { %v1867_v12 = vadd.f32 0.0001, %v1851_v35  ;;  %v1899_v58 = vadd.f32 0.0009, %v1883_v28  ;;  %v5054_v5 = vmul.f32 %v1895_v3, %v1863_v8  ;;  %2232 = vrcp.f32 %v5036_v60  ;;  %v6214_v8 = vld [vmem:[#allocation73_spill] sm:$0xff]  ;;  %v6230_v28 = vld [vmem:[#allocation51_spill] sm:$0xff] }
 0x18e   : > { %v1868_v49 = vadd.f32 0.0001, %v1852_v13  ;;  %v1900_v63 = vadd.f32 0.0009, %v1884_v25  ;;  %v5057_v6 = vmul.f32 %v1896_v45, %v1864_v17  ;;  %2234 = vrcp.f32 %v5045_v16  ;;  %v6215_v13 = vld [vmem:[#allocation74_spill] sm:$0xff]  ;;  %v6216_v17 = vld [vmem:[#allocation33_spill] sm:$0xff] }
 0x18f   : > { %v1813_v11 = vadd.f32 0.0009, %v4880_v0  ;;  %v1821_v22 = vmul.f32 %v4896_v14, %v4838_v33  ;;  %v5063_v62 = vmul.f32 %v1897_v43, %v1865_v26  ;;  %2236 = vrcp.f32 %v5048_v56  ;;  %v6218_v33 = vld [vmem:[#allocation79_spill] sm:$0xff]  ;;  %v6231_v3 = vld [vmem:[#allocation96_spill] sm:$0xff]  ;;  %v6234_v26 = vld [vmem:[#allocation53_spill] sm:$0xff] }
 0x190   : > { %v1814_v35 = vadd.f32 0.0009, %v4882_v19  ;;  %v1815_v29 = vadd.f32 0.0009, %v6214_v8  ;;  %v5068_v48 = vmul.f32 %v1898_v46, %v1866_v47  ;;  %2238 = vrcp.f32 %v5051_v59  ;;  %v6235_v47 = vld [vmem:[#allocation58_spill] sm:$0xff]  ;;  %v6237_v8 = vld [vmem:[#allocation60_spill] sm:$0xff] }
 0x191   : > { %v1816_v52 = vadd.f32 0.0009, %v6215_v13  ;;  %v1822_v0 = vmul.f32 %v6217_v18, %v6216_v17  ;;  %v5074_v23 = vmul.f32 %v1899_v58, %v1867_v12  ;;  %2240 = vrcp.f32 %v5054_v5 }
 0x192   : > { %v1817_v14 = vadd.f32 0.0009, %v6218_v33  ;;  %v1818_v27 = vadd.f32 0.0009, %v6219_v9  ;;  %v5079_v19 = vmul.f32 %v1900_v63, %v1868_v49  ;;  %2242 = vrcp.f32 %v5057_v6  ;;  %v6236_v49 = vld [vmem:[#allocation59_spill] sm:$0xff] }
 0x193   : > { %v1819_v53 = vadd.f32 0.0009, %v6220_v61  ;;  %v1820_v1 = vadd.f32 0.0009, %v6221_v2  ;;  %v1823_v34 = vmul.f32 %v6223_v4, %v6222_v55  ;;  %2244 = vrcp.f32 %v5063_v62  ;;  %v2221_v39 = vpop.eup %2220  ;;  %v6240_v55 = vld [vmem:[#allocation67_spill] sm:$0xff] }
 0x194   : > { %v1824_v57 = vmul.f32 %v6225_v20, %v6224_v41  ;;  %v1825_v40 = vmul.f32 %v6227_v37, %v6226_v10  ;;  %v1826_v30 = vmul.f32 %v6229_v42, %v6228_v44  ;;  %2246 = vrcp.f32 %v5068_v48  ;;  %v2223_v7 = vpop.eup %2222  ;;  %v6241_v20 = vld [vmem:[#allocation72_spill] sm:$0xff] }
 0x195   : > { %v5096_v24 = vmul.f32 %v6231_v3, %v6230_v28  ;;  %v5100_v50 = vmul.f32 %v6233_v54, %v6232_v21  ;;  %2248 = vrcp.f32 %v5074_v23  ;;  %v1933_v25 = vmul.f32 %v2221_v39, %v4986_v36 }
 0x196   : > { %v2225_v45 = vpop.eup %2224  ;;  %v5105_v43 = vmul.f32 %v1813_v11, %v6234_v26  ;;  %v5108_v46 = vmul.f32 %v1814_v35, %v6235_v47  ;;  %2250 = vrcp.f32 %v5079_v19  ;;  %v1934_v12 = vmul.f32 %v2223_v7, %v4994_v32  ;;  %v6238_v11 = vld [vmem:[#allocation65_spill] sm:$0xff]  ;;  %v6239_v35 = vld [vmem:[#allocation66_spill] sm:$0xff] }
 0x197   : > { %v2227_v58 = vpop.eup %2226  ;;  %v5113_v63 = vmul.f32 %v1815_v29, %v6236_v49  ;;  %v5116_v13 = vmul.f32 %v1816_v52, %v6237_v8  ;;  %v1935_v36 = vmul.f32 %v2225_v45, %v5002_v15  ;;  %v1949_v17 = vsub.f32 2.0, %v1933_v25 }
 0x198   : > { %v2229_v18 = vpop.eup %2228  ;;  %v5120_v33 = vmul.f32 %v1817_v14, %v6238_v11  ;;  %v5123_v9 = vmul.f32 %v1818_v27, %v6239_v35  ;;  %v1936_v61 = vmul.f32 %v2227_v58, %v5010_v38  ;;  %v1950_v32 = vsub.f32 2.0, %v1934_v12 }
 0x199   : > { %v2231_v2 = vpop.eup %2230  ;;  %v5127_v29 = vmul.f32 %v1819_v53, %v6240_v55  ;;  %v1937_v52 = vmul.f32 %v2229_v18, %v5018_v31  ;;  %v1951_v4 = vsub.f32 2.0, %v1935_v36  ;;  %v1965_v41 = vmul.f32 %v2221_v39, %v1949_v17 }
 0x19a   : > { %v2233_v15 = vpop.eup %2232  ;;  %v5131_v10 = vmul.f32 %v1820_v1, %v6241_v20  ;;  %v1938_v14 = vmul.f32 %v2231_v2, %v5027_v51  ;;  %v1952_v37 = vsub.f32 2.0, %v1936_v61  ;;  %v1966_v27 = vmul.f32 %v2223_v7, %v1950_v32 }
 0x19b   : > { %v2235_v44 = vpop.eup %2234  ;;  %v1939_v38 = vmul.f32 %v2233_v15, %v5036_v60  ;;  %v1953_v42 = vsub.f32 2.0, %v1937_v52  ;;  %v1967_v28 = vmul.f32 %v2225_v45, %v1951_v4  ;;  %v5135_v3 = vmul.f32 %v1965_v41, %v1821_v22 }
 0x19c   : > { %v2237_v53 = vpop.eup %2236  ;;  %v1940_v31 = vmul.f32 %v2235_v44, %v5045_v16  ;;  %v1954_v21 = vsub.f32 2.0, %v1938_v14  ;;  %v1968_v39 = vmul.f32 %v2227_v58, %v1952_v37  ;;  %v5138_v54 = vmul.f32 %v1966_v27, %v1822_v0 }
 0x19d   : > { %v2239_v1 = vpop.eup %2238  ;;  %v1941_v25 = vmul.f32 %v2237_v53, %v5048_v56  ;;  %v1955_v51 = vsub.f32 2.0, %v1939_v38  ;;  %v1969_v26 = vmul.f32 %v2229_v18, %v1953_v42  ;;  %v5141_v7 = vmul.f32 %v1967_v28, %v1823_v34 }
 0x19e   : > { %v2241_v47 = vpop.eup %2240  ;;  %v1942_v60 = vmul.f32 %v2239_v1, %v5051_v59  ;;  %v1956_v45 = vsub.f32 2.0, %v1940_v31  ;;  %v1970_v22 = vmul.f32 %v2231_v2, %v1954_v21  ;;  %v5144_v12 = vmul.f32 %v1968_v39, %v1824_v57 }
 0x19f   : > { %v2243_v49 = vpop.eup %2242  ;;  %v1943_v16 = vmul.f32 %v2241_v47, %v5054_v5  ;;  %v1957_v58 = vsub.f32 2.0, %v1941_v25  ;;  %v1971_v0 = vmul.f32 %v2233_v15, %v1955_v51  ;;  %v1985_v8 = vmul.f32 %v1969_v26, %v1825_v40 }
 0x1a0   : > { %v2245_v36 = vpop.eup %2244  ;;  %v1944_v56 = vmul.f32 %v2243_v49, %v5057_v6  ;;  %v1958_v17 = vsub.f32 2.0, %v1942_v60  ;;  %v1972_v18 = vmul.f32 %v2235_v44, %v1956_v45  ;;  %v1986_v34 = vmul.f32 %v1970_v22, %v1826_v30 }
 0x1a1   : > { %v2247_v11 = vpop.eup %2246  ;;  %v1945_v35 = vmul.f32 %v2245_v36, %v5063_v62  ;;  %v1959_v59 = vsub.f32 2.0, %v1943_v16  ;;  %v1973_v61 = vmul.f32 %v2237_v53, %v1957_v58  ;;  %v1987_v57 = vmul.f32 %v1971_v0, %v5096_v24 }
 0x1a2   : > { %v2249_v32 = vpop.eup %2248  ;;  %v1946_v5 = vmul.f32 %v2247_v11, %v5068_v48  ;;  %v1960_v2 = vsub.f32 2.0, %v1944_v56  ;;  %v1974_v55 = vmul.f32 %v2239_v1, %v1958_v17  ;;  %v1988_v40 = vmul.f32 %v1972_v18, %v5100_v50 }
 0x1a3   : > { %v2251_v52 = vpop.eup %2250  ;;  %v1947_v6 = vmul.f32 %v2249_v32, %v5074_v23  ;;  %v1961_v4 = vsub.f32 2.0, %v1945_v35  ;;  %v1975_v30 = vmul.f32 %v2241_v47, %v1959_v59  ;;  %v1989_v41 = vmul.f32 %v1973_v61, %v5105_v43 }
 0x1a4   : > { %v1948_v62 = vmul.f32 %v2251_v52, %v5079_v19  ;;  %v1962_v15 = vsub.f32 2.0, %v1946_v5  ;;  %v1976_v20 = vmul.f32 %v2243_v49, %v1960_v2  ;;  %v1990_v24 = vmul.f32 %v1974_v55, %v5108_v46 }
 0x1a5   : > { %v1963_v48 = vsub.f32 2.0, %v1947_v6  ;;  %v1977_v14 = vmul.f32 %v2245_v36, %v1961_v4  ;;  %v1991_v37 = vmul.f32 %v1975_v30, %v5113_v63  ;;  %v1997_v50 = vsub.f32 1.0, %v5135_v3 }
 0x1a6   : > { %v1964_v27 = vsub.f32 2.0, %v1948_v62  ;;  %v1978_v23 = vmul.f32 %v2247_v11, %v1962_v15  ;;  %v1992_v44 = vmul.f32 %v1976_v20, %v5116_v13  ;;  %v1998_v43 = vsub.f32 1.0, %v5138_v54 }
 0x1a7   : > { %v1979_v38 = vmul.f32 %v2249_v32, %v1963_v48  ;;  %v1993_v19 = vmul.f32 %v1977_v14, %v5120_v33  ;;  %v1999_v42 = vsub.f32 1.0, %v5141_v7  ;;  %v2000_v46 = vsub.f32 1.0, %v5144_v12 }
 0x1a8   : > { %v1980_v63 = vmul.f32 %v2251_v52, %v1964_v27  ;;  %v1994_v28 = vmul.f32 %v1978_v23, %v5123_v9  ;;  %v2001_v13 = vsub.f32 1.0, %v1985_v8  ;;  %v2002_v3 = vsub.f32 1.0, %v1986_v34 }
 0x1a9   : > { %v1995_v53 = vmul.f32 %v1979_v38, %v5127_v29  ;;  %v2003_v31 = vsub.f32 1.0, %v1987_v57  ;;  %v2004_v33 = vsub.f32 1.0, %v1988_v40  ;;  %v2005_v21 = vsub.f32 1.0, %v1989_v41 }
 0x1aa   : > { %v1996_v39 = vmul.f32 %v1980_v63, %v5131_v10  ;;  %v2006_v54 = vsub.f32 1.0, %v1990_v24  ;;  %v2007_v1 = vsub.f32 1.0, %v1991_v37  ;;  %v2008_v25 = vsub.f32 1.0, %v1992_v44 }
 0x1ab   : > { %v2009_v51 = vsub.f32 1.0, %v1993_v19  ;;  %v2010_v26 = vsub.f32 1.0, %v1994_v28  ;;  %v2011_v7 = vsub.f32 1.0, %v1995_v53  ;;  %v2013_v47 = vmul.f32 0.5, %v1997_v50 }
 0x1ac   : > { %v2012_v9 = vsub.f32 1.0, %v1996_v39  ;;  %v2014_v60 = vmul.f32 0.5, %v1998_v43  ;;  %v2015_v29 = vmul.f32 0.5, %v1999_v42  ;;  %v2016_v45 = vmul.f32 0.5, %v2000_v46 }
 0x1ad   : > { %v2017_v22 = vmul.f32 0.5, %v2001_v13  ;;  %v2018_v12 = vmul.f32 0.5, %v2002_v3  ;;  %v2019_v49 = vmul.f32 0.5, %v2003_v31  ;;  %v2020_v10 = vmul.f32 0.5, %v2004_v33 }
 0x1ae   : > { %v2021_v16 = vmul.f32 0.5, %v2005_v21  ;;  %v2022_v58 = vmul.f32 0.5, %v2006_v54  ;;  %v2023_v0 = vmul.f32 0.5, %v2007_v1  ;;  %v2024_v8 = vmul.f32 0.5, %v2008_v25 }
 0x1af   : > { %v2025_v36 = vmul.f32 0.5, %v2009_v51  ;;  %v2026_v56 = vmul.f32 0.5, %v2010_v26  ;;  %v2027_v17 = vmul.f32 0.5, %v2011_v7  ;;  %v2028_v18 = vmul.f32 0.5, %v2012_v9 }
 0x1b0   : > { %v2029_v34 = vmax.f32 %v2013_v47, 0.0  ;;  %v2030_v11 = vmax.f32 %v2014_v60, 0.0  ;;  %v2031_v35 = vmax.f32 %v2015_v29, 0.0  ;;  %v2032_v59 = vmax.f32 %v2016_v45, 0.0 }
 0x1b1   : > { %v2033_v61 = vmax.f32 %v2017_v22, 0.0  ;;  %v2034_v57 = vmax.f32 %v2018_v12, 0.0  ;;  %v2035_v32 = vmax.f32 %v2019_v49, 0.0  ;;  %v2036_v5 = vmax.f32 %v2020_v10, 0.0 }
 0x1b2   : > { %v2037_v2 = vmax.f32 %v2021_v16, 0.0  ;;  %v2038_v55 = vmax.f32 %v2022_v58, 0.0  ;;  %v2039_v40 = vmax.f32 %v2023_v0, 0.0  ;;  %v2040_v52 = vmax.f32 %v2024_v8, 0.0 }
 0x1b3   : > { %v2041_v6 = vmax.f32 %v2025_v36, 0.0  ;;  %v2042_v4 = vmax.f32 %v2026_v56, 0.0  ;;  %v2043_v30 = vmax.f32 %v2027_v17, 0.0  ;;  %v2044_v41 = vmax.f32 %v2028_v18, 0.0 }
 0x1b4   : > { %v2045_v62 = vmin.f32 %v2029_v34, 1.0  ;;  %v2046_v15 = vmin.f32 %v2030_v11, 1.0  ;;  %v2047_v20 = vmin.f32 %v2031_v35, 1.0  ;;  %v2048_v24 = vmin.f32 %v2032_v59, 1.0 }
 0x1b5   : > { %v2049_v48 = vmin.f32 %v2033_v61, 1.0  ;;  %v2050_v14 = vmin.f32 %v2034_v57, 1.0  ;;  %v2051_v37 = vmin.f32 %v2035_v32, 1.0  ;;  %v2052_v50 = vmin.f32 %v2036_v5, 1.0 }
 0x1b6   : > { %v2053_v27 = vmin.f32 %v2037_v2, 1.0  ;;  %v2054_v23 = vmin.f32 %v2038_v55, 1.0  ;;  %v2055_v44 = vmin.f32 %v2039_v40, 1.0  ;;  %v2056_v43 = vmin.f32 %v2040_v52, 1.0  ;;  %2061 = vst [vmem:[%s5183_s26] sm:$0xff] %v2045_v62  ;;  %2062 = vst [vmem:[%s5183_s26 + $0x8] sm:$0xff] %v2046_v15 }
 0x1b7   : > { %2063 = vst [vmem:[%s5183_s26 + $0x10] sm:$0xff] %v2047_v20  ;;  %2064 = vst [vmem:[%s5183_s26 + $0x18] sm:$0xff] %v2048_v24  ;;  %v2057_v38 = vmin.f32 %v2041_v6, 1.0  ;;  %v2058_v19 = vmin.f32 %v2042_v4, 1.0  ;;  %v2059_v42 = vmin.f32 %v2043_v30, 1.0  ;;  %v2060_v46 = vmin.f32 %v2044_v41, 1.0 }
 0x1b8   : > { %2065 = vst [vmem:[%s5183_s26 + $0x20] sm:$0xff] %v2049_v48  ;;  %2066 = vst [vmem:[%s5183_s26 + $0x28] sm:$0xff] %v2050_v14 }
 0x1b9   : > { %2067 = vst [vmem:[%s5183_s26 + $0x30] sm:$0xff] %v2051_v37  ;;  %2068 = vst [vmem:[%s5183_s26 + $0x38] sm:$0xff] %v2052_v50 }
 0x1ba   : > { %2069 = vst [vmem:[%s5183_s26 + $0x40] sm:$0xff] %v2053_v27  ;;  %2070 = vst [vmem:[%s5183_s26 + $0x48] sm:$0xff] %v2054_v23 }
 0x1bb   : > { %2071 = vst [vmem:[%s5183_s26 + $0x50] sm:$0xff] %v2055_v44  ;;  %2072 = vst [vmem:[%s5183_s26 + $0x58] sm:$0xff] %v2056_v43 }
 0x1bc   : > { %2073 = vst [vmem:[%s5183_s26 + $0x60] sm:$0xff] %v2057_v38  ;;  %2074 = vst [vmem:[%s5183_s26 + $0x68] sm:$0xff] %v2058_v19 }
 0x1bd   : > { %2075 = vst [vmem:[%s5183_s26 + $0x70] sm:$0xff] %v2059_v42  ;;  %2076 = vst [vmem:[%s5183_s26 + $0x78] sm:$0xff] %v2060_v46 }
 0x1be PF: > { %s12_s11 = sadd.s32 1, %s2274_s11   ;;  %s6243_s9 = smov %s2270_s10 }
 0x1bf   : > { %p9_p6 = scmp.ge.s32.totalorder %s12_s11, 4   ;;  %s6244_s10 = smov %s6246_s12 }
 0x1c1   :  { %11 = sbr.rel (!%p9_p6) target bundleno = 2 (0x2), region = 61 }

</bundles_post_ra>
